<compile_context>
chip_gen: v6e
topology: v6e:2x2x1
jax: 0.10.0
libtpu: 0.0.40
codegen_flags: <defaults>
</compile_context>

<pallas_src>
import math

import numpy as np

import jax
import jax.numpy as jnp
from jax.experimental import pallas as pl
from jax.experimental.pallas import tpu as pltpu


# ----------------------------------------------------------------------------
# Kernel
# ----------------------------------------------------------------------------
def _make_kernel(bh, W, r2):
    """Fused 1x1-conv + SiLU + PixelShuffle kernel for one (batch, h-tile) step.

    x_ref  : (1, C_in, TN)        TN = bh*W spatial positions on the lane axis
    w_ref  : (r2, dim_out, C_in)  bf16 weight, grouped per sub-pixel g = i*r+j
    t_ref  : (r2, W, r2*W)        bf16 0/1 scatter matrices (w -> i*W*r + w*r + j)
    bsc_ref: (dim_out, r2*W)      f32 bias, pre-scattered to output lane order
    o_ref  : (1, dim_out, bh*r2*W) output, flat pixel-shuffled spatial order
    """

    def kernel(x_ref, w_ref, t_ref, bsc_ref, o_ref):
        xb = x_ref[0].astype(jnp.bfloat16)                      # (C_in, TN)

        # 1x1 conv per sub-pixel group, f32 MXU accumulation.  The
        # pre-activation is carried as bf16 for the (pure data-movement)
        # scatter matmuls; bias + SiLU are applied afterwards in f32.
        pre = []
        for g in range(r2):
            yg = jnp.dot(w_ref[g], xb, preferred_element_type=jnp.float32)
            pre.append(yg.astype(jnp.bfloat16))                 # (dim_out, TN)

        bsc = bsc_ref[...]                                      # (dim_out, r2*W)
        cols = r2 * W
        for hl in range(bh):                                    # static unroll
            sl = slice(hl * W, (hl + 1) * W)
            acc = None
            for g in range(r2):
                # scatter group g of input row hl to output lanes i*W*r + w*r + j
                part = jnp.dot(pre[g][:, sl], t_ref[g],
                               preferred_element_type=jnp.float32)
                acc = part if acc is None else acc + part       # (dim_out, r2*W)
            z = acc + bsc
            z = z * jax.nn.sigmoid(z)                           # exact SiLU (f32)
            o_ref[0, :, hl * cols:(hl + 1) * cols] = z.astype(o_ref.dtype)

    return kernel


# ----------------------------------------------------------------------------
# Tiling / VMEM sizing
# ----------------------------------------------------------------------------
def _vmem_capacity_bytes():
    try:
        return int(pltpu.get_tpu_info().vmem_capacity_bytes)
    except Exception:
        return 64 * 1024 * 1024        # conservative: v7x per-TC VMEM


def _pick_tile(H, W, c_in, dim_out, r, x_itemsize, out_itemsize, budget):
    """Pick bh (input rows per grid step).  TN = bh*W must be a multiple of 128
    (or the full image) and bh must divide H so the fused shuffle never sees a
    ragged tile."""
    r2 = r * r

    def est(bh):
        tn = bh * W
        return (2 * c_in * tn * x_itemsize              # x blocks (double buffered)
                + c_in * tn * 2                          # bf16 copy of x
                + r2 * dim_out * tn * (4 + 2)            # f32 conv results + bf16 copies
                + 2 * dim_out * tn * r2 * out_itemsize   # out blocks (double buffered)
                + 4 * dim_out * r2 * W * 4               # epilogue temps
                + 2 * r2 * dim_out * c_in * 2            # resident bf16 weight
                + 2 * r2 * W * r2 * W * 2                # scatter matrices
                + 2 * dim_out * r2 * W * 4)              # scattered bias

    structural = [d for d in range(1, H + 1)
                  if H % d == 0 and (d * W) % 128 == 0
                  and d * W <= 2048 and d <= 32]
    if not structural:
        # whole image per step; last block dim equals the full extent so the
        # 128-divisibility constraint does not apply.
        return H, est(H)
    fits = [d for d in structural if est(d) <= budget]
    bh = max(fits) if fits else min(structural)
    return bh, est(bh)


# ----------------------------------------------------------------------------
# Parameters (mirrors Upsample.__init__ / init_conv_)
# ----------------------------------------------------------------------------
def init_upsample_params(key, dim, dim_out=None, factor=2):
    """kaiming_uniform on the (dim_out, dim) base weight, each base output
    channel repeated factor^2 times contiguously (PyTorch order c*r^2 + g),
    zero bias.  Returns the flat f32 weight (dim_out*r^2, dim) and bias."""
    dim_out = dim_out or dim
    r2 = factor * factor
    fan_in = dim                                   # 1x1 kernel
    bound = math.sqrt(2.0) * math.sqrt(3.0 / fan_in)
    w_base = jax.random.uniform(key, (dim_out, dim), jnp.float32,
                                minval=-bound, maxval=bound)
    weight_flat = jnp.repeat(w_base, r2, axis=0)   # (dim_out*r^2, dim)
    bias = jnp.zeros((dim_out * r2,), jnp.float32)
    return weight_flat, bias


def prepare_upsample_params(weight_flat, bias, *, dim_out, factor):
    """One-time prep for the kernel: group the flat (dim_out*r^2, C_in) weight
    per sub-pixel g = i*r + j and pre-cast it to bf16 (no per-step cast)."""
    r2 = factor * factor
    c_out_total, c_in = weight_flat.shape
    assert c_out_total == dim_out * r2, (c_out_total, dim_out, r2)
    w_grouped = jnp.transpose(weight_flat.reshape(dim_out, r2, c_in), (1, 0, 2))
    return w_grouped.astype(jnp.bfloat16), bias.astype(jnp.float32)


# ----------------------------------------------------------------------------
# Forward
# ----------------------------------------------------------------------------
def upsample_forward(x, w_grouped, bias, *, dim_out, factor, out_dtype=None):
    """x: (B, C_in, H, W) NCHW -> (B, dim_out, H*factor, W*factor), fused
    conv1x1 + SiLU + PixelShuffle in a single Pallas kernel (one HBM pass)."""
    B, C_in, H, W = x.shape
    r = factor
    r2 = r * r
    assert w_grouped.shape == (r2, dim_out, C_in), w_grouped.shape
    out_dtype = jnp.dtype(out_dtype) if out_dtype is not None else x.dtype
    S = H * W

    cap = _vmem_capacity_bytes()
    budget = int(0.6 * cap)
    bh, est = _pick_tile(H, W, C_in, dim_out, r,
                         jnp.dtype(x.dtype).itemsize,
                         jnp.dtype(out_dtype).itemsize, budget)
    TN = bh * W
    n_tiles = H // bh
    L = TN * r2
    vmem_limit = int(min(max(int(1.5 * est), 32 * 1024 * 1024),
                         cap - 2 * 1024 * 1024,
                         127 * 1024 * 1024))

    # Constant 0/1 scatter matrices: T[g][w, i*W*r + w*r + j] = 1, g = i*r + j.
    t_np = np.zeros((r2, W, r2 * W), np.float32)
    w_idx = np.arange(W)
    for g in range(r2):
        i, j = divmod(g, r)
        t_np[g, w_idx, i * W * r + w_idx * r + j] = 1.0
    t_mats = jnp.asarray(t_np, dtype=jnp.bfloat16)

    # Bias pre-scattered to the output lane order of one h-row chunk.
    m = np.arange(r2 * W)
    g_of_m = (m // (W * r)) * r + (m % r)
    bias_scat = bias.reshape(dim_out, r2).astype(jnp.float32)[:, g_of_m]

    x3 = x.reshape(B, C_in, S)                       # free reshape, no transpose

    out_flat = pl.pallas_call(
        _make_kernel(bh, W, r2),
        out_shape=jax.ShapeDtypeStruct((B, dim_out, S * r2), out_dtype),
        grid_spec=pltpu.PrefetchScalarGridSpec(
            num_scalar_prefetch=0,
            grid=(B, n_tiles),
            in_specs=[
                pl.BlockSpec((1, C_in, TN), lambda b, t: (b, 0, t)),
                pl.BlockSpec((r2, dim_out, C_in), lambda b, t: (0, 0, 0)),
                pl.BlockSpec((r2, W, r2 * W), lambda b, t: (0, 0, 0)),
                pl.BlockSpec((dim_out, r2 * W), lambda b, t: (0, 0)),
            ],
            out_specs=pl.BlockSpec((1, dim_out, L), lambda b, t: (b, 0, t)),
        ),
        compiler_params=pltpu.CompilerParams(
            dimension_semantics=("arbitrary", "parallel"),
            vmem_limit_bytes=vmem_limit,
        ),
    )(x3, w_grouped, t_mats, bias_scat)

    # Flat spatial order is already (h, i, w, j) per channel -> free reshape.
    return out_flat.reshape(B, dim_out, H * r, W * r)


# ----------------------------------------------------------------------------
# Pure-JAX reference (mirrors the kernel's bf16 MXU / bf16 pre-activation path
# when match_kernel_precision=True; otherwise exact f32).
# ----------------------------------------------------------------------------
def upsample_reference(x, weight_flat, bias, *, dim_out, factor,
                       match_kernel_precision=True):
    B, C_in, H, W = x.shape
    r = factor
    if match_kernel_precision:
        pre = jnp.einsum('ok,bkhw->bohw',
                         weight_flat.astype(jnp.bfloat16),
                         x.astype(jnp.bfloat16),
                         preferred_element_type=jnp.float32)
        pre = pre.astype(jnp.bfloat16).astype(jnp.float32)
    else:
        pre = jnp.einsum('ok,bkhw->bohw',
                         weight_flat.astype(jnp.float32),
                         x.astype(jnp.float32))
    y = pre + bias.astype(jnp.float32)[None, :, None, None]
    y = y * jax.nn.sigmoid(y)
    y = y.reshape(B, dim_out, r, r, H, W)
    y = jnp.transpose(y, (0, 1, 4, 2, 5, 3)).reshape(B, dim_out, H * r, W * r)
    return y.astype(x.dtype)


if __name__ == "__main__":
    key = jax.random.PRNGKey(0)
    kx, kw, kdw, kb = jax.random.split(key, 4)

    B, dim, H, W = 2, 4, 16, 16
    dim_out, factor = 4, 2

    x = jax.random.normal(kx, (B, dim, H, W), jnp.float32)

    # Faithful module init (repeated base rows / zero bias), then perturbed so
    # every output channel and the bias are distinct -- a much stronger check
    # of the fused pixel-shuffle data path.
    weight_flat, bias = init_upsample_params(kw, dim, dim_out, factor)
    weight_flat = weight_flat + 0.1 * jax.random.normal(kdw, weight_flat.shape,
                                                        jnp.float32)
    bias = 0.05 * jax.random.normal(kb, bias.shape, jnp.float32)

    w_grouped, bias_f32 = prepare_upsample_params(weight_flat, bias,
                                                  dim_out=dim_out, factor=factor)

    out = upsample_forward(x, w_grouped, bias_f32, dim_out=dim_out, factor=factor)
    out = jax.block_until_ready(out)

    ref = upsample_reference(x, weight_flat, bias, dim_out=dim_out, factor=factor)
    assert out.shape == (B, dim_out, H * factor, W * factor), out.shape
    max_err = float(jnp.max(jnp.abs(out.astype(jnp.float32) - ref.astype(jnp.float32))))
    assert jnp.allclose(out, ref, atol=1e-2, rtol=1e-2), f"mismatch, max_err={max_err}"

    print("KERNEL_OK")
</pallas_src>

<mosaic_0001>
module attributes {stable_mosaic.version = 11 : i64} {
  func.func @kernel(%arg0: i32, %arg1: i32, %arg2: memref<1x4x256xf32, #tpu.memory_space<vmem>>, %arg3: memref<4x4x4xbf16, #tpu.memory_space<vmem>>, %arg4: memref<4x16x64xbf16, #tpu.memory_space<vmem>>, %arg5: memref<4x64xf32, #tpu.memory_space<vmem>>, %arg6: memref<1x4x1024xf32, #tpu.memory_space<vmem>>) attributes {dimension_semantics = [#tpu.dimension_semantics<arbitrary>, #tpu.dimension_semantics<parallel>], iteration_bounds = array<i64: 2, 1>, scalar_prefetch = 0 : i64, scratch_operands = 0 : i64, tpu.core_type = #tpu.core_type<tc>, window_params = [{transform_indices = @transform_0, window_bounds = array<i64: 1, 4, 256>}, {pipeline_mode = #tpu.pipeline_mode<synchronous>, transform_indices = @transform_1, window_bounds = array<i64: 4, 4, 4>}, {pipeline_mode = #tpu.pipeline_mode<synchronous>, transform_indices = @transform_2, window_bounds = array<i64: 4, 16, 64>}, {pipeline_mode = #tpu.pipeline_mode<synchronous>, transform_indices = @transform_3, window_bounds = array<i64: 4, 64>}, {transform_indices = @transform_4, window_bounds = array<i64: 1, 4, 1024>}]} {
    %c0 = arith.constant 0 : index
    %c0_0 = arith.constant 0 : index
    %c0_1 = arith.constant 0 : index
    %0 = vector.load %arg2[%c0, %c0_0, %c0_1] : memref<1x4x256xf32, #tpu.memory_space<vmem>>, vector<1x4x256xf32>
    %1 = vector.shape_cast %0 : vector<1x4x256xf32> to vector<4x256xf32>
    %2 = arith.truncf %1 : vector<4x256xf32> to vector<4x256xbf16>
    %c0_2 = arith.constant 0 : index
    %c0_3 = arith.constant 0 : index
    %c0_4 = arith.constant 0 : index
    %3 = vector.load %arg3[%c0_2, %c0_3, %c0_4] : memref<4x4x4xbf16, #tpu.memory_space<vmem>>, vector<1x4x4xbf16>
    %4 = vector.shape_cast %3 : vector<1x4x4xbf16> to vector<4x4xbf16>
    %cst = arith.constant dense<0.000000e+00> : vector<4x256xf32>
    %5 = tpu.matmul %4, %2, %cst {dimension_numbers = #tpu.dot_dimension_numbers<[1], [0], [0], [1], [0, 0, 1, 1], [], []>} : vector<4x4xbf16>, vector<4x256xbf16>, vector<4x256xf32> -> vector<4x256xf32>
    %6 = arith.truncf %5 : vector<4x256xf32> to vector<4x256xbf16>
    %c1 = arith.constant 1 : index
    %c0_5 = arith.constant 0 : index
    %c0_6 = arith.constant 0 : index
    %7 = vector.load %arg3[%c1, %c0_5, %c0_6] : memref<4x4x4xbf16, #tpu.memory_space<vmem>>, vector<1x4x4xbf16>
    %8 = vector.shape_cast %7 : vector<1x4x4xbf16> to vector<4x4xbf16>
    %cst_7 = arith.constant dense<0.000000e+00> : vector<4x256xf32>
    %9 = tpu.matmul %8, %2, %cst_7 {dimension_numbers = #tpu.dot_dimension_numbers<[1], [0], [0], [1], [0, 0, 1, 1], [], []>} : vector<4x4xbf16>, vector<4x256xbf16>, vector<4x256xf32> -> vector<4x256xf32>
    %10 = arith.truncf %9 : vector<4x256xf32> to vector<4x256xbf16>
    %c2 = arith.constant 2 : index
    %c0_8 = arith.constant 0 : index
    %c0_9 = arith.constant 0 : index
    %11 = vector.load %arg3[%c2, %c0_8, %c0_9] : memref<4x4x4xbf16, #tpu.memory_space<vmem>>, vector<1x4x4xbf16>
    %12 = vector.shape_cast %11 : vector<1x4x4xbf16> to vector<4x4xbf16>
    %cst_10 = arith.constant dense<0.000000e+00> : vector<4x256xf32>
    %13 = tpu.matmul %12, %2, %cst_10 {dimension_numbers = #tpu.dot_dimension_numbers<[1], [0], [0], [1], [0, 0, 1, 1], [], []>} : vector<4x4xbf16>, vector<4x256xbf16>, vector<4x256xf32> -> vector<4x256xf32>
    %14 = arith.truncf %13 : vector<4x256xf32> to vector<4x256xbf16>
    %c3 = arith.constant 3 : index
    %c0_11 = arith.constant 0 : index
    %c0_12 = arith.constant 0 : index
    %15 = vector.load %arg3[%c3, %c0_11, %c0_12] : memref<4x4x4xbf16, #tpu.memory_space<vmem>>, vector<1x4x4xbf16>
    %16 = vector.shape_cast %15 : vector<1x4x4xbf16> to vector<4x4xbf16>
    %cst_13 = arith.constant dense<0.000000e+00> : vector<4x256xf32>
    %17 = tpu.matmul %16, %2, %cst_13 {dimension_numbers = #tpu.dot_dimension_numbers<[1], [0], [0], [1], [0, 0, 1, 1], [], []>} : vector<4x4xbf16>, vector<4x256xbf16>, vector<4x256xf32> -> vector<4x256xf32>
    %18 = arith.truncf %17 : vector<4x256xf32> to vector<4x256xbf16>
    %c0_14 = arith.constant 0 : index
    %c0_15 = arith.constant 0 : index
    %19 = vector.load %arg5[%c0_14, %c0_15] : memref<4x64xf32, #tpu.memory_space<vmem>>, vector<4x64xf32>
    %20 = vector.extract_strided_slice %6 {offsets = [0, 0], sizes = [4, 16], strides = [1, 1]} : vector<4x256xbf16> to vector<4x16xbf16>
    %c0_16 = arith.constant 0 : index
    %c0_17 = arith.constant 0 : index
    %c0_18 = arith.constant 0 : index
    %21 = vector.load %arg4[%c0_16, %c0_17, %c0_18] : memref<4x16x64xbf16, #tpu.memory_space<vmem>>, vector<1x16x64xbf16>
    %22 = vector.shape_cast %21 : vector<1x16x64xbf16> to vector<16x64xbf16>
    %cst_19 = arith.constant dense<0.000000e+00> : vector<4x64xf32>
    %23 = tpu.matmul %20, %22, %cst_19 {dimension_numbers = #tpu.dot_dimension_numbers<[1], [0], [0], [1], [0, 0, 1, 1], [], []>} : vector<4x16xbf16>, vector<16x64xbf16>, vector<4x64xf32> -> vector<4x64xf32>
    %24 = vector.extract_strided_slice %10 {offsets = [0, 0], sizes = [4, 16], strides = [1, 1]} : vector<4x256xbf16> to vector<4x16xbf16>
    %c1_20 = arith.constant 1 : index
    %c0_21 = arith.constant 0 : index
    %c0_22 = arith.constant 0 : index
    %25 = vector.load %arg4[%c1_20, %c0_21, %c0_22] : memref<4x16x64xbf16, #tpu.memory_space<vmem>>, vector<1x16x64xbf16>
    %26 = vector.shape_cast %25 : vector<1x16x64xbf16> to vector<16x64xbf16>
    %cst_23 = arith.constant dense<0.000000e+00> : vector<4x64xf32>
    %27 = tpu.matmul %24, %26, %cst_23 {dimension_numbers = #tpu.dot_dimension_numbers<[1], [0], [0], [1], [0, 0, 1, 1], [], []>} : vector<4x16xbf16>, vector<16x64xbf16>, vector<4x64xf32> -> vector<4x64xf32>
    %28 = arith.addf %23, %27 : vector<4x64xf32>
    %29 = vector.extract_strided_slice %14 {offsets = [0, 0], sizes = [4, 16], strides = [1, 1]} : vector<4x256xbf16> to vector<4x16xbf16>
    %c2_24 = arith.constant 2 : index
    %c0_25 = arith.constant 0 : index
    %c0_26 = arith.constant 0 : index
    %30 = vector.load %arg4[%c2_24, %c0_25, %c0_26] : memref<4x16x64xbf16, #tpu.memory_space<vmem>>, vector<1x16x64xbf16>
    %31 = vector.shape_cast %30 : vector<1x16x64xbf16> to vector<16x64xbf16>
    %cst_27 = arith.constant dense<0.000000e+00> : vector<4x64xf32>
    %32 = tpu.matmul %29, %31, %cst_27 {dimension_numbers = #tpu.dot_dimension_numbers<[1], [0], [0], [1], [0, 0, 1, 1], [], []>} : vector<4x16xbf16>, vector<16x64xbf16>, vector<4x64xf32> -> vector<4x64xf32>
    %33 = arith.addf %28, %32 : vector<4x64xf32>
    %34 = vector.extract_strided_slice %18 {offsets = [0, 0], sizes = [4, 16], strides = [1, 1]} : vector<4x256xbf16> to vector<4x16xbf16>
    %c3_28 = arith.constant 3 : index
    %c0_29 = arith.constant 0 : index
    %c0_30 = arith.constant 0 : index
    %35 = vector.load %arg4[%c3_28, %c0_29, %c0_30] : memref<4x16x64xbf16, #tpu.memory_space<vmem>>, vector<1x16x64xbf16>
    %36 = vector.shape_cast %35 : vector<1x16x64xbf16> to vector<16x64xbf16>
    %cst_31 = arith.constant dense<0.000000e+00> : vector<4x64xf32>
    %37 = tpu.matmul %34, %36, %cst_31 {dimension_numbers = #tpu.dot_dimension_numbers<[1], [0], [0], [1], [0, 0, 1, 1], [], []>} : vector<4x16xbf16>, vector<16x64xbf16>, vector<4x64xf32> -> vector<4x64xf32>
    %38 = arith.addf %33, %37 : vector<4x64xf32>
    %39 = arith.addf %38, %19 : vector<4x64xf32>
    %40 = arith.negf %39 : vector<4x64xf32>
    %41 = math.exp %40 : vector<4x64xf32>
    %cst_32 = arith.constant 1.000000e+00 : f32
    %42 = vector.broadcast %cst_32 : f32 to vector<4x64xf32>
    %43 = arith.addf %42, %41 : vector<4x64xf32>
    %44 = arith.divf %42, %43 : vector<4x64xf32>
    %45 = arith.mulf %39, %44 : vector<4x64xf32>
    %c0_33 = arith.constant 0 : index
    %c0_34 = arith.constant 0 : index
    %c0_35 = arith.constant 0 : index
    %46 = vector.load %arg6[%c0_33, %c0_34, %c0_35] : memref<1x4x1024xf32, #tpu.memory_space<vmem>>, vector<1x4x64xf32>
    %47 = vector.shape_cast %46 : vector<1x4x64xf32> to vector<4x64xf32>
    %48 = vector.shape_cast %45 : vector<4x64xf32> to vector<1x4x64xf32>
    tpu.vector_store %arg6[%c0_33, %c0_34, %c0_35], %48 {strides = array<i32>} : memref<1x4x1024xf32, #tpu.memory_space<vmem>>, vector<1x4x64xf32>,
    %49 = vector.extract_strided_slice %6 {offsets = [0, 16], sizes = [4, 16], strides = [1, 1]} : vector<4x256xbf16> to vector<4x16xbf16>
    %c0_36 = arith.constant 0 : index
    %c0_37 = arith.constant 0 : index
    %c0_38 = arith.constant 0 : index
    %50 = vector.load %arg4[%c0_36, %c0_37, %c0_38] : memref<4x16x64xbf16, #tpu.memory_space<vmem>>, vector<1x16x64xbf16>
    %51 = vector.shape_cast %50 : vector<1x16x64xbf16> to vector<16x64xbf16>
    %cst_39 = arith.constant dense<0.000000e+00> : vector<4x64xf32>
    %52 = tpu.matmul %49, %51, %cst_39 {dimension_numbers = #tpu.dot_dimension_numbers<[1], [0], [0], [1], [0, 0, 1, 1], [], []>} : vector<4x16xbf16>, vector<16x64xbf16>, vector<4x64xf32> -> vector<4x64xf32>
    %53 = vector.extract_strided_slice %10 {offsets = [0, 16], sizes = [4, 16], strides = [1, 1]} : vector<4x256xbf16> to vector<4x16xbf16>
    %c1_40 = arith.constant 1 : index
    %c0_41 = arith.constant 0 : index
    %c0_42 = arith.constant 0 : index
    %54 = vector.load %arg4[%c1_40, %c0_41, %c0_42] : memref<4x16x64xbf16, #tpu.memory_space<vmem>>, vector<1x16x64xbf16>
    %55 = vector.shape_cast %54 : vector<1x16x64xbf16> to vector<16x64xbf16>
    %cst_43 = arith.constant dense<0.000000e+00> : vector<4x64xf32>
    %56 = tpu.matmul %53, %55, %cst_43 {dimension_numbers = #tpu.dot_dimension_numbers<[1], [0], [0], [1], [0, 0, 1, 1], [], []>} : vector<4x16xbf16>, vector<16x64xbf16>, vector<4x64xf32> -> vector<4x64xf32>
    %57 = arith.addf %52, %56 : vector<4x64xf32>
    %58 = vector.extract_strided_slice %14 {offsets = [0, 16], sizes = [4, 16], strides = [1, 1]} : vector<4x256xbf16> to vector<4x16xbf16>
    %c2_44 = arith.constant 2 : index
    %c0_45 = arith.constant 0 : index
    %c0_46 = arith.constant 0 : index
    %59 = vector.load %arg4[%c2_44, %c0_45, %c0_46] : memref<4x16x64xbf16, #tpu.memory_space<vmem>>, vector<1x16x64xbf16>
    %60 = vector.shape_cast %59 : vector<1x16x64xbf16> to vector<16x64xbf16>
    %cst_47 = arith.constant dense<0.000000e+00> : vector<4x64xf32>
    %61 = tpu.matmul %58, %60, %cst_47 {dimension_numbers = #tpu.dot_dimension_numbers<[1], [0], [0], [1], [0, 0, 1, 1], [], []>} : vector<4x16xbf16>, vector<16x64xbf16>, vector<4x64xf32> -> vector<4x64xf32>
    %62 = arith.addf %57, %61 : vector<4x64xf32>
    %63 = vector.extract_strided_slice %18 {offsets = [0, 16], sizes = [4, 16], strides = [1, 1]} : vector<4x256xbf16> to vector<4x16xbf16>
    %c3_48 = arith.constant 3 : index
    %c0_49 = arith.constant 0 : index
    %c0_50 = arith.constant 0 : index
    %64 = vector.load %arg4[%c3_48, %c0_49, %c0_50] : memref<4x16x64xbf16, #tpu.memory_space<vmem>>, vector<1x16x64xbf16>
    %65 = vector.shape_cast %64 : vector<1x16x64xbf16> to vector<16x64xbf16>
    %cst_51 = arith.constant dense<0.000000e+00> : vector<4x64xf32>
    %66 = tpu.matmul %63, %65, %cst_51 {dimension_numbers = #tpu.dot_dimension_numbers<[1], [0], [0], [1], [0, 0, 1, 1], [], []>} : vector<4x16xbf16>, vector<16x64xbf16>, vector<4x64xf32> -> vector<4x64xf32>
    %67 = arith.addf %62, %66 : vector<4x64xf32>
    %68 = arith.addf %67, %19 : vector<4x64xf32>
    %69 = arith.negf %68 : vector<4x64xf32>
    %70 = math.exp %69 : vector<4x64xf32>
    %cst_52 = arith.constant 1.000000e+00 : f32
    %71 = vector.broadcast %cst_52 : f32 to vector<4x64xf32>
    %72 = arith.addf %71, %70 : vector<4x64xf32>
    %73 = arith.divf %71, %72 : vector<4x64xf32>
    %74 = arith.mulf %68, %73 : vector<4x64xf32>
    %c0_53 = arith.constant 0 : index
    %c0_54 = arith.constant 0 : index
    %c64 = arith.constant 64 : index
    %75 = vector.load %arg6[%c0_53, %c0_54, %c64] : memref<1x4x1024xf32, #tpu.memory_space<vmem>>, vector<1x4x64xf32>
    %76 = vector.shape_cast %75 : vector<1x4x64xf32> to vector<4x64xf32>
    %77 = vector.shape_cast %74 : vector<4x64xf32> to vector<1x4x64xf32>
    tpu.vector_store %arg6[%c0_53, %c0_54, %c64], %77 {strides = array<i32>} : memref<1x4x1024xf32, #tpu.memory_space<vmem>>, vector<1x4x64xf32>,
    %78 = vector.extract_strided_slice %6 {offsets = [0, 32], sizes = [4, 16], strides = [1, 1]} : vector<4x256xbf16> to vector<4x16xbf16>
    %c0_55 = arith.constant 0 : index
    %c0_56 = arith.constant 0 : index
    %c0_57 = arith.constant 0 : index
    %79 = vector.load %arg4[%c0_55, %c0_56, %c0_57] : memref<4x16x64xbf16, #tpu.memory_space<vmem>>, vector<1x16x64xbf16>
    %80 = vector.shape_cast %79 : vector<1x16x64xbf16> to vector<16x64xbf16>
    %cst_58 = arith.constant dense<0.000000e+00> : vector<4x64xf32>
    %81 = tpu.matmul %78, %80, %cst_58 {dimension_numbers = #tpu.dot_dimension_numbers<[1], [0], [0], [1], [0, 0, 1, 1], [], []>} : vector<4x16xbf16>, vector<16x64xbf16>, vector<4x64xf32> -> vector<4x64xf32>
    %82 = vector.extract_strided_slice %10 {offsets = [0, 32], sizes = [4, 16], strides = [1, 1]} : vector<4x256xbf16> to vector<4x16xbf16>
    %c1_59 = arith.constant 1 : index
    %c0_60 = arith.constant 0 : index
    %c0_61 = arith.constant 0 : index
    %83 = vector.load %arg4[%c1_59, %c0_60, %c0_61] : memref<4x16x64xbf16, #tpu.memory_space<vmem>>, vector<1x16x64xbf16>
    %84 = vector.shape_cast %83 : vector<1x16x64xbf16> to vector<16x64xbf16>
    %cst_62 = arith.constant dense<0.000000e+00> : vector<4x64xf32>
    %85 = tpu.matmul %82, %84, %cst_62 {dimension_numbers = #tpu.dot_dimension_numbers<[1], [0], [0], [1], [0, 0, 1, 1], [], []>} : vector<4x16xbf16>, vector<16x64xbf16>, vector<4x64xf32> -> vector<4x64xf32>
    %86 = arith.addf %81, %85 : vector<4x64xf32>
    %87 = vector.extract_strided_slice %14 {offsets = [0, 32], sizes = [4, 16], strides = [1, 1]} : vector<4x256xbf16> to vector<4x16xbf16>
    %c2_63 = arith.constant 2 : index
    %c0_64 = arith.constant 0 : index
    %c0_65 = arith.constant 0 : index
    %88 = vector.load %arg4[%c2_63, %c0_64, %c0_65] : memref<4x16x64xbf16, #tpu.memory_space<vmem>>, vector<1x16x64xbf16>
    %89 = vector.shape_cast %88 : vector<1x16x64xbf16> to vector<16x64xbf16>
    %cst_66 = arith.constant dense<0.000000e+00> : vector<4x64xf32>
    %90 = tpu.matmul %87, %89, %cst_66 {dimension_numbers = #tpu.dot_dimension_numbers<[1], [0], [0], [1], [0, 0, 1, 1], [], []>} : vector<4x16xbf16>, vector<16x64xbf16>, vector<4x64xf32> -> vector<4x64xf32>
    %91 = arith.addf %86, %90 : vector<4x64xf32>
    %92 = vector.extract_strided_slice %18 {offsets = [0, 32], sizes = [4, 16], strides = [1, 1]} : vector<4x256xbf16> to vector<4x16xbf16>
    %c3_67 = arith.constant 3 : index
    %c0_68 = arith.constant 0 : index
    %c0_69 = arith.constant 0 : index
    %93 = vector.load %arg4[%c3_67, %c0_68, %c0_69] : memref<4x16x64xbf16, #tpu.memory_space<vmem>>, vector<1x16x64xbf16>
    %94 = vector.shape_cast %93 : vector<1x16x64xbf16> to vector<16x64xbf16>
    %cst_70 = arith.constant dense<0.000000e+00> : vector<4x64xf32>
    %95 = tpu.matmul %92, %94, %cst_70 {dimension_numbers = #tpu.dot_dimension_numbers<[1], [0], [0], [1], [0, 0, 1, 1], [], []>} : vector<4x16xbf16>, vector<16x64xbf16>, vector<4x64xf32> -> vector<4x64xf32>
    %96 = arith.addf %91, %95 : vector<4x64xf32>
    %97 = arith.addf %96, %19 : vector<4x64xf32>
    %98 = arith.negf %97 : vector<4x64xf32>
    %99 = math.exp %98 : vector<4x64xf32>
    %cst_71 = arith.constant 1.000000e+00 : f32
    %100 = vector.broadcast %cst_71 : f32 to vector<4x64xf32>
    %101 = arith.addf %100, %99 : vector<4x64xf32>
    %102 = arith.divf %100, %101 : vector<4x64xf32>
    %103 = arith.mulf %97, %102 : vector<4x64xf32>
    %c0_72 = arith.constant 0 : index
    %c0_73 = arith.constant 0 : index
    %c128 = arith.constant 128 : index
    %104 = vector.load %arg6[%c0_72, %c0_73, %c128] : memref<1x4x1024xf32, #tpu.memory_space<vmem>>, vector<1x4x64xf32>
    %105 = vector.shape_cast %104 : vector<1x4x64xf32> to vector<4x64xf32>
    %106 = vector.shape_cast %103 : vector<4x64xf32> to vector<1x4x64xf32>
    tpu.vector_store %arg6[%c0_72, %c0_73, %c128], %106 {strides = array<i32>} : memref<1x4x1024xf32, #tpu.memory_space<vmem>>, vector<1x4x64xf32>,
    %107 = vector.extract_strided_slice %6 {offsets = [0, 48], sizes = [4, 16], strides = [1, 1]} : vector<4x256xbf16> to vector<4x16xbf16>
    %c0_74 = arith.constant 0 : index
    %c0_75 = arith.constant 0 : index
    %c0_76 = arith.constant 0 : index
    %108 = vector.load %arg4[%c0_74, %c0_75, %c0_76] : memref<4x16x64xbf16, #tpu.memory_space<vmem>>, vector<1x16x64xbf16>
    %109 = vector.shape_cast %108 : vector<1x16x64xbf16> to vector<16x64xbf16>
    %cst_77 = arith.constant dense<0.000000e+00> : vector<4x64xf32>
    %110 = tpu.matmul %107, %109, %cst_77 {dimension_numbers = #tpu.dot_dimension_numbers<[1], [0], [0], [1], [0, 0, 1, 1], [], []>} : vector<4x16xbf16>, vector<16x64xbf16>, vector<4x64xf32> -> vector<4x64xf32>
    %111 = vector.extract_strided_slice %10 {offsets = [0, 48], sizes = [4, 16], strides = [1, 1]} : vector<4x256xbf16> to vector<4x16xbf16>
    %c1_78 = arith.constant 1 : index
    %c0_79 = arith.constant 0 : index
    %c0_80 = arith.constant 0 : index
    %112 = vector.load %arg4[%c1_78, %c0_79, %c0_80] : memref<4x16x64xbf16, #tpu.memory_space<vmem>>, vector<1x16x64xbf16>
    %113 = vector.shape_cast %112 : vector<1x16x64xbf16> to vector<16x64xbf16>
    %cst_81 = arith.constant dense<0.000000e+00> : vector<4x64xf32>
    %114 = tpu.matmul %111, %113, %cst_81 {dimension_numbers = #tpu.dot_dimension_numbers<[1], [0], [0], [1], [0, 0, 1, 1], [], []>} : vector<4x16xbf16>, vector<16x64xbf16>, vector<4x64xf32> -> vector<4x64xf32>
    %115 = arith.addf %110, %114 : vector<4x64xf32>
    %116 = vector.extract_strided_slice %14 {offsets = [0, 48], sizes = [4, 16], strides = [1, 1]} : vector<4x256xbf16> to vector<4x16xbf16>
    %c2_82 = arith.constant 2 : index
    %c0_83 = arith.constant 0 : index
    %c0_84 = arith.constant 0 : index
    %117 = vector.load %arg4[%c2_82, %c0_83, %c0_84] : memref<4x16x64xbf16, #tpu.memory_space<vmem>>, vector<1x16x64xbf16>
    %118 = vector.shape_cast %117 : vector<1x16x64xbf16> to vector<16x64xbf16>
    %cst_85 = arith.constant dense<0.000000e+00> : vector<4x64xf32>
    %119 = tpu.matmul %116, %118, %cst_85 {dimension_numbers = #tpu.dot_dimension_numbers<[1], [0], [0], [1], [0, 0, 1, 1], [], []>} : vector<4x16xbf16>, vector<16x64xbf16>, vector<4x64xf32> -> vector<4x64xf32>
    %120 = arith.addf %115, %119 : vector<4x64xf32>
    %121 = vector.extract_strided_slice %18 {offsets = [0, 48], sizes = [4, 16], strides = [1, 1]} : vector<4x256xbf16> to vector<4x16xbf16>
    %c3_86 = arith.constant 3 : index
    %c0_87 = arith.constant 0 : index
    %c0_88 = arith.constant 0 : index
    %122 = vector.load %arg4[%c3_86, %c0_87, %c0_88] : memref<4x16x64xbf16, #tpu.memory_space<vmem>>, vector<1x16x64xbf16>
    %123 = vector.shape_cast %122 : vector<1x16x64xbf16> to vector<16x64xbf16>
    %cst_89 = arith.constant dense<0.000000e+00> : vector<4x64xf32>
    %124 = tpu.matmul %121, %123, %cst_89 {dimension_numbers = #tpu.dot_dimension_numbers<[1], [0], [0], [1], [0, 0, 1, 1], [], []>} : vector<4x16xbf16>, vector<16x64xbf16>, vector<4x64xf32> -> vector<4x64xf32>
    %125 = arith.addf %120, %124 : vector<4x64xf32>
    %126 = arith.addf %125, %19 : vector<4x64xf32>
    %127 = arith.negf %126 : vector<4x64xf32>
    %128 = math.exp %127 : vector<4x64xf32>
    %cst_90 = arith.constant 1.000000e+00 : f32
    %129 = vector.broadcast %cst_90 : f32 to vector<4x64xf32>
    %130 = arith.addf %129, %128 : vector<4x64xf32>
    %131 = arith.divf %129, %130 : vector<4x64xf32>
    %132 = arith.mulf %126, %131 : vector<4x64xf32>
    %c0_91 = arith.constant 0 : index
    %c0_92 = arith.constant 0 : index
    %c192 = arith.constant 192 : index
    %133 = vector.load %arg6[%c0_91, %c0_92, %c192] : memref<1x4x1024xf32, #tpu.memory_space<vmem>>, vector<1x4x64xf32>
    %134 = vector.shape_cast %133 : vector<1x4x64xf32> to vector<4x64xf32>
    %135 = vector.shape_cast %132 : vector<4x64xf32> to vector<1x4x64xf32>
    tpu.vector_store %arg6[%c0_91, %c0_92, %c192], %135 {strides = array<i32>} : memref<1x4x1024xf32, #tpu.memory_space<vmem>>, vector<1x4x64xf32>,
    %136 = vector.extract_strided_slice %6 {offsets = [0, 64], sizes = [4, 16], strides = [1, 1]} : vector<4x256xbf16> to vector<4x16xbf16>
    %c0_93 = arith.constant 0 : index
    %c0_94 = arith.constant 0 : index
    %c0_95 = arith.constant 0 : index
    %137 = vector.load %arg4[%c0_93, %c0_94, %c0_95] : memref<4x16x64xbf16, #tpu.memory_space<vmem>>, vector<1x16x64xbf16>
    %138 = vector.shape_cast %137 : vector<1x16x64xbf16> to vector<16x64xbf16>
    %cst_96 = arith.constant dense<0.000000e+00> : vector<4x64xf32>
    %139 = tpu.matmul %136, %138, %cst_96 {dimension_numbers = #tpu.dot_dimension_numbers<[1], [0], [0], [1], [0, 0, 1, 1], [], []>} : vector<4x16xbf16>, vector<16x64xbf16>, vector<4x64xf32> -> vector<4x64xf32>
    %140 = vector.extract_strided_slice %10 {offsets = [0, 64], sizes = [4, 16], strides = [1, 1]} : vector<4x256xbf16> to vector<4x16xbf16>
    %c1_97 = arith.constant 1 : index
    %c0_98 = arith.constant 0 : index
    %c0_99 = arith.constant 0 : index
    %141 = vector.load %arg4[%c1_97, %c0_98, %c0_99] : memref<4x16x64xbf16, #tpu.memory_space<vmem>>, vector<1x16x64xbf16>
    %142 = vector.shape_cast %141 : vector<1x16x64xbf16> to vector<16x64xbf16>
    %cst_100 = arith.constant dense<0.000000e+00> : vector<4x64xf32>
    %143 = tpu.matmul %140, %142, %cst_100 {dimension_numbers = #tpu.dot_dimension_numbers<[1], [0], [0], [1], [0, 0, 1, 1], [], []>} : vector<4x16xbf16>, vector<16x64xbf16>, vector<4x64xf32> -> vector<4x64xf32>
    %144 = arith.addf %139, %143 : vector<4x64xf32>
    %145 = vector.extract_strided_slice %14 {offsets = [0, 64], sizes = [4, 16], strides = [1, 1]} : vector<4x256xbf16> to vector<4x16xbf16>
    %c2_101 = arith.constant 2 : index
    %c0_102 = arith.constant 0 : index
    %c0_103 = arith.constant 0 : index
    %146 = vector.load %arg4[%c2_101, %c0_102, %c0_103] : memref<4x16x64xbf16, #tpu.memory_space<vmem>>, vector<1x16x64xbf16>
    %147 = vector.shape_cast %146 : vector<1x16x64xbf16> to vector<16x64xbf16>
    %cst_104 = arith.constant dense<0.000000e+00> : vector<4x64xf32>
    %148 = tpu.matmul %145, %147, %cst_104 {dimension_numbers = #tpu.dot_dimension_numbers<[1], [0], [0], [1], [0, 0, 1, 1], [], []>} : vector<4x16xbf16>, vector<16x64xbf16>, vector<4x64xf32> -> vector<4x64xf32>
    %149 = arith.addf %144, %148 : vector<4x64xf32>
    %150 = vector.extract_strided_slice %18 {offsets = [0, 64], sizes = [4, 16], strides = [1, 1]} : vector<4x256xbf16> to vector<4x16xbf16>
    %c3_105 = arith.constant 3 : index
    %c0_106 = arith.constant 0 : index
    %c0_107 = arith.constant 0 : index
    %151 = vector.load %arg4[%c3_105, %c0_106, %c0_107] : memref<4x16x64xbf16, #tpu.memory_space<vmem>>, vector<1x16x64xbf16>
    %152 = vector.shape_cast %151 : vector<1x16x64xbf16> to vector<16x64xbf16>
    %cst_108 = arith.constant dense<0.000000e+00> : vector<4x64xf32>
    %153 = tpu.matmul %150, %152, %cst_108 {dimension_numbers = #tpu.dot_dimension_numbers<[1], [0], [0], [1], [0, 0, 1, 1], [], []>} : vector<4x16xbf16>, vector<16x64xbf16>, vector<4x64xf32> -> vector<4x64xf32>
    %154 = arith.addf %149, %153 : vector<4x64xf32>
    %155 = arith.addf %154, %19 : vector<4x64xf32>
    %156 = arith.negf %155 : vector<4x64xf32>
    %157 = math.exp %156 : vector<4x64xf32>
    %cst_109 = arith.constant 1.000000e+00 : f32
    %158 = vector.broadcast %cst_109 : f32 to vector<4x64xf32>
    %159 = arith.addf %158, %157 : vector<4x64xf32>
    %160 = arith.divf %158, %159 : vector<4x64xf32>
    %161 = arith.mulf %155, %160 : vector<4x64xf32>
    %c0_110 = arith.constant 0 : index
    %c0_111 = arith.constant 0 : index
    %c256 = arith.constant 256 : index
    %162 = vector.load %arg6[%c0_110, %c0_111, %c256] : memref<1x4x1024xf32, #tpu.memory_space<vmem>>, vector<1x4x64xf32>
    %163 = vector.shape_cast %162 : vector<1x4x64xf32> to vector<4x64xf32>
    %164 = vector.shape_cast %161 : vector<4x64xf32> to vector<1x4x64xf32>
    tpu.vector_store %arg6[%c0_110, %c0_111, %c256], %164 {strides = array<i32>} : memref<1x4x1024xf32, #tpu.memory_space<vmem>>, vector<1x4x64xf32>,
    %165 = vector.extract_strided_slice %6 {offsets = [0, 80], sizes = [4, 16], strides = [1, 1]} : vector<4x256xbf16> to vector<4x16xbf16>
    %c0_112 = arith.constant 0 : index
    %c0_113 = arith.constant 0 : index
    %c0_114 = arith.constant 0 : index
    %166 = vector.load %arg4[%c0_112, %c0_113, %c0_114] : memref<4x16x64xbf16, #tpu.memory_space<vmem>>, vector<1x16x64xbf16>
    %167 = vector.shape_cast %166 : vector<1x16x64xbf16> to vector<16x64xbf16>
    %cst_115 = arith.constant dense<0.000000e+00> : vector<4x64xf32>
    %168 = tpu.matmul %165, %167, %cst_115 {dimension_numbers = #tpu.dot_dimension_numbers<[1], [0], [0], [1], [0, 0, 1, 1], [], []>} : vector<4x16xbf16>, vector<16x64xbf16>, vector<4x64xf32> -> vector<4x64xf32>
    %169 = vector.extract_strided_slice %10 {offsets = [0, 80], sizes = [4, 16], strides = [1, 1]} : vector<4x256xbf16> to vector<4x16xbf16>
    %c1_116 = arith.constant 1 : index
    %c0_117 = arith.constant 0 : index
    %c0_118 = arith.constant 0 : index
    %170 = vector.load %arg4[%c1_116, %c0_117, %c0_118] : memref<4x16x64xbf16, #tpu.memory_space<vmem>>, vector<1x16x64xbf16>
    %171 = vector.shape_cast %170 : vector<1x16x64xbf16> to vector<16x64xbf16>
    %cst_119 = arith.constant dense<0.000000e+00> : vector<4x64xf32>
    %172 = tpu.matmul %169, %171, %cst_119 {dimension_numbers = #tpu.dot_dimension_numbers<[1], [0], [0], [1], [0, 0, 1, 1], [], []>} : vector<4x16xbf16>, vector<16x64xbf16>, vector<4x64xf32> -> vector<4x64xf32>
    %173 = arith.addf %168, %172 : vector<4x64xf32>
    %174 = vector.extract_strided_slice %14 {offsets = [0, 80], sizes = [4, 16], strides = [1, 1]} : vector<4x256xbf16> to vector<4x16xbf16>
    %c2_120 = arith.constant 2 : index
    %c0_121 = arith.constant 0 : index
    %c0_122 = arith.constant 0 : index
    %175 = vector.load %arg4[%c2_120, %c0_121, %c0_122] : memref<4x16x64xbf16, #tpu.memory_space<vmem>>, vector<1x16x64xbf16>
    %176 = vector.shape_cast %175 : vector<1x16x64xbf16> to vector<16x64xbf16>
    %cst_123 = arith.constant dense<0.000000e+00> : vector<4x64xf32>
    %177 = tpu.matmul %174, %176, %cst_123 {dimension_numbers = #tpu.dot_dimension_numbers<[1], [0], [0], [1], [0, 0, 1, 1], [], []>} : vector<4x16xbf16>, vector<16x64xbf16>, vector<4x64xf32> -> vector<4x64xf32>
    %178 = arith.addf %173, %177 : vector<4x64xf32>
    %179 = vector.extract_strided_slice %18 {offsets = [0, 80], sizes = [4, 16], strides = [1, 1]} : vector<4x256xbf16> to vector<4x16xbf16>
    %c3_124 = arith.constant 3 : index
    %c0_125 = arith.constant 0 : index
    %c0_126 = arith.constant 0 : index
    %180 = vector.load %arg4[%c3_124, %c0_125, %c0_126] : memref<4x16x64xbf16, #tpu.memory_space<vmem>>, vector<1x16x64xbf16>
    %181 = vector.shape_cast %180 : vector<1x16x64xbf16> to vector<16x64xbf16>
    %cst_127 = arith.constant dense<0.000000e+00> : vector<4x64xf32>
    %182 = tpu.matmul %179, %181, %cst_127 {dimension_numbers = #tpu.dot_dimension_numbers<[1], [0], [0], [1], [0, 0, 1, 1], [], []>} : vector<4x16xbf16>, vector<16x64xbf16>, vector<4x64xf32> -> vector<4x64xf32>
    %183 = arith.addf %178, %182 : vector<4x64xf32>
    %184 = arith.addf %183, %19 : vector<4x64xf32>
    %185 = arith.negf %184 : vector<4x64xf32>
    %186 = math.exp %185 : vector<4x64xf32>
    %cst_128 = arith.constant 1.000000e+00 : f32
    %187 = vector.broadcast %cst_128 : f32 to vector<4x64xf32>
    %188 = arith.addf %187, %186 : vector<4x64xf32>
    %189 = arith.divf %187, %188 : vector<4x64xf32>
    %190 = arith.mulf %184, %189 : vector<4x64xf32>
    %c0_129 = arith.constant 0 : index
    %c0_130 = arith.constant 0 : index
    %c320 = arith.constant 320 : index
    %191 = vector.load %arg6[%c0_129, %c0_130, %c320] : memref<1x4x1024xf32, #tpu.memory_space<vmem>>, vector<1x4x64xf32>
    %192 = vector.shape_cast %191 : vector<1x4x64xf32> to vector<4x64xf32>
    %193 = vector.shape_cast %190 : vector<4x64xf32> to vector<1x4x64xf32>
    tpu.vector_store %arg6[%c0_129, %c0_130, %c320], %193 {strides = array<i32>} : memref<1x4x1024xf32, #tpu.memory_space<vmem>>, vector<1x4x64xf32>,
    %194 = vector.extract_strided_slice %6 {offsets = [0, 96], sizes = [4, 16], strides = [1, 1]} : vector<4x256xbf16> to vector<4x16xbf16>
    %c0_131 = arith.constant 0 : index
    %c0_132 = arith.constant 0 : index
    %c0_133 = arith.constant 0 : index
    %195 = vector.load %arg4[%c0_131, %c0_132, %c0_133] : memref<4x16x64xbf16, #tpu.memory_space<vmem>>, vector<1x16x64xbf16>
    %196 = vector.shape_cast %195 : vector<1x16x64xbf16> to vector<16x64xbf16>
    %cst_134 = arith.constant dense<0.000000e+00> : vector<4x64xf32>
    %197 = tpu.matmul %194, %196, %cst_134 {dimension_numbers = #tpu.dot_dimension_numbers<[1], [0], [0], [1], [0, 0, 1, 1], [], []>} : vector<4x16xbf16>, vector<16x64xbf16>, vector<4x64xf32> -> vector<4x64xf32>
    %198 = vector.extract_strided_slice %10 {offsets = [0, 96], sizes = [4, 16], strides = [1, 1]} : vector<4x256xbf16> to vector<4x16xbf16>
    %c1_135 = arith.constant 1 : index
    %c0_136 = arith.constant 0 : index
    %c0_137 = arith.constant 0 : index
    %199 = vector.load %arg4[%c1_135, %c0_136, %c0_137] : memref<4x16x64xbf16, #tpu.memory_space<vmem>>, vector<1x16x64xbf16>
    %200 = vector.shape_cast %199 : vector<1x16x64xbf16> to vector<16x64xbf16>
    %cst_138 = arith.constant dense<0.000000e+00> : vector<4x64xf32>
    %201 = tpu.matmul %198, %200, %cst_138 {dimension_numbers = #tpu.dot_dimension_numbers<[1], [0], [0], [1], [0, 0, 1, 1], [], []>} : vector<4x16xbf16>, vector<16x64xbf16>, vector<4x64xf32> -> vector<4x64xf32>
    %202 = arith.addf %197, %201 : vector<4x64xf32>
    %203 = vector.extract_strided_slice %14 {offsets = [0, 96], sizes = [4, 16], strides = [1, 1]} : vector<4x256xbf16> to vector<4x16xbf16>
    %c2_139 = arith.constant 2 : index
    %c0_140 = arith.constant 0 : index
    %c0_141 = arith.constant 0 : index
    %204 = vector.load %arg4[%c2_139, %c0_140, %c0_141] : memref<4x16x64xbf16, #tpu.memory_space<vmem>>, vector<1x16x64xbf16>
    %205 = vector.shape_cast %204 : vector<1x16x64xbf16> to vector<16x64xbf16>
    %cst_142 = arith.constant dense<0.000000e+00> : vector<4x64xf32>
    %206 = tpu.matmul %203, %205, %cst_142 {dimension_numbers = #tpu.dot_dimension_numbers<[1], [0], [0], [1], [0, 0, 1, 1], [], []>} : vector<4x16xbf16>, vector<16x64xbf16>, vector<4x64xf32> -> vector<4x64xf32>
    %207 = arith.addf %202, %206 : vector<4x64xf32>
    %208 = vector.extract_strided_slice %18 {offsets = [0, 96], sizes = [4, 16], strides = [1, 1]} : vector<4x256xbf16> to vector<4x16xbf16>
    %c3_143 = arith.constant 3 : index
    %c0_144 = arith.constant 0 : index
    %c0_145 = arith.constant 0 : index
    %209 = vector.load %arg4[%c3_143, %c0_144, %c0_145] : memref<4x16x64xbf16, #tpu.memory_space<vmem>>, vector<1x16x64xbf16>
    %210 = vector.shape_cast %209 : vector<1x16x64xbf16> to vector<16x64xbf16>
    %cst_146 = arith.constant dense<0.000000e+00> : vector<4x64xf32>
    %211 = tpu.matmul %208, %210, %cst_146 {dimension_numbers = #tpu.dot_dimension_numbers<[1], [0], [0], [1], [0, 0, 1, 1], [], []>} : vector<4x16xbf16>, vector<16x64xbf16>, vector<4x64xf32> -> vector<4x64xf32>
    %212 = arith.addf %207, %211 : vector<4x64xf32>
    %213 = arith.addf %212, %19 : vector<4x64xf32>
    %214 = arith.negf %213 : vector<4x64xf32>
    %215 = math.exp %214 : vector<4x64xf32>
    %cst_147 = arith.constant 1.000000e+00 : f32
    %216 = vector.broadcast %cst_147 : f32 to vector<4x64xf32>
    %217 = arith.addf %216, %215 : vector<4x64xf32>
    %218 = arith.divf %216, %217 : vector<4x64xf32>
    %219 = arith.mulf %213, %218 : vector<4x64xf32>
    %c0_148 = arith.constant 0 : index
    %c0_149 = arith.constant 0 : index
    %c384 = arith.constant 384 : index
    %220 = vector.load %arg6[%c0_148, %c0_149, %c384] : memref<1x4x1024xf32, #tpu.memory_space<vmem>>, vector<1x4x64xf32>
    %221 = vector.shape_cast %220 : vector<1x4x64xf32> to vector<4x64xf32>
    %222 = vector.shape_cast %219 : vector<4x64xf32> to vector<1x4x64xf32>
    tpu.vector_store %arg6[%c0_148, %c0_149, %c384], %222 {strides = array<i32>} : memref<1x4x1024xf32, #tpu.memory_space<vmem>>, vector<1x4x64xf32>,
    %223 = vector.extract_strided_slice %6 {offsets = [0, 112], sizes = [4, 16], strides = [1, 1]} : vector<4x256xbf16> to vector<4x16xbf16>
    %c0_150 = arith.constant 0 : index
    %c0_151 = arith.constant 0 : index
    %c0_152 = arith.constant 0 : index
    %224 = vector.load %arg4[%c0_150, %c0_151, %c0_152] : memref<4x16x64xbf16, #tpu.memory_space<vmem>>, vector<1x16x64xbf16>
    %225 = vector.shape_cast %224 : vector<1x16x64xbf16> to vector<16x64xbf16>
    %cst_153 = arith.constant dense<0.000000e+00> : vector<4x64xf32>
    %226 = tpu.matmul %223, %225, %cst_153 {dimension_numbers = #tpu.dot_dimension_numbers<[1], [0], [0], [1], [0, 0, 1, 1], [], []>} : vector<4x16xbf16>, vector<16x64xbf16>, vector<4x64xf32> -> vector<4x64xf32>
    %227 = vector.extract_strided_slice %10 {offsets = [0, 112], sizes = [4, 16], strides = [1, 1]} : vector<4x256xbf16> to vector<4x16xbf16>
    %c1_154 = arith.constant 1 : index
    %c0_155 = arith.constant 0 : index
    %c0_156 = arith.constant 0 : index
    %228 = vector.load %arg4[%c1_154, %c0_155, %c0_156] : memref<4x16x64xbf16, #tpu.memory_space<vmem>>, vector<1x16x64xbf16>
    %229 = vector.shape_cast %228 : vector<1x16x64xbf16> to vector<16x64xbf16>
    %cst_157 = arith.constant dense<0.000000e+00> : vector<4x64xf32>
    %230 = tpu.matmul %227, %229, %cst_157 {dimension_numbers = #tpu.dot_dimension_numbers<[1], [0], [0], [1], [0, 0, 1, 1], [], []>} : vector<4x16xbf16>, vector<16x64xbf16>, vector<4x64xf32> -> vector<4x64xf32>
    %231 = arith.addf %226, %230 : vector<4x64xf32>
    %232 = vector.extract_strided_slice %14 {offsets = [0, 112], sizes = [4, 16], strides = [1, 1]} : vector<4x256xbf16> to vector<4x16xbf16>
    %c2_158 = arith.constant 2 : index
    %c0_159 = arith.constant 0 : index
    %c0_160 = arith.constant 0 : index
    %233 = vector.load %arg4[%c2_158, %c0_159, %c0_160] : memref<4x16x64xbf16, #tpu.memory_space<vmem>>, vector<1x16x64xbf16>
    %234 = vector.shape_cast %233 : vector<1x16x64xbf16> to vector<16x64xbf16>
    %cst_161 = arith.constant dense<0.000000e+00> : vector<4x64xf32>
    %235 = tpu.matmul %232, %234, %cst_161 {dimension_numbers = #tpu.dot_dimension_numbers<[1], [0], [0], [1], [0, 0, 1, 1], [], []>} : vector<4x16xbf16>, vector<16x64xbf16>, vector<4x64xf32> -> vector<4x64xf32>
    %236 = arith.addf %231, %235 : vector<4x64xf32>
    %237 = vector.extract_strided_slice %18 {offsets = [0, 112], sizes = [4, 16], strides = [1, 1]} : vector<4x256xbf16> to vector<4x16xbf16>
    %c3_162 = arith.constant 3 : index
    %c0_163 = arith.constant 0 : index
    %c0_164 = arith.constant 0 : index
    %238 = vector.load %arg4[%c3_162, %c0_163, %c0_164] : memref<4x16x64xbf16, #tpu.memory_space<vmem>>, vector<1x16x64xbf16>
    %239 = vector.shape_cast %238 : vector<1x16x64xbf16> to vector<16x64xbf16>
    %cst_165 = arith.constant dense<0.000000e+00> : vector<4x64xf32>
    %240 = tpu.matmul %237, %239, %cst_165 {dimension_numbers = #tpu.dot_dimension_numbers<[1], [0], [0], [1], [0, 0, 1, 1], [], []>} : vector<4x16xbf16>, vector<16x64xbf16>, vector<4x64xf32> -> vector<4x64xf32>
    %241 = arith.addf %236, %240 : vector<4x64xf32>
    %242 = arith.addf %241, %19 : vector<4x64xf32>
    %243 = arith.negf %242 : vector<4x64xf32>
    %244 = math.exp %243 : vector<4x64xf32>
    %cst_166 = arith.constant 1.000000e+00 : f32
    %245 = vector.broadcast %cst_166 : f32 to vector<4x64xf32>
    %246 = arith.addf %245, %244 : vector<4x64xf32>
    %247 = arith.divf %245, %246 : vector<4x64xf32>
    %248 = arith.mulf %242, %247 : vector<4x64xf32>
    %c0_167 = arith.constant 0 : index
    %c0_168 = arith.constant 0 : index
    %c448 = arith.constant 448 : index
    %249 = vector.load %arg6[%c0_167, %c0_168, %c448] : memref<1x4x1024xf32, #tpu.memory_space<vmem>>, vector<1x4x64xf32>
    %250 = vector.shape_cast %249 : vector<1x4x64xf32> to vector<4x64xf32>
    %251 = vector.shape_cast %248 : vector<4x64xf32> to vector<1x4x64xf32>
    tpu.vector_store %arg6[%c0_167, %c0_168, %c448], %251 {strides = array<i32>} : memref<1x4x1024xf32, #tpu.memory_space<vmem>>, vector<1x4x64xf32>,
    %252 = vector.extract_strided_slice %6 {offsets = [0, 128], sizes = [4, 16], strides = [1, 1]} : vector<4x256xbf16> to vector<4x16xbf16>
    %c0_169 = arith.constant 0 : index
    %c0_170 = arith.constant 0 : index
    %c0_171 = arith.constant 0 : index
    %253 = vector.load %arg4[%c0_169, %c0_170, %c0_171] : memref<4x16x64xbf16, #tpu.memory_space<vmem>>, vector<1x16x64xbf16>
    %254 = vector.shape_cast %253 : vector<1x16x64xbf16> to vector<16x64xbf16>
    %cst_172 = arith.constant dense<0.000000e+00> : vector<4x64xf32>
    %255 = tpu.matmul %252, %254, %cst_172 {dimension_numbers = #tpu.dot_dimension_numbers<[1], [0], [0], [1], [0, 0, 1, 1], [], []>} : vector<4x16xbf16>, vector<16x64xbf16>, vector<4x64xf32> -> vector<4x64xf32>
    %256 = vector.extract_strided_slice %10 {offsets = [0, 128], sizes = [4, 16], strides = [1, 1]} : vector<4x256xbf16> to vector<4x16xbf16>
    %c1_173 = arith.constant 1 : index
    %c0_174 = arith.constant 0 : index
    %c0_175 = arith.constant 0 : index
    %257 = vector.load %arg4[%c1_173, %c0_174, %c0_175] : memref<4x16x64xbf16, #tpu.memory_space<vmem>>, vector<1x16x64xbf16>
    %258 = vector.shape_cast %257 : vector<1x16x64xbf16> to vector<16x64xbf16>
    %cst_176 = arith.constant dense<0.000000e+00> : vector<4x64xf32>
    %259 = tpu.matmul %256, %258, %cst_176 {dimension_numbers = #tpu.dot_dimension_numbers<[1], [0], [0], [1], [0, 0, 1, 1], [], []>} : vector<4x16xbf16>, vector<16x64xbf16>, vector<4x64xf32> -> vector<4x64xf32>
    %260 = arith.addf %255, %259 : vector<4x64xf32>
    %261 = vector.extract_strided_slice %14 {offsets = [0, 128], sizes = [4, 16], strides = [1, 1]} : vector<4x256xbf16> to vector<4x16xbf16>
    %c2_177 = arith.constant 2 : index
    %c0_178 = arith.constant 0 : index
    %c0_179 = arith.constant 0 : index
    %262 = vector.load %arg4[%c2_177, %c0_178, %c0_179] : memref<4x16x64xbf16, #tpu.memory_space<vmem>>, vector<1x16x64xbf16>
    %263 = vector.shape_cast %262 : vector<1x16x64xbf16> to vector<16x64xbf16>
    %cst_180 = arith.constant dense<0.000000e+00> : vector<4x64xf32>
    %264 = tpu.matmul %261, %263, %cst_180 {dimension_numbers = #tpu.dot_dimension_numbers<[1], [0], [0], [1], [0, 0, 1, 1], [], []>} : vector<4x16xbf16>, vector<16x64xbf16>, vector<4x64xf32> -> vector<4x64xf32>
    %265 = arith.addf %260, %264 : vector<4x64xf32>
    %266 = vector.extract_strided_slice %18 {offsets = [0, 128], sizes = [4, 16], strides = [1, 1]} : vector<4x256xbf16> to vector<4x16xbf16>
    %c3_181 = arith.constant 3 : index
    %c0_182 = arith.constant 0 : index
    %c0_183 = arith.constant 0 : index
    %267 = vector.load %arg4[%c3_181, %c0_182, %c0_183] : memref<4x16x64xbf16, #tpu.memory_space<vmem>>, vector<1x16x64xbf16>
    %268 = vector.shape_cast %267 : vector<1x16x64xbf16> to vector<16x64xbf16>
    %cst_184 = arith.constant dense<0.000000e+00> : vector<4x64xf32>
    %269 = tpu.matmul %266, %268, %cst_184 {dimension_numbers = #tpu.dot_dimension_numbers<[1], [0], [0], [1], [0, 0, 1, 1], [], []>} : vector<4x16xbf16>, vector<16x64xbf16>, vector<4x64xf32> -> vector<4x64xf32>
    %270 = arith.addf %265, %269 : vector<4x64xf32>
    %271 = arith.addf %270, %19 : vector<4x64xf32>
    %272 = arith.negf %271 : vector<4x64xf32>
    %273 = math.exp %272 : vector<4x64xf32>
    %cst_185 = arith.constant 1.000000e+00 : f32
    %274 = vector.broadcast %cst_185 : f32 to vector<4x64xf32>
    %275 = arith.addf %274, %273 : vector<4x64xf32>
    %276 = arith.divf %274, %275 : vector<4x64xf32>
    %277 = arith.mulf %271, %276 : vector<4x64xf32>
    %c0_186 = arith.constant 0 : index
    %c0_187 = arith.constant 0 : index
    %c512 = arith.constant 512 : index
    %278 = vector.load %arg6[%c0_186, %c0_187, %c512] : memref<1x4x1024xf32, #tpu.memory_space<vmem>>, vector<1x4x64xf32>
    %279 = vector.shape_cast %278 : vector<1x4x64xf32> to vector<4x64xf32>
    %280 = vector.shape_cast %277 : vector<4x64xf32> to vector<1x4x64xf32>
    tpu.vector_store %arg6[%c0_186, %c0_187, %c512], %280 {strides = array<i32>} : memref<1x4x1024xf32, #tpu.memory_space<vmem>>, vector<1x4x64xf32>,
    %281 = vector.extract_strided_slice %6 {offsets = [0, 144], sizes = [4, 16], strides = [1, 1]} : vector<4x256xbf16> to vector<4x16xbf16>
    %c0_188 = arith.constant 0 : index
    %c0_189 = arith.constant 0 : index
    %c0_190 = arith.constant 0 : index
    %282 = vector.load %arg4[%c0_188, %c0_189, %c0_190] : memref<4x16x64xbf16, #tpu.memory_space<vmem>>, vector<1x16x64xbf16>
    %283 = vector.shape_cast %282 : vector<1x16x64xbf16> to vector<16x64xbf16>
    %cst_191 = arith.constant dense<0.000000e+00> : vector<4x64xf32>
    %284 = tpu.matmul %281, %283, %cst_191 {dimension_numbers = #tpu.dot_dimension_numbers<[1], [0], [0], [1], [0, 0, 1, 1], [], []>} : vector<4x16xbf16>, vector<16x64xbf16>, vector<4x64xf32> -> vector<4x64xf32>
    %285 = vector.extract_strided_slice %10 {offsets = [0, 144], sizes = [4, 16], strides = [1, 1]} : vector<4x256xbf16> to vector<4x16xbf16>
    %c1_192 = arith.constant 1 : index
    %c0_193 = arith.constant 0 : index
    %c0_194 = arith.constant 0 : index
    %286 = vector.load %arg4[%c1_192, %c0_193, %c0_194] : memref<4x16x64xbf16, #tpu.memory_space<vmem>>, vector<1x16x64xbf16>
    %287 = vector.shape_cast %286 : vector<1x16x64xbf16> to vector<16x64xbf16>
    %cst_195 = arith.constant dense<0.000000e+00> : vector<4x64xf32>
    %288 = tpu.matmul %285, %287, %cst_195 {dimension_numbers = #tpu.dot_dimension_numbers<[1], [0], [0], [1], [0, 0, 1, 1], [], []>} : vector<4x16xbf16>, vector<16x64xbf16>, vector<4x64xf32> -> vector<4x64xf32>
    %289 = arith.addf %284, %288 : vector<4x64xf32>
    %290 = vector.extract_strided_slice %14 {offsets = [0, 144], sizes = [4, 16], strides = [1, 1]} : vector<4x256xbf16> to vector<4x16xbf16>
    %c2_196 = arith.constant 2 : index
    %c0_197 = arith.constant 0 : index
    %c0_198 = arith.constant 0 : index
    %291 = vector.load %arg4[%c2_196, %c0_197, %c0_198] : memref<4x16x64xbf16, #tpu.memory_space<vmem>>, vector<1x16x64xbf16>
    %292 = vector.shape_cast %291 : vector<1x16x64xbf16> to vector<16x64xbf16>
    %cst_199 = arith.constant dense<0.000000e+00> : vector<4x64xf32>
    %293 = tpu.matmul %290, %292, %cst_199 {dimension_numbers = #tpu.dot_dimension_numbers<[1], [0], [0], [1], [0, 0, 1, 1], [], []>} : vector<4x16xbf16>, vector<16x64xbf16>, vector<4x64xf32> -> vector<4x64xf32>
    %294 = arith.addf %289, %293 : vector<4x64xf32>
    %295 = vector.extract_strided_slice %18 {offsets = [0, 144], sizes = [4, 16], strides = [1, 1]} : vector<4x256xbf16> to vector<4x16xbf16>
    %c3_200 = arith.constant 3 : index
    %c0_201 = arith.constant 0 : index
    %c0_202 = arith.constant 0 : index
    %296 = vector.load %arg4[%c3_200, %c0_201, %c0_202] : memref<4x16x64xbf16, #tpu.memory_space<vmem>>, vector<1x16x64xbf16>
    %297 = vector.shape_cast %296 : vector<1x16x64xbf16> to vector<16x64xbf16>
    %cst_203 = arith.constant dense<0.000000e+00> : vector<4x64xf32>
    %298 = tpu.matmul %295, %297, %cst_203 {dimension_numbers = #tpu.dot_dimension_numbers<[1], [0], [0], [1], [0, 0, 1, 1], [], []>} : vector<4x16xbf16>, vector<16x64xbf16>, vector<4x64xf32> -> vector<4x64xf32>
    %299 = arith.addf %294, %298 : vector<4x64xf32>
    %300 = arith.addf %299, %19 : vector<4x64xf32>
    %301 = arith.negf %300 : vector<4x64xf32>
    %302 = math.exp %301 : vector<4x64xf32>
    %cst_204 = arith.constant 1.000000e+00 : f32
    %303 = vector.broadcast %cst_204 : f32 to vector<4x64xf32>
    %304 = arith.addf %303, %302 : vector<4x64xf32>
    %305 = arith.divf %303, %304 : vector<4x64xf32>
    %306 = arith.mulf %300, %305 : vector<4x64xf32>
    %c0_205 = arith.constant 0 : index
    %c0_206 = arith.constant 0 : index
    %c576 = arith.constant 576 : index
    %307 = vector.load %arg6[%c0_205, %c0_206, %c576] : memref<1x4x1024xf32, #tpu.memory_space<vmem>>, vector<1x4x64xf32>
    %308 = vector.shape_cast %307 : vector<1x4x64xf32> to vector<4x64xf32>
    %309 = vector.shape_cast %306 : vector<4x64xf32> to vector<1x4x64xf32>
    tpu.vector_store %arg6[%c0_205, %c0_206, %c576], %309 {strides = array<i32>} : memref<1x4x1024xf32, #tpu.memory_space<vmem>>, vector<1x4x64xf32>,
    %310 = vector.extract_strided_slice %6 {offsets = [0, 160], sizes = [4, 16], strides = [1, 1]} : vector<4x256xbf16> to vector<4x16xbf16>
    %c0_207 = arith.constant 0 : index
    %c0_208 = arith.constant 0 : index
    %c0_209 = arith.constant 0 : index
    %311 = vector.load %arg4[%c0_207, %c0_208, %c0_209] : memref<4x16x64xbf16, #tpu.memory_space<vmem>>, vector<1x16x64xbf16>
    %312 = vector.shape_cast %311 : vector<1x16x64xbf16> to vector<16x64xbf16>
    %cst_210 = arith.constant dense<0.000000e+00> : vector<4x64xf32>
    %313 = tpu.matmul %310, %312, %cst_210 {dimension_numbers = #tpu.dot_dimension_numbers<[1], [0], [0], [1], [0, 0, 1, 1], [], []>} : vector<4x16xbf16>, vector<16x64xbf16>, vector<4x64xf32> -> vector<4x64xf32>
    %314 = vector.extract_strided_slice %10 {offsets = [0, 160], sizes = [4, 16], strides = [1, 1]} : vector<4x256xbf16> to vector<4x16xbf16>
    %c1_211 = arith.constant 1 : index
    %c0_212 = arith.constant 0 : index
    %c0_213 = arith.constant 0 : index
    %315 = vector.load %arg4[%c1_211, %c0_212, %c0_213] : memref<4x16x64xbf16, #tpu.memory_space<vmem>>, vector<1x16x64xbf16>
    %316 = vector.shape_cast %315 : vector<1x16x64xbf16> to vector<16x64xbf16>
    %cst_214 = arith.constant dense<0.000000e+00> : vector<4x64xf32>
    %317 = tpu.matmul %314, %316, %cst_214 {dimension_numbers = #tpu.dot_dimension_numbers<[1], [0], [0], [1], [0, 0, 1, 1], [], []>} : vector<4x16xbf16>, vector<16x64xbf16>, vector<4x64xf32> -> vector<4x64xf32>
    %318 = arith.addf %313, %317 : vector<4x64xf32>
    %319 = vector.extract_strided_slice %14 {offsets = [0, 160], sizes = [4, 16], strides = [1, 1]} : vector<4x256xbf16> to vector<4x16xbf16>
    %c2_215 = arith.constant 2 : index
    %c0_216 = arith.constant 0 : index
    %c0_217 = arith.constant 0 : index
    %320 = vector.load %arg4[%c2_215, %c0_216, %c0_217] : memref<4x16x64xbf16, #tpu.memory_space<vmem>>, vector<1x16x64xbf16>
    %321 = vector.shape_cast %320 : vector<1x16x64xbf16> to vector<16x64xbf16>
    %cst_218 = arith.constant dense<0.000000e+00> : vector<4x64xf32>
    %322 = tpu.matmul %319, %321, %cst_218 {dimension_numbers = #tpu.dot_dimension_numbers<[1], [0], [0], [1], [0, 0, 1, 1], [], []>} : vector<4x16xbf16>, vector<16x64xbf16>, vector<4x64xf32> -> vector<4x64xf32>
    %323 = arith.addf %318, %322 : vector<4x64xf32>
    %324 = vector.extract_strided_slice %18 {offsets = [0, 160], sizes = [4, 16], strides = [1, 1]} : vector<4x256xbf16> to vector<4x16xbf16>
    %c3_219 = arith.constant 3 : index
    %c0_220 = arith.constant 0 : index
    %c0_221 = arith.constant 0 : index
    %325 = vector.load %arg4[%c3_219, %c0_220, %c0_221] : memref<4x16x64xbf16, #tpu.memory_space<vmem>>, vector<1x16x64xbf16>
    %326 = vector.shape_cast %325 : vector<1x16x64xbf16> to vector<16x64xbf16>
    %cst_222 = arith.constant dense<0.000000e+00> : vector<4x64xf32>
    %327 = tpu.matmul %324, %326, %cst_222 {dimension_numbers = #tpu.dot_dimension_numbers<[1], [0], [0], [1], [0, 0, 1, 1], [], []>} : vector<4x16xbf16>, vector<16x64xbf16>, vector<4x64xf32> -> vector<4x64xf32>
    %328 = arith.addf %323, %327 : vector<4x64xf32>
    %329 = arith.addf %328, %19 : vector<4x64xf32>
    %330 = arith.negf %329 : vector<4x64xf32>
    %331 = math.exp %330 : vector<4x64xf32>
    %cst_223 = arith.constant 1.000000e+00 : f32
    %332 = vector.broadcast %cst_223 : f32 to vector<4x64xf32>
    %333 = arith.addf %332, %331 : vector<4x64xf32>
    %334 = arith.divf %332, %333 : vector<4x64xf32>
    %335 = arith.mulf %329, %334 : vector<4x64xf32>
    %c0_224 = arith.constant 0 : index
    %c0_225 = arith.constant 0 : index
    %c640 = arith.constant 640 : index
    %336 = vector.load %arg6[%c0_224, %c0_225, %c640] : memref<1x4x1024xf32, #tpu.memory_space<vmem>>, vector<1x4x64xf32>
    %337 = vector.shape_cast %336 : vector<1x4x64xf32> to vector<4x64xf32>
    %338 = vector.shape_cast %335 : vector<4x64xf32> to vector<1x4x64xf32>
    tpu.vector_store %arg6[%c0_224, %c0_225, %c640], %338 {strides = array<i32>} : memref<1x4x1024xf32, #tpu.memory_space<vmem>>, vector<1x4x64xf32>,
    %339 = vector.extract_strided_slice %6 {offsets = [0, 176], sizes = [4, 16], strides = [1, 1]} : vector<4x256xbf16> to vector<4x16xbf16>
    %c0_226 = arith.constant 0 : index
    %c0_227 = arith.constant 0 : index
    %c0_228 = arith.constant 0 : index
    %340 = vector.load %arg4[%c0_226, %c0_227, %c0_228] : memref<4x16x64xbf16, #tpu.memory_space<vmem>>, vector<1x16x64xbf16>
    %341 = vector.shape_cast %340 : vector<1x16x64xbf16> to vector<16x64xbf16>
    %cst_229 = arith.constant dense<0.000000e+00> : vector<4x64xf32>
    %342 = tpu.matmul %339, %341, %cst_229 {dimension_numbers = #tpu.dot_dimension_numbers<[1], [0], [0], [1], [0, 0, 1, 1], [], []>} : vector<4x16xbf16>, vector<16x64xbf16>, vector<4x64xf32> -> vector<4x64xf32>
    %343 = vector.extract_strided_slice %10 {offsets = [0, 176], sizes = [4, 16], strides = [1, 1]} : vector<4x256xbf16> to vector<4x16xbf16>
    %c1_230 = arith.constant 1 : index
    %c0_231 = arith.constant 0 : index
    %c0_232 = arith.constant 0 : index
    %344 = vector.load %arg4[%c1_230, %c0_231, %c0_232] : memref<4x16x64xbf16, #tpu.memory_space<vmem>>, vector<1x16x64xbf16>
    %345 = vector.shape_cast %344 : vector<1x16x64xbf16> to vector<16x64xbf16>
    %cst_233 = arith.constant dense<0.000000e+00> : vector<4x64xf32>
    %346 = tpu.matmul %343, %345, %cst_233 {dimension_numbers = #tpu.dot_dimension_numbers<[1], [0], [0], [1], [0, 0, 1, 1], [], []>} : vector<4x16xbf16>, vector<16x64xbf16>, vector<4x64xf32> -> vector<4x64xf32>
    %347 = arith.addf %342, %346 : vector<4x64xf32>
    %348 = vector.extract_strided_slice %14 {offsets = [0, 176], sizes = [4, 16], strides = [1, 1]} : vector<4x256xbf16> to vector<4x16xbf16>
    %c2_234 = arith.constant 2 : index
    %c0_235 = arith.constant 0 : index
    %c0_236 = arith.constant 0 : index
    %349 = vector.load %arg4[%c2_234, %c0_235, %c0_236] : memref<4x16x64xbf16, #tpu.memory_space<vmem>>, vector<1x16x64xbf16>
    %350 = vector.shape_cast %349 : vector<1x16x64xbf16> to vector<16x64xbf16>
    %cst_237 = arith.constant dense<0.000000e+00> : vector<4x64xf32>
    %351 = tpu.matmul %348, %350, %cst_237 {dimension_numbers = #tpu.dot_dimension_numbers<[1], [0], [0], [1], [0, 0, 1, 1], [], []>} : vector<4x16xbf16>, vector<16x64xbf16>, vector<4x64xf32> -> vector<4x64xf32>
    %352 = arith.addf %347, %351 : vector<4x64xf32>
    %353 = vector.extract_strided_slice %18 {offsets = [0, 176], sizes = [4, 16], strides = [1, 1]} : vector<4x256xbf16> to vector<4x16xbf16>
    %c3_238 = arith.constant 3 : index
    %c0_239 = arith.constant 0 : index
    %c0_240 = arith.constant 0 : index
    %354 = vector.load %arg4[%c3_238, %c0_239, %c0_240] : memref<4x16x64xbf16, #tpu.memory_space<vmem>>, vector<1x16x64xbf16>
    %355 = vector.shape_cast %354 : vector<1x16x64xbf16> to vector<16x64xbf16>
    %cst_241 = arith.constant dense<0.000000e+00> : vector<4x64xf32>
    %356 = tpu.matmul %353, %355, %cst_241 {dimension_numbers = #tpu.dot_dimension_numbers<[1], [0], [0], [1], [0, 0, 1, 1], [], []>} : vector<4x16xbf16>, vector<16x64xbf16>, vector<4x64xf32> -> vector<4x64xf32>
    %357 = arith.addf %352, %356 : vector<4x64xf32>
    %358 = arith.addf %357, %19 : vector<4x64xf32>
    %359 = arith.negf %358 : vector<4x64xf32>
    %360 = math.exp %359 : vector<4x64xf32>
    %cst_242 = arith.constant 1.000000e+00 : f32
    %361 = vector.broadcast %cst_242 : f32 to vector<4x64xf32>
    %362 = arith.addf %361, %360 : vector<4x64xf32>
    %363 = arith.divf %361, %362 : vector<4x64xf32>
    %364 = arith.mulf %358, %363 : vector<4x64xf32>
    %c0_243 = arith.constant 0 : index
    %c0_244 = arith.constant 0 : index
    %c704 = arith.constant 704 : index
    %365 = vector.load %arg6[%c0_243, %c0_244, %c704] : memref<1x4x1024xf32, #tpu.memory_space<vmem>>, vector<1x4x64xf32>
    %366 = vector.shape_cast %365 : vector<1x4x64xf32> to vector<4x64xf32>
    %367 = vector.shape_cast %364 : vector<4x64xf32> to vector<1x4x64xf32>
    tpu.vector_store %arg6[%c0_243, %c0_244, %c704], %367 {strides = array<i32>} : memref<1x4x1024xf32, #tpu.memory_space<vmem>>, vector<1x4x64xf32>,
    %368 = vector.extract_strided_slice %6 {offsets = [0, 192], sizes = [4, 16], strides = [1, 1]} : vector<4x256xbf16> to vector<4x16xbf16>
    %c0_245 = arith.constant 0 : index
    %c0_246 = arith.constant 0 : index
    %c0_247 = arith.constant 0 : index
    %369 = vector.load %arg4[%c0_245, %c0_246, %c0_247] : memref<4x16x64xbf16, #tpu.memory_space<vmem>>, vector<1x16x64xbf16>
    %370 = vector.shape_cast %369 : vector<1x16x64xbf16> to vector<16x64xbf16>
    %cst_248 = arith.constant dense<0.000000e+00> : vector<4x64xf32>
    %371 = tpu.matmul %368, %370, %cst_248 {dimension_numbers = #tpu.dot_dimension_numbers<[1], [0], [0], [1], [0, 0, 1, 1], [], []>} : vector<4x16xbf16>, vector<16x64xbf16>, vector<4x64xf32> -> vector<4x64xf32>
    %372 = vector.extract_strided_slice %10 {offsets = [0, 192], sizes = [4, 16], strides = [1, 1]} : vector<4x256xbf16> to vector<4x16xbf16>
    %c1_249 = arith.constant 1 : index
    %c0_250 = arith.constant 0 : index
    %c0_251 = arith.constant 0 : index
    %373 = vector.load %arg4[%c1_249, %c0_250, %c0_251] : memref<4x16x64xbf16, #tpu.memory_space<vmem>>, vector<1x16x64xbf16>
    %374 = vector.shape_cast %373 : vector<1x16x64xbf16> to vector<16x64xbf16>
    %cst_252 = arith.constant dense<0.000000e+00> : vector<4x64xf32>
    %375 = tpu.matmul %372, %374, %cst_252 {dimension_numbers = #tpu.dot_dimension_numbers<[1], [0], [0], [1], [0, 0, 1, 1], [], []>} : vector<4x16xbf16>, vector<16x64xbf16>, vector<4x64xf32> -> vector<4x64xf32>
    %376 = arith.addf %371, %375 : vector<4x64xf32>
    %377 = vector.extract_strided_slice %14 {offsets = [0, 192], sizes = [4, 16], strides = [1, 1]} : vector<4x256xbf16> to vector<4x16xbf16>
    %c2_253 = arith.constant 2 : index
    %c0_254 = arith.constant 0 : index
    %c0_255 = arith.constant 0 : index
    %378 = vector.load %arg4[%c2_253, %c0_254, %c0_255] : memref<4x16x64xbf16, #tpu.memory_space<vmem>>, vector<1x16x64xbf16>
    %379 = vector.shape_cast %378 : vector<1x16x64xbf16> to vector<16x64xbf16>
    %cst_256 = arith.constant dense<0.000000e+00> : vector<4x64xf32>
    %380 = tpu.matmul %377, %379, %cst_256 {dimension_numbers = #tpu.dot_dimension_numbers<[1], [0], [0], [1], [0, 0, 1, 1], [], []>} : vector<4x16xbf16>, vector<16x64xbf16>, vector<4x64xf32> -> vector<4x64xf32>
    %381 = arith.addf %376, %380 : vector<4x64xf32>
    %382 = vector.extract_strided_slice %18 {offsets = [0, 192], sizes = [4, 16], strides = [1, 1]} : vector<4x256xbf16> to vector<4x16xbf16>
    %c3_257 = arith.constant 3 : index
    %c0_258 = arith.constant 0 : index
    %c0_259 = arith.constant 0 : index
    %383 = vector.load %arg4[%c3_257, %c0_258, %c0_259] : memref<4x16x64xbf16, #tpu.memory_space<vmem>>, vector<1x16x64xbf16>
    %384 = vector.shape_cast %383 : vector<1x16x64xbf16> to vector<16x64xbf16>
    %cst_260 = arith.constant dense<0.000000e+00> : vector<4x64xf32>
    %385 = tpu.matmul %382, %384, %cst_260 {dimension_numbers = #tpu.dot_dimension_numbers<[1], [0], [0], [1], [0, 0, 1, 1], [], []>} : vector<4x16xbf16>, vector<16x64xbf16>, vector<4x64xf32> -> vector<4x64xf32>
    %386 = arith.addf %381, %385 : vector<4x64xf32>
    %387 = arith.addf %386, %19 : vector<4x64xf32>
    %388 = arith.negf %387 : vector<4x64xf32>
    %389 = math.exp %388 : vector<4x64xf32>
    %cst_261 = arith.constant 1.000000e+00 : f32
    %390 = vector.broadcast %cst_261 : f32 to vector<4x64xf32>
    %391 = arith.addf %390, %389 : vector<4x64xf32>
    %392 = arith.divf %390, %391 : vector<4x64xf32>
    %393 = arith.mulf %387, %392 : vector<4x64xf32>
    %c0_262 = arith.constant 0 : index
    %c0_263 = arith.constant 0 : index
    %c768 = arith.constant 768 : index
    %394 = vector.load %arg6[%c0_262, %c0_263, %c768] : memref<1x4x1024xf32, #tpu.memory_space<vmem>>, vector<1x4x64xf32>
    %395 = vector.shape_cast %394 : vector<1x4x64xf32> to vector<4x64xf32>
    %396 = vector.shape_cast %393 : vector<4x64xf32> to vector<1x4x64xf32>
    tpu.vector_store %arg6[%c0_262, %c0_263, %c768], %396 {strides = array<i32>} : memref<1x4x1024xf32, #tpu.memory_space<vmem>>, vector<1x4x64xf32>,
    %397 = vector.extract_strided_slice %6 {offsets = [0, 208], sizes = [4, 16], strides = [1, 1]} : vector<4x256xbf16> to vector<4x16xbf16>
    %c0_264 = arith.constant 0 : index
    %c0_265 = arith.constant 0 : index
    %c0_266 = arith.constant 0 : index
    %398 = vector.load %arg4[%c0_264, %c0_265, %c0_266] : memref<4x16x64xbf16, #tpu.memory_space<vmem>>, vector<1x16x64xbf16>
    %399 = vector.shape_cast %398 : vector<1x16x64xbf16> to vector<16x64xbf16>
    %cst_267 = arith.constant dense<0.000000e+00> : vector<4x64xf32>
    %400 = tpu.matmul %397, %399, %cst_267 {dimension_numbers = #tpu.dot_dimension_numbers<[1], [0], [0], [1], [0, 0, 1, 1], [], []>} : vector<4x16xbf16>, vector<16x64xbf16>, vector<4x64xf32> -> vector<4x64xf32>
    %401 = vector.extract_strided_slice %10 {offsets = [0, 208], sizes = [4, 16], strides = [1, 1]} : vector<4x256xbf16> to vector<4x16xbf16>
    %c1_268 = arith.constant 1 : index
    %c0_269 = arith.constant 0 : index
    %c0_270 = arith.constant 0 : index
    %402 = vector.load %arg4[%c1_268, %c0_269, %c0_270] : memref<4x16x64xbf16, #tpu.memory_space<vmem>>, vector<1x16x64xbf16>
    %403 = vector.shape_cast %402 : vector<1x16x64xbf16> to vector<16x64xbf16>
    %cst_271 = arith.constant dense<0.000000e+00> : vector<4x64xf32>
    %404 = tpu.matmul %401, %403, %cst_271 {dimension_numbers = #tpu.dot_dimension_numbers<[1], [0], [0], [1], [0, 0, 1, 1], [], []>} : vector<4x16xbf16>, vector<16x64xbf16>, vector<4x64xf32> -> vector<4x64xf32>
    %405 = arith.addf %400, %404 : vector<4x64xf32>
    %406 = vector.extract_strided_slice %14 {offsets = [0, 208], sizes = [4, 16], strides = [1, 1]} : vector<4x256xbf16> to vector<4x16xbf16>
    %c2_272 = arith.constant 2 : index
    %c0_273 = arith.constant 0 : index
    %c0_274 = arith.constant 0 : index
    %407 = vector.load %arg4[%c2_272, %c0_273, %c0_274] : memref<4x16x64xbf16, #tpu.memory_space<vmem>>, vector<1x16x64xbf16>
    %408 = vector.shape_cast %407 : vector<1x16x64xbf16> to vector<16x64xbf16>
    %cst_275 = arith.constant dense<0.000000e+00> : vector<4x64xf32>
    %409 = tpu.matmul %406, %408, %cst_275 {dimension_numbers = #tpu.dot_dimension_numbers<[1], [0], [0], [1], [0, 0, 1, 1], [], []>} : vector<4x16xbf16>, vector<16x64xbf16>, vector<4x64xf32> -> vector<4x64xf32>
    %410 = arith.addf %405, %409 : vector<4x64xf32>
    %411 = vector.extract_strided_slice %18 {offsets = [0, 208], sizes = [4, 16], strides = [1, 1]} : vector<4x256xbf16> to vector<4x16xbf16>
    %c3_276 = arith.constant 3 : index
    %c0_277 = arith.constant 0 : index
    %c0_278 = arith.constant 0 : index
    %412 = vector.load %arg4[%c3_276, %c0_277, %c0_278] : memref<4x16x64xbf16, #tpu.memory_space<vmem>>, vector<1x16x64xbf16>
    %413 = vector.shape_cast %412 : vector<1x16x64xbf16> to vector<16x64xbf16>
    %cst_279 = arith.constant dense<0.000000e+00> : vector<4x64xf32>
    %414 = tpu.matmul %411, %413, %cst_279 {dimension_numbers = #tpu.dot_dimension_numbers<[1], [0], [0], [1], [0, 0, 1, 1], [], []>} : vector<4x16xbf16>, vector<16x64xbf16>, vector<4x64xf32> -> vector<4x64xf32>
    %415 = arith.addf %410, %414 : vector<4x64xf32>
    %416 = arith.addf %415, %19 : vector<4x64xf32>
    %417 = arith.negf %416 : vector<4x64xf32>
    %418 = math.exp %417 : vector<4x64xf32>
    %cst_280 = arith.constant 1.000000e+00 : f32
    %419 = vector.broadcast %cst_280 : f32 to vector<4x64xf32>
    %420 = arith.addf %419, %418 : vector<4x64xf32>
    %421 = arith.divf %419, %420 : vector<4x64xf32>
    %422 = arith.mulf %416, %421 : vector<4x64xf32>
    %c0_281 = arith.constant 0 : index
    %c0_282 = arith.constant 0 : index
    %c832 = arith.constant 832 : index
    %423 = vector.load %arg6[%c0_281, %c0_282, %c832] : memref<1x4x1024xf32, #tpu.memory_space<vmem>>, vector<1x4x64xf32>
    %424 = vector.shape_cast %423 : vector<1x4x64xf32> to vector<4x64xf32>
    %425 = vector.shape_cast %422 : vector<4x64xf32> to vector<1x4x64xf32>
    tpu.vector_store %arg6[%c0_281, %c0_282, %c832], %425 {strides = array<i32>} : memref<1x4x1024xf32, #tpu.memory_space<vmem>>, vector<1x4x64xf32>,
    %426 = vector.extract_strided_slice %6 {offsets = [0, 224], sizes = [4, 16], strides = [1, 1]} : vector<4x256xbf16> to vector<4x16xbf16>
    %c0_283 = arith.constant 0 : index
    %c0_284 = arith.constant 0 : index
    %c0_285 = arith.constant 0 : index
    %427 = vector.load %arg4[%c0_283, %c0_284, %c0_285] : memref<4x16x64xbf16, #tpu.memory_space<vmem>>, vector<1x16x64xbf16>
    %428 = vector.shape_cast %427 : vector<1x16x64xbf16> to vector<16x64xbf16>
    %cst_286 = arith.constant dense<0.000000e+00> : vector<4x64xf32>
    %429 = tpu.matmul %426, %428, %cst_286 {dimension_numbers = #tpu.dot_dimension_numbers<[1], [0], [0], [1], [0, 0, 1, 1], [], []>} : vector<4x16xbf16>, vector<16x64xbf16>, vector<4x64xf32> -> vector<4x64xf32>
    %430 = vector.extract_strided_slice %10 {offsets = [0, 224], sizes = [4, 16], strides = [1, 1]} : vector<4x256xbf16> to vector<4x16xbf16>
    %c1_287 = arith.constant 1 : index
    %c0_288 = arith.constant 0 : index
    %c0_289 = arith.constant 0 : index
    %431 = vector.load %arg4[%c1_287, %c0_288, %c0_289] : memref<4x16x64xbf16, #tpu.memory_space<vmem>>, vector<1x16x64xbf16>
    %432 = vector.shape_cast %431 : vector<1x16x64xbf16> to vector<16x64xbf16>
    %cst_290 = arith.constant dense<0.000000e+00> : vector<4x64xf32>
    %433 = tpu.matmul %430, %432, %cst_290 {dimension_numbers = #tpu.dot_dimension_numbers<[1], [0], [0], [1], [0, 0, 1, 1], [], []>} : vector<4x16xbf16>, vector<16x64xbf16>, vector<4x64xf32> -> vector<4x64xf32>
    %434 = arith.addf %429, %433 : vector<4x64xf32>
    %435 = vector.extract_strided_slice %14 {offsets = [0, 224], sizes = [4, 16], strides = [1, 1]} : vector<4x256xbf16> to vector<4x16xbf16>
    %c2_291 = arith.constant 2 : index
    %c0_292 = arith.constant 0 : index
    %c0_293 = arith.constant 0 : index
    %436 = vector.load %arg4[%c2_291, %c0_292, %c0_293] : memref<4x16x64xbf16, #tpu.memory_space<vmem>>, vector<1x16x64xbf16>
    %437 = vector.shape_cast %436 : vector<1x16x64xbf16> to vector<16x64xbf16>
    %cst_294 = arith.constant dense<0.000000e+00> : vector<4x64xf32>
    %438 = tpu.matmul %435, %437, %cst_294 {dimension_numbers = #tpu.dot_dimension_numbers<[1], [0], [0], [1], [0, 0, 1, 1], [], []>} : vector<4x16xbf16>, vector<16x64xbf16>, vector<4x64xf32> -> vector<4x64xf32>
    %439 = arith.addf %434, %438 : vector<4x64xf32>
    %440 = vector.extract_strided_slice %18 {offsets = [0, 224], sizes = [4, 16], strides = [1, 1]} : vector<4x256xbf16> to vector<4x16xbf16>
    %c3_295 = arith.constant 3 : index
    %c0_296 = arith.constant 0 : index
    %c0_297 = arith.constant 0 : index
    %441 = vector.load %arg4[%c3_295, %c0_296, %c0_297] : memref<4x16x64xbf16, #tpu.memory_space<vmem>>, vector<1x16x64xbf16>
    %442 = vector.shape_cast %441 : vector<1x16x64xbf16> to vector<16x64xbf16>
    %cst_298 = arith.constant dense<0.000000e+00> : vector<4x64xf32>
    %443 = tpu.matmul %440, %442, %cst_298 {dimension_numbers = #tpu.dot_dimension_numbers<[1], [0], [0], [1], [0, 0, 1, 1], [], []>} : vector<4x16xbf16>, vector<16x64xbf16>, vector<4x64xf32> -> vector<4x64xf32>
    %444 = arith.addf %439, %443 : vector<4x64xf32>
    %445 = arith.addf %444, %19 : vector<4x64xf32>
    %446 = arith.negf %445 : vector<4x64xf32>
    %447 = math.exp %446 : vector<4x64xf32>
    %cst_299 = arith.constant 1.000000e+00 : f32
    %448 = vector.broadcast %cst_299 : f32 to vector<4x64xf32>
    %449 = arith.addf %448, %447 : vector<4x64xf32>
    %450 = arith.divf %448, %449 : vector<4x64xf32>
    %451 = arith.mulf %445, %450 : vector<4x64xf32>
    %c0_300 = arith.constant 0 : index
    %c0_301 = arith.constant 0 : index
    %c896 = arith.constant 896 : index
    %452 = vector.load %arg6[%c0_300, %c0_301, %c896] : memref<1x4x1024xf32, #tpu.memory_space<vmem>>, vector<1x4x64xf32>
    %453 = vector.shape_cast %452 : vector<1x4x64xf32> to vector<4x64xf32>
    %454 = vector.shape_cast %451 : vector<4x64xf32> to vector<1x4x64xf32>
    tpu.vector_store %arg6[%c0_300, %c0_301, %c896], %454 {strides = array<i32>} : memref<1x4x1024xf32, #tpu.memory_space<vmem>>, vector<1x4x64xf32>,
    %455 = vector.extract_strided_slice %6 {offsets = [0, 240], sizes = [4, 16], strides = [1, 1]} : vector<4x256xbf16> to vector<4x16xbf16>
    %c0_302 = arith.constant 0 : index
    %c0_303 = arith.constant 0 : index
    %c0_304 = arith.constant 0 : index
    %456 = vector.load %arg4[%c0_302, %c0_303, %c0_304] : memref<4x16x64xbf16, #tpu.memory_space<vmem>>, vector<1x16x64xbf16>
    %457 = vector.shape_cast %456 : vector<1x16x64xbf16> to vector<16x64xbf16>
    %cst_305 = arith.constant dense<0.000000e+00> : vector<4x64xf32>
    %458 = tpu.matmul %455, %457, %cst_305 {dimension_numbers = #tpu.dot_dimension_numbers<[1], [0], [0], [1], [0, 0, 1, 1], [], []>} : vector<4x16xbf16>, vector<16x64xbf16>, vector<4x64xf32> -> vector<4x64xf32>
    %459 = vector.extract_strided_slice %10 {offsets = [0, 240], sizes = [4, 16], strides = [1, 1]} : vector<4x256xbf16> to vector<4x16xbf16>
    %c1_306 = arith.constant 1 : index
    %c0_307 = arith.constant 0 : index
    %c0_308 = arith.constant 0 : index
    %460 = vector.load %arg4[%c1_306, %c0_307, %c0_308] : memref<4x16x64xbf16, #tpu.memory_space<vmem>>, vector<1x16x64xbf16>
    %461 = vector.shape_cast %460 : vector<1x16x64xbf16> to vector<16x64xbf16>
    %cst_309 = arith.constant dense<0.000000e+00> : vector<4x64xf32>
    %462 = tpu.matmul %459, %461, %cst_309 {dimension_numbers = #tpu.dot_dimension_numbers<[1], [0], [0], [1], [0, 0, 1, 1], [], []>} : vector<4x16xbf16>, vector<16x64xbf16>, vector<4x64xf32> -> vector<4x64xf32>
    %463 = arith.addf %458, %462 : vector<4x64xf32>
    %464 = vector.extract_strided_slice %14 {offsets = [0, 240], sizes = [4, 16], strides = [1, 1]} : vector<4x256xbf16> to vector<4x16xbf16>
    %c2_310 = arith.constant 2 : index
    %c0_311 = arith.constant 0 : index
    %c0_312 = arith.constant 0 : index
    %465 = vector.load %arg4[%c2_310, %c0_311, %c0_312] : memref<4x16x64xbf16, #tpu.memory_space<vmem>>, vector<1x16x64xbf16>
    %466 = vector.shape_cast %465 : vector<1x16x64xbf16> to vector<16x64xbf16>
    %cst_313 = arith.constant dense<0.000000e+00> : vector<4x64xf32>
    %467 = tpu.matmul %464, %466, %cst_313 {dimension_numbers = #tpu.dot_dimension_numbers<[1], [0], [0], [1], [0, 0, 1, 1], [], []>} : vector<4x16xbf16>, vector<16x64xbf16>, vector<4x64xf32> -> vector<4x64xf32>
    %468 = arith.addf %463, %467 : vector<4x64xf32>
    %469 = vector.extract_strided_slice %18 {offsets = [0, 240], sizes = [4, 16], strides = [1, 1]} : vector<4x256xbf16> to vector<4x16xbf16>
    %c3_314 = arith.constant 3 : index
    %c0_315 = arith.constant 0 : index
    %c0_316 = arith.constant 0 : index
    %470 = vector.load %arg4[%c3_314, %c0_315, %c0_316] : memref<4x16x64xbf16, #tpu.memory_space<vmem>>, vector<1x16x64xbf16>
    %471 = vector.shape_cast %470 : vector<1x16x64xbf16> to vector<16x64xbf16>
    %cst_317 = arith.constant dense<0.000000e+00> : vector<4x64xf32>
    %472 = tpu.matmul %469, %471, %cst_317 {dimension_numbers = #tpu.dot_dimension_numbers<[1], [0], [0], [1], [0, 0, 1, 1], [], []>} : vector<4x16xbf16>, vector<16x64xbf16>, vector<4x64xf32> -> vector<4x64xf32>
    %473 = arith.addf %468, %472 : vector<4x64xf32>
    %474 = arith.addf %473, %19 : vector<4x64xf32>
    %475 = arith.negf %474 : vector<4x64xf32>
    %476 = math.exp %475 : vector<4x64xf32>
    %cst_318 = arith.constant 1.000000e+00 : f32
    %477 = vector.broadcast %cst_318 : f32 to vector<4x64xf32>
    %478 = arith.addf %477, %476 : vector<4x64xf32>
    %479 = arith.divf %477, %478 : vector<4x64xf32>
    %480 = arith.mulf %474, %479 : vector<4x64xf32>
    %c0_319 = arith.constant 0 : index
    %c0_320 = arith.constant 0 : index
    %c960 = arith.constant 960 : index
    %481 = vector.load %arg6[%c0_319, %c0_320, %c960] : memref<1x4x1024xf32, #tpu.memory_space<vmem>>, vector<1x4x64xf32>
    %482 = vector.shape_cast %481 : vector<1x4x64xf32> to vector<4x64xf32>
    %483 = vector.shape_cast %480 : vector<4x64xf32> to vector<1x4x64xf32>
    tpu.vector_store %arg6[%c0_319, %c0_320, %c960], %483 {strides = array<i32>} : memref<1x4x1024xf32, #tpu.memory_space<vmem>>, vector<1x4x64xf32>,
    return
  }
  func.func @transform_0(%arg0: i32, %arg1: i32) -> (i32, i32, i32) {
    %c0_i32 = arith.constant 0 : i32
    %c0_i32_0 = arith.constant 0 : i32
    return %arg0, %c0_i32, %arg1 : i32, i32, i32
  }
  func.func @transform_1(%arg0: i32, %arg1: i32) -> (i32, i32, i32) {
    %c0_i32 = arith.constant 0 : i32
    %c0_i32_0 = arith.constant 0 : i32
    %c0_i32_1 = arith.constant 0 : i32
    %c0_i32_2 = arith.constant 0 : i32
    return %c0_i32, %c0_i32_0, %c0_i32_1 : i32, i32, i32
  }
  func.func @transform_2(%arg0: i32, %arg1: i32) -> (i32, i32, i32) {
    %c0_i32 = arith.constant 0 : i32
    %c0_i32_0 = arith.constant 0 : i32
    %c0_i32_1 = arith.constant 0 : i32
    %c0_i32_2 = arith.constant 0 : i32
    return %c0_i32, %c0_i32_0, %c0_i32_1 : i32, i32, i32
  }
  func.func @transform_3(%arg0: i32, %arg1: i32) -> (i32, i32) {
    %c0_i32 = arith.constant 0 : i32
    %c0_i32_0 = arith.constant 0 : i32
    %c0_i32_1 = arith.constant 0 : i32
    return %c0_i32, %c0_i32_0 : i32, i32
  }
  func.func @transform_4(%arg0: i32, %arg1: i32) -> (i32, i32, i32) {
    %c0_i32 = arith.constant 0 : i32
    %c0_i32_0 = arith.constant 0 : i32
    return %arg0, %c0_i32, %arg1 : i32, i32, i32
  }
}

</mosaic_0001>

<bundles_post_ra>
// kernel: tpu_custom_call.1
= control target key start
LH: loop header
LB: loop body
LE: loop exit
PB: predicated region body
PF: predicated region fallthrough
CT: control target
= control target key end

     0   :  { %9 = vsyncpa [#allocation3], 0  ;;  %s5983_s0 = inlined_call_operand.hbm [shape: f32[2,4,256], index: 0, kind: input, shape index: {}]   ;;  %s5984_s1 = inlined_call_operand.hbm [shape: bf16[4,4,4], index: 1, kind: input, shape index: {}]   ;;  %s5985_s2 = inlined_call_operand.hbm [shape: bf16[4,16,64], index: 2, kind: input, shape index: {}]   ;;  %s5986_s3 = inlined_call_operand.vmem [shape: f32[4,64], index: 3, kind: input, shape index: {}]   ;;  %s5987_s4 = inlined_call_operand.hbm [shape: f32[2,4,1024], index: 4, kind: output, shape index: {}]  }
   0x1   :  { %11 = vsyncpa [#allocation3 + $0x1], 0 }
   0x2   :  { %12 = vsyncpa [#allocation6], 0 }
   0x3   :  { %13 = vsyncpa [#allocation4], 0 }
   0x4   :  { %15 = vsyncpa [#allocation4 + $0x1], 0  ;;  %s5309_s15 = smov 0   ;;  %s5311_s16 = smov 0  }
   0x5   :  { %s5313_s17 = smov 0   ;;  %s5315_s18 = smov 0  }
   0x6   :  { %s5317_s19 = smov 0   ;;  %s5319_s20 = smov 0  }
   0x7 LB: > { %s4188_s21 = sadd.s32 4294967295, %s5264_s20   ;;  %s4189_s22 = sadd.s32 4294967294, %s5264_s20   ;;  %s5264_s20 = sphi %s5319_s20, %s21_s20   ;;  %s5260_s19 = sphi %s5317_s19, %s6007_s19   ;;  %s5256_s18 = sphi %s5315_s18, %s6006_s18   ;;  %s5252_s17 = sphi %s5313_s17, %s6005_s17   ;;  %s5248_s16 = sphi %s5311_s16, %s6004_s16   ;;  %s5244_s15 = sphi %s5309_s15, %s6003_s15  }
   0x8   : > { %p55_p0 = scmp.ne.s32.totalorder %s5248_s16, %s5244_s15  ;;  %p5343_p1 = scmp.eq.s32.totalorder %s4188_s21, 0 }
   0x9   : > { %p5347_p2 = scmp.eq.s32.totalorder %s4188_s21, 1  ;;  %p150_p3 = scmp.eq.s32.totalorder %s4189_s22, 1 }
   0xa   : > { %s5991_s23 = scalar_select %p5343_p1, 1, 0 }
   0xb   : > { %p5353_p4 = por %p5343_p1, %p55_p0  ;;  %p4190_p5 = scmp.ge.s32.totalorder %s5264_s20, 1 }
   0xc   : > { %p5358_p6 = por %p150_p3, %p55_p0  ;;  %p157_p7 = scmp.lt.s32.totalorder %s5264_s20, 3 }
   0xd   : > { %s5993_s25 = scalar_select %p5353_p4, 1, 0 }
   0xe   : > { %s5994_s26 = scalar_select %p5358_p6, 1, 0 }
   0xf   : > { %p5363_p8 = pnand %p4190_p5, %p157_p7  ;;  %s5266_s28 = smov [#allocation5]  }
  0x10   : > { %s169_s29 = sshll.u32 %s5266_s28, 4  ;;  %s5267_s5 = smov [#allocation7]   ;;  %s170_s29 = int_to_ptr.vmem [resolvable:$true] %s169_s29 }
  0x11   : > { %p4885_p9 = pneg %p5363_p8  ;;  %s182_s6 = sshll.u32 %s5267_s5, 4  ;;  %s183_s6 = int_to_ptr.vmem [resolvable:$true] %s182_s6 }
  0x12   : > { %s5111_s7 = scalar_lea.vmem %s170_s29, 128  ;;  %p5119_p5 = scmp.lt.s32.totalorder %s170_s29, %s170_s29 }
  0x13   : > { %p5372_p11 = pnand %p4885_p9, %p5343_p1  ;;  %p5112_p13 = scmp.ne.s32.totalorder %s170_s29, %s5111_s7 }
  0x14   : > { %p5120_p7 = scmp.lt.s32.totalorder %s5111_s7, %s5111_s7 }
  0x15   : > { %p5102_p12 = pneg %p5372_p11 }
  0x16   : > { %p5121_p10 = por %p5120_p7, %p5119_p5 }
  0x17   : > { %p5114_p0 = pnand %p5112_p13, %p5102_p12 }
  0x19   : > { %p5115_p3 = pneg %p5114_p0 }
  0x1b   : > { %p5122_p9 = pnand %p5121_p10, %p5115_p3 }
  0x1d   : > { %5125 = shalt.err (!%p5122_p9)
}
  0x1e   : > { %s5268_s8 = smov 32   ;;  %s5269_s9 = smov 2  }
  0x1f   : > { %4888 = dma.hbm_to_vmem [thread:$0]  (!%p5372_p11), %s5984_s1, 128, %s170_s29, [#allocation6], %s5268_s8, %s5268_s8, %s5269_s9  }
  0x20   : > { %s5137_s12 = scalar_lea.vmem %s183_s6, 512  ;;  %p5145_p1 = scmp.lt.s32.totalorder %s183_s6, %s183_s6 }
  0x21   : > { %p5138_p6 = scmp.ne.s32.totalorder %s183_s6, %s5137_s12  ;;  %p5146_p4 = scmp.lt.s32.totalorder %s5137_s12, %s5137_s12 }
  0x23   : > { %p5140_p13 = pnand %p5138_p6, %p5102_p12  ;;  %p5147_p5 = por %p5146_p4, %p5145_p1 }
  0x25   : > { %p5141_p0 = pneg %p5140_p13 }
  0x27   : > { %p5148_p10 = pnand %p5147_p5, %p5141_p0 }
  0x29   : > { %5151 = shalt.err (!%p5148_p10)
}
  0x2a   : > { %s5270_s13 = smov 64   ;;  %s5271_s14 = smov 4  }
  0x2b   : > { %4891 = dma.hbm_to_vmem [thread:$0]  (!%p5372_p11), %s5985_s2, 512, %s183_s6, [#allocation6], %s5270_s13, %s5270_s13, %s5271_s14  }
  0x2c   : > { %s33_s28 = sadd.s32 1, %s5260_s19  ;;  %s42_s29 = sadd.s32 1, %s5252_s17 }
  0x2d   : > { %p35_p1 = scmp.ge.s32.totalorder %s33_s28, 2  ;;  %p49_p4 = scmp.ne.s32.totalorder %s5252_s17, %s5248_s16 }
  0x2e   : > { %p50_p6 = scmp.eq.s32.totalorder %s5264_s20, 0  ;;  %p4902_p12 = scmp.lt.s32.totalorder %s5264_s20, 2 }
  0x2f   : > { %s6009_s28 = smov (%p35_p1, %s33_s28), 0  ;;  %p5404_p7 = por %p5347_p2, %p49_p4 }
  0x30   : > { %p51_p3 = por %p50_p6, %p49_p4  ;;  %s37_s30 = ssub.s32 %s5260_s19, %s6009_s28 }
  0x31   : > { %s199_s7 = sand.u32 1, %s5252_s17   ;;  %p40_p9 = scmp.eq.s32.totalorder %s37_s30, 0 }
  0x32   : > { %s4194_s6 = sshll.u32 %s199_s7, 3  ;;  %s4359_s8 = sshll.u32 %s5260_s19, 7 }
  0x33   : > { %s5413_s9 = scalar_select %p40_p9, %s5252_s17, %s42_s29  }
  0x34   : > { %s211_s12 = scalar_lea.hbm %s5983_s0, %s4359_s8  ;;  %s203_s13 = scalar_lea.vmem [#allocation2], %s4194_s6 }
  0x35   : > { %s213_s14 = sshll.u32 %s203_s13, 4  ;;  %p5420_p11 = pnand %p4902_p12, %p51_p3  ;;  %s214_s14 = int_to_ptr.vmem [resolvable:$true] %s213_s14 }
  0x36   : > { %s200_s21 = scalar_lea.sflag [#allocation3], %s199_s7  ;;  %s5165_s22 = scalar_lea.vmem %s214_s14, 128 }
  0x37   : > { %p5154_p2 = pneg %p5420_p11  ;;  %p5166_p13 = scmp.ne.s32.totalorder %s214_s14, %s5165_s22 }
  0x38   : > { %s5272_s29 = smov [#allocation2]  }
  0x39   : > { %p5168_p0 = pnand %p5166_p13, %p5154_p2  ;;  %s5170_s30 = sshll.u32 %s5272_s29, 4  ;;  %s5171_s30 = int_to_ptr.vmem [resolvable:$false] %s5170_s30 }
  0x3a   : > { %s5172_s8 = scalar_lea.vmem %s5171_s30, 256  ;;  %p5173_p10 = scmp.lt.s32.totalorder %s214_s14, %s5171_s30 }
  0x3b   : > { %p5169_p5 = pneg %p5168_p0  ;;  %p5174_p1 = scmp.lt.s32.totalorder %s5172_s8, %s5165_s22 }
  0x3d   : > { %p5175_p4 = por %p5174_p1, %p5173_p10 }
  0x3f   : > { %p5176_p6 = pnand %p5175_p4, %p5169_p5 }
  0x41   : > { %5179 = shalt.err (!%p5176_p6)
}
  0x42   : > { %4895 = dma.hbm_to_vmem [thread:$0]  (!%p5420_p11), %s211_s12, 128, %s214_s14, %s200_s21  }
  0x43   : > { %222 = sbr.rel (%p5363_p8) target bundleno = 990 (0x3de), region = 36  ;;  %s5431_s7 = sand.u32 (!%p5363_p8), 1, %s5248_s16  }
  0x44   : > { %s4198_s6 = sshll.u32 (!%p5363_p8), %s5431_s7, 3  ;;  %s225_s10 = scalar_lea.sflag (!%p5363_p8), [#allocation3], %s5431_s7 }
  0x45   : > { %s228_s11 = scalar_lea.vmem (!%p5363_p8), [#allocation2], %s4198_s6  ;;  %p5999_p12 = scmp.ne.s32.totalorder (!%p5363_p8), %s5993_s25, 0 }
  0x48   : > { %5231 = dma.done.wait (%p5999_p12), %s225_s10, 128  }
  0x49   : > { %5233 = vsyncadd (%p5999_p12), %s225_s10, 4294967168  ;;  %p6000_p3 = scmp.ne.s32.totalorder %s5991_s23, 0 }
  0x4b   : > { %5235 = dma.done.wait (%p6000_p3), [#allocation6], 640  }
  0x4c   : > { %5237 = vsyncadd (%p6000_p3), [#allocation6], 4294966656  ;;  %v5273_v0 = vmov 0   ;;  %v264_v1 = vld [vmem:[%s228_s11] sm:$0xff]  ;;  %vm275_vm0 = vcmask 1041408   ;;  %vm271_vm1 = vcmask 31744  }
  0x4d   : > { %314 = vmatprep.mubr.bf16.mxu0 %v5273_v0  ;;  %362 = vmatprep.mubr.bf16.mxu1 %v5273_v0  ;;  %v266_v2 = vcombine.high %v264_v1, %v264_v1  ;;  %v268_v3 = vpack.c.bf16 %v264_v1, %v264_v1  ;;  %v270_v6 = vld [vmem:[#allocation5] sm:$0x3]  ;;  %v326_v7 = vld [vmem:[#allocation5 + $0x2] sm:$0x3]  ;;  %v374_v8 = vld [vmem:[#allocation5 + $0x4] sm:$0x3] }
  0x4e   : > { %v422_v9 = vld [vmem:[#allocation5 + $0x6] sm:$0x3]  ;;  %v5274_v10 = vmov 0.0   ;;  %v4971_v11 = vld [vmem:[#allocation7 + $0x8] sm:$0xff]   ;;  %v4972_v12 = vld [vmem:[#allocation7] sm:$0xff]   ;;  %vm5275_vm2 = vmmov 0  }
  0x4f   : > { %v269_v4 = vpack.c.bf16 %v266_v2, %v266_v2  ;;  %v277_v5 = vsel %vm275_vm0, %v268_v3, 0  ;;  %vm481_vm3 = vcmask 130048   ;;  %v4973_v15 = vld [vmem:[#allocation7 + $0x10] sm:$0xff]   ;;  %v4974_v18 = vld [vmem:[#allocation7 + $0x18] sm:$0xff]   ;;  %s5276_s23 = smov 112   ;;  %v4975_v29 = vld [vmem:[#allocation7 + $0x8] sm:$0xff]  }
  0x50   : > { %v4976_v30 = vld [vmem:[#allocation7] sm:$0xff]   ;;  %s5277_s25 = smov 96   ;;  %s5278_s27 = smov 80   ;;  %v4977_v41 = vld [vmem:[#allocation7 + $0x10] sm:$0xff]   ;;  %v4978_v43 = vld [vmem:[#allocation7 + $0x18] sm:$0xff]   ;;  %vm688_vm4 = vcmask 519168  }
  0x51   : > { %4202 = vmatprep.subr.msk.bf16.mxu0 %vm275_vm0, %v269_v4  ;;  %4204 = vmatprep.subr.msk.bf16.mxu1 %vm275_vm0, %v269_v4  ;;  %s5279_s12 = smov 64   ;;  %s5280_s13 = smov 48   ;;  %v4979_v45 = vld [vmem:[#allocation7 + $0x8] sm:$0xff]   ;;  %v4980_v47 = vld [vmem:[#allocation7] sm:$0xff]   ;;  %v4981_v49 = vld [vmem:[#allocation7 + $0x10] sm:$0xff]   ;;  %vm920_vm5 = vcmask 1043968  }
  0x52   : > { %297 = vmatpush1.bf16.msra.mxu0 %v277_v5  ;;  %345 = vmatpush1.bf16.msra.mxu1 %v277_v5  ;;  %s5281_s14 = smov 32   ;;  %s5282_s24 = smov 16   ;;  %v4982_v51 = vld [vmem:[#allocation7 + $0x18] sm:$0xff]   ;;  %v4983_v53 = vld [vmem:[#allocation7 + $0x8] sm:$0xff]   ;;  %v4984_v55 = vld [vmem:[#allocation7] sm:$0xff]  }
  0x53   : > { %4206 = vmatprep.subr.msk.bf16.mxu0 %vm275_vm0, %v269_v4  ;;  %4208 = vmatprep.subr.msk.bf16.mxu1 %vm275_vm0, %v269_v4  ;;  %v4985_v57 = vld [vmem:[#allocation7 + $0x10] sm:$0xff]   ;;  %v4986_v59 = vld [vmem:[#allocation7 + $0x18] sm:$0xff]   ;;  %v4987_v61 = vld [vmem:[#allocation7 + $0x8] sm:$0xff]   ;;  %s4201_s29 = sshll.u32 %s5431_s7, 5  ;;  %s4360_s10 = sshll.u32 %s5256_s18, 9 }
  0x54   : > { %v4988_v63 = vld [vmem:[#allocation7] sm:$0xff]   ;;  %v4989_v1 = vld [vmem:[#allocation7 + $0x10] sm:$0xff]   ;;  %v4990_v3 = vld [vmem:[#allocation7 + $0x18] sm:$0xff]   ;;  %s5730_s30 = scalar_lea.vmem [#allocation8], %s4201_s29 }
  0x55   : > { %4203 = vmatmul.mubr.msk.bf16.vlgmr.msra.gmra.mxu0 %vm271_vm1, %v270_v6  ;;  %4205 = vmatmul.mubr.msk.bf16.vlgmr.msra.gmra.mxu1 %vm271_vm1, %v326_v7  ;;  %v4992_v7 = vld [vmem:[#allocation7] sm:$0xff]   ;;  %s4085_s11 = sshll.u32 %s5730_s30, 4  ;;  %s4086_s11 = int_to_ptr.vmem [resolvable:$true] %s4085_s11 }
  0x56   : > { %393 = vmatpush1.bf16.msra.mxu0 %v277_v5  ;;  %441 = vmatpush1.bf16.msra.mxu1 %v277_v5  ;;  %v4991_v5 = vld [vmem:[#allocation7 + $0x8] sm:$0xff]  }
  0x57   : > { %410 = vmatprep.mubr.bf16.mxu0 %v5273_v0  ;;  %458 = vmatprep.mubr.bf16.mxu1 %v5273_v0 }
  0x58   : > { %4489 = vmatprep.subr.bf16.mxu0 %v5274_v10  ;;  %4495 = vmatprep.subr.bf16.mxu1 %v5274_v10 }
  0x5d   : > { %4207 = vmatmul.mubr.msk.bf16.vlgmr.msra.gmra.mxu0 %vm271_vm1, %v374_v8  ;;  %4209 = vmatmul.mubr.msk.bf16.vlgmr.msra.gmra.mxu1 %vm271_vm1, %v422_v9  ;;  %v4993_v9 = vld [vmem:[#allocation7 + $0x10] sm:$0xff]  }
  0x5e   : > { %4490 = vmatpush3.bf16.msra.mxu0 %v4971_v11  ;;  %4496 = vmatpush3.bf16.msra.mxu1 %v4972_v12  ;;  %v4994_v12 = vld [vmem:[#allocation7 + $0x18] sm:$0xff]  }
  0x5f   : > { %4501 = vmatprep.subr.bf16.mxu0 %v5274_v10  ;;  %4507 = vmatprep.subr.bf16.mxu1 %v5274_v10 }
  0x60   : > { %4491 = vmatprep.mubr.msk.bf16.mxu0 %vm5275_vm2, %v5274_v10  ;;  %4497 = vmatprep.mubr.msk.bf16.mxu1 %vm5275_vm2, %v5274_v10 }
 0x115   : > { %v316_v13 = vpop.f32.mrf.mxu0  ;;  %v364_v14 = vpop.f32.mrf.mxu1 }
 0x116   : > { %v5455_v16 = vpack.c.bf16 %v316_v13, %v316_v13  ;;  %v5457_v17 = vpack.c.bf16 %v364_v14, %v364_v14  ;;  %v4995_v14 = vld [vmem:[#allocation7 + $0x8] sm:$0xff]  }
 0x117   : > { %v5459_v19 = vpop.f32.mrf.mxu0  ;;  %v5461_v20 = vpop.f32.mrf.mxu1 }
 0x118   : > { %695 = vrot.lane.b32.xlu0 %v5457_v17, %s5276_s23  ;;  %4492 = vmatmul.mubr.msk.bf16.vlgmr.msra.gmra.mxu0 %vm481_vm3, %v5457_v17  ;;  %v5522_v37 = vpack.c.bf16 %v5461_v20, %v5461_v20  ;;  %v5535_v39 = vpack.c.bf16 %v5459_v19, %v5459_v19  ;;  %v4997_v19 = vld [vmem:[#allocation7 + $0x10] sm:$0xff]  }
 0x119   : > { %4498 = vmatmul.mubr.msk.bf16.vlgmr.msra.gmra.mxu1 %vm481_vm3, %v5455_v16  ;;  %v320_v21 = vpop.f32.mrf.mxu0  ;;  %v368_v22 = vpop.f32.mrf.mxu1  ;;  %4502 = vmatpush3.bf16.msra.mxu0 %v4973_v15 }
 0x11a   : > { %4508 = vmatpush3.bf16.msra.mxu1 %v4974_v18  ;;  %4503 = vmatprep.mubr.msk.bf16.mxu0 %vm5275_vm2, %v5274_v10 }
 0x11b   : > { %v321_v23 = vpop.f32.mrf.mxu0  ;;  %v369_v24 = vpop.f32.mrf.mxu1  ;;  %4509 = vmatprep.mubr.msk.bf16.mxu1 %vm5275_vm2, %v5274_v10  ;;  %4513 = vmatprep.subr.bf16.mxu0 %v5274_v10 }
 0x11c   : > { %747 = vrot.lane.b32.xlu0 %v5455_v16, %s5276_s23  ;;  %4519 = vmatprep.subr.bf16.mxu1 %v5274_v10  ;;  %v4998_v24 = vld [vmem:[#allocation7 + $0x18] sm:$0xff]  }
 0x11d   : > { %v412_v25 = vpop.f32.mrf.mxu0  ;;  %v460_v26 = vpop.f32.mrf.mxu1 }
 0x11e   : > { %v419_v27 = vpack.c.bf16 %v412_v25, %v412_v25  ;;  %v467_v28 = vpack.c.bf16 %v460_v26, %v460_v26 }
 0x11f   : > { %v414_v31 = vpop.f32.mrf.mxu0  ;;  %v462_v32 = vpop.f32.mrf.mxu1 }
 0x120   : > { %926 = vrot.lane.b32.xlu0 %v5457_v17, %s5277_s25  ;;  %801 = vrot.lane.b32.xlu1 %v419_v27, %s5276_s23  ;;  %v5528_v38 = vpack.c.bf16 %v414_v31, %v414_v31  ;;  %v5541_v40 = vpack.c.bf16 %v462_v32, %v462_v32  ;;  %v4999_v31 = vld [vmem:[#allocation7 + $0x8] sm:$0xff]  }
 0x121   : > { %4510 = vmatmul.mubr.msk.bf16.vlgmr.msra.gmra.mxu1 %vm481_vm3, %v467_v28  ;;  %4504 = vmatmul.mubr.msk.bf16.vlgmr.msra.gmra.mxu0 %vm481_vm3, %v419_v27  ;;  %v416_v33 = vpop.f32.mrf.mxu0  ;;  %v464_v34 = vpop.f32.mrf.mxu1 }
 0x122   : > { %4514 = vmatpush3.bf16.msra.mxu0 %v4975_v29  ;;  %4520 = vmatpush3.bf16.msra.mxu1 %v4976_v30 }
 0x123   : > { %v417_v35 = vpop.f32.mrf.mxu0  ;;  %v465_v36 = vpop.f32.mrf.mxu1  ;;  %4515 = vmatprep.mubr.msk.bf16.mxu0 %vm5275_vm2, %v5274_v10  ;;  %4525 = vmatprep.subr.bf16.mxu0 %v5274_v10 }
 0x124   : > { %1030 = vrot.lane.b32.xlu0 %v419_v27, %s5277_s25  ;;  %856 = vrot.lane.b32.xlu1 %v467_v28, %s5276_s23  ;;  %v5682_v36 = vld [vmem:[%s5986_s3] sm:$0xf] }
 0x125   : > { %4521 = vmatprep.mubr.msk.bf16.mxu1 %vm5275_vm2, %v5274_v10  ;;  %4531 = vmatprep.subr.bf16.mxu1 %v5274_v10 }
 0x128   : > { %1149 = vrot.lane.b32.xlu0 %v5457_v17, %s5278_s27  ;;  %977 = vrot.lane.b32.xlu1 %v5455_v16, %s5277_s25 }
 0x12c   : > { %1253 = vrot.lane.b32.xlu0 %v419_v27, %s5278_s27  ;;  %1084 = vrot.lane.b32.xlu1 %v467_v28, %s5277_s25 }
 0x130   : > { %1376 = vrot.lane.b32.xlu0 %v5457_v17, %s5279_s12  ;;  %1200 = vrot.lane.b32.xlu1 %v5455_v16, %s5278_s27 }
 0x134   : > { %1480 = vrot.lane.b32.xlu0 %v419_v27, %s5279_s12  ;;  %1307 = vrot.lane.b32.xlu1 %v467_v28, %s5278_s27 }
 0x138   : > { %1599 = vrot.lane.b32.xlu0 %v5457_v17, %s5280_s13  ;;  %1427 = vrot.lane.b32.xlu1 %v5455_v16, %s5279_s12 }
 0x13c   : > { %1703 = vrot.lane.b32.xlu0 %v419_v27, %s5280_s13  ;;  %1534 = vrot.lane.b32.xlu1 %v467_v28, %s5279_s12 }
 0x140   : > { %1826 = vrot.lane.b32.xlu0 %v5457_v17, %s5281_s14  ;;  %1650 = vrot.lane.b32.xlu1 %v5455_v16, %s5280_s13 }
 0x144   : > { %1930 = vrot.lane.b32.xlu0 %v419_v27, %s5281_s14  ;;  %1757 = vrot.lane.b32.xlu1 %v467_v28, %s5280_s13 }
 0x148   : > { %2049 = vrot.lane.b32.xlu0 %v5457_v17, %s5282_s24  ;;  %1877 = vrot.lane.b32.xlu1 %v5455_v16, %s5281_s14 }
 0x14c   : > { %2153 = vrot.lane.b32.xlu0 %v419_v27, %s5282_s24  ;;  %1984 = vrot.lane.b32.xlu1 %v467_v28, %s5281_s14 }
 0x150   : > { %2492 = vrot.lane.b32.xlu0 %v5522_v37, %s5276_s23  ;;  %2100 = vrot.lane.b32.xlu1 %v5455_v16, %s5282_s24  ;;  %v4996_v16 = vld [vmem:[#allocation7] sm:$0xff]  }
 0x154   : > { %2207 = vrot.lane.b32.xlu1 %v467_v28, %s5282_s24  ;;  %2598 = vrot.lane.b32.xlu0 %v5528_v38, %s5276_s23 }
 0x158   : > { %2544 = vrot.lane.b32.xlu1 %v5535_v39, %s5276_s23  ;;  %2722 = vrot.lane.b32.xlu0 %v5522_v37, %s5277_s25 }
 0x15c   : > { %2653 = vrot.lane.b32.xlu1 %v5541_v40, %s5276_s23  ;;  %2826 = vrot.lane.b32.xlu0 %v5528_v38, %s5277_s25 }
 0x160   : > { %2773 = vrot.lane.b32.xlu1 %v5535_v39, %s5277_s25  ;;  %2945 = vrot.lane.b32.xlu0 %v5522_v37, %s5278_s27 }
 0x164   : > { %2880 = vrot.lane.b32.xlu1 %v5541_v40, %s5277_s25  ;;  %3049 = vrot.lane.b32.xlu0 %v5528_v38, %s5278_s27 }
 0x168   : > { %2996 = vrot.lane.b32.xlu1 %v5535_v39, %s5278_s27  ;;  %3172 = vrot.lane.b32.xlu0 %v5522_v37, %s5279_s12 }
 0x16c   : > { %3103 = vrot.lane.b32.xlu1 %v5541_v40, %s5278_s27  ;;  %3276 = vrot.lane.b32.xlu0 %v5528_v38, %s5279_s12  ;;  %s5939_s27 = scalar_lea.hbm %s5987_s4, %s4360_s10 }
 0x170   : > { %3223 = vrot.lane.b32.xlu1 %v5535_v39, %s5279_s12  ;;  %3395 = vrot.lane.b32.xlu0 %v5522_v37, %s5280_s13 }
 0x174   : > { %3330 = vrot.lane.b32.xlu1 %v5541_v40, %s5279_s12  ;;  %3499 = vrot.lane.b32.xlu0 %v5528_v38, %s5280_s13 }
 0x178   : > { %3446 = vrot.lane.b32.xlu1 %v5535_v39, %s5280_s13  ;;  %3622 = vrot.lane.b32.xlu0 %v5522_v37, %s5281_s14 }
 0x17c   : > { %3553 = vrot.lane.b32.xlu1 %v5541_v40, %s5280_s13  ;;  %3726 = vrot.lane.b32.xlu0 %v5528_v38, %s5281_s14  ;;  %s5180_s13 = scalar_lea.vmem %s4086_s11, 512 }
 0x17d   : > { %p5181_p8 = scmp.ne.s32.totalorder %s4086_s11, %s5180_s13 }
 0x17f   : > { %p5182_p9 = pnand %p5181_p8, %p5404_p7 }
 0x180   : > { %3673 = vrot.lane.b32.xlu1 %v5535_v39, %s5281_s14  ;;  %3845 = vrot.lane.b32.xlu0 %v5522_v37, %s5282_s24 }
 0x181   : > { %p5183_p11 = pneg %p5182_p9 }
 0x184   : > { %3780 = vrot.lane.b32.xlu1 %v5541_v40, %s5281_s14  ;;  %3949 = vrot.lane.b32.xlu0 %v5528_v38, %s5282_s24  ;;  %s5283_s14 = smov [#allocation8]  }
 0x188   : > { %3896 = vrot.lane.b32.xlu1 %v5535_v39, %s5282_s24 }
 0x18a   : > { %v696_v42 = vpop.permute.xlu0 %695 }
 0x18b   : > { %4516 = vmatmul.mubr.msk.bf16.vlgmr.msra.gmra.mxu0 %vm481_vm3, %v696_v42 }
 0x18c   : > { %4003 = vrot.lane.b32.xlu1 %v5541_v40, %s5282_s24  ;;  %4526 = vmatpush3.bf16.msra.mxu0 %v4977_v41  ;;  %s5184_s24 = sshll.u32 %s5283_s14, 4  ;;  %s5185_s24 = int_to_ptr.vmem [resolvable:$false] %s5184_s24 }
 0x18d   : > { %4527 = vmatprep.mubr.msk.bf16.mxu0 %vm5275_vm2, %v5274_v10  ;;  %4537 = vmatprep.subr.bf16.mxu0 %v5274_v10  ;;  %s5186_s18 = scalar_lea.vmem %s5185_s24, 1024  ;;  %p5187_p2 = scmp.lt.s32.totalorder %s4086_s11, %s5185_s24 }
 0x18e   : > { %v748_v44 = vpop.permute.xlu0 %747  ;;  %p5188_p13 = scmp.lt.s32.totalorder %s5186_s18, %s5180_s13 }
 0x18f   : > { %4522 = vmatmul.mubr.msk.bf16.vlgmr.msra.gmra.mxu1 %vm481_vm3, %v748_v44  ;;  %v5000_v44 = vld [vmem:[#allocation7] sm:$0xff]  }
 0x190   : > { %4532 = vmatpush3.bf16.msra.mxu1 %v4978_v43  ;;  %4533 = vmatprep.mubr.msk.bf16.mxu1 %vm5275_vm2, %v5274_v10  ;;  %p5189_p0 = por %p5188_p13, %p5187_p2 }
 0x191   : > { %4543 = vmatprep.subr.bf16.mxu1 %v5274_v10 }
 0x192   : > { %v802_v46 = vpop.permute.xlu1 %801  ;;  %v927_v50 = vpop.permute.xlu0 %926  ;;  %p5190_p5 = pnand %p5189_p0, %p5183_p11 }
 0x193   : > { %4528 = vmatmul.mubr.msk.bf16.vlgmr.msra.gmra.mxu0 %vm481_vm3, %v802_v46 }
 0x194   : > { %4538 = vmatpush3.bf16.msra.mxu0 %v4979_v45  ;;  %4539 = vmatprep.mubr.msk.bf16.mxu0 %vm5275_vm2, %v5274_v10 }
 0x195   : > { %4549 = vmatprep.subr.bf16.mxu0 %v5274_v10 }
 0x196   : > { %v857_v48 = vpop.permute.xlu1 %856  ;;  %v1031_v54 = vpop.permute.xlu0 %1030 }
 0x197   : > { %4534 = vmatmul.mubr.msk.bf16.vlgmr.msra.gmra.mxu1 %vm481_vm3, %v857_v48 }
 0x198   : > { %4544 = vmatpush3.bf16.msra.mxu1 %v4980_v47  ;;  %4545 = vmatprep.mubr.msk.bf16.mxu1 %vm5275_vm2, %v5274_v10 }
 0x199   : > { %4555 = vmatprep.subr.bf16.mxu1 %v5274_v10 }
 0x19a   : > { %v978_v52 = vpop.permute.xlu1 %977  ;;  %v1150_v58 = vpop.permute.xlu0 %1149 }
 0x19b   : > { %4540 = vmatmul.mubr.msk.bf16.vlgmr.msra.gmra.mxu0 %vm481_vm3, %v927_v50 }
 0x19c   : > { %4550 = vmatpush3.bf16.msra.mxu0 %v4981_v49  ;;  %4551 = vmatprep.mubr.msk.bf16.mxu0 %vm5275_vm2, %v5274_v10 }
 0x19d   : > { %4561 = vmatprep.subr.bf16.mxu0 %v5274_v10 }
 0x19e   : > { %v1085_v56 = vpop.permute.xlu1 %1084  ;;  %v1254_v62 = vpop.permute.xlu0 %1253 }
 0x19f   : > { %4546 = vmatmul.mubr.msk.bf16.vlgmr.msra.gmra.mxu1 %vm481_vm3, %v978_v52  ;;  %v5001_v52 = vld [vmem:[#allocation7 + $0x10] sm:$0xff]  }
 0x1a0   : > { %4556 = vmatpush3.bf16.msra.mxu1 %v4982_v51  ;;  %4557 = vmatprep.mubr.msk.bf16.mxu1 %vm5275_vm2, %v5274_v10 }
 0x1a1   : > { %4567 = vmatprep.subr.bf16.mxu1 %v5274_v10 }
 0x1a2   : > { %v1201_v60 = vpop.permute.xlu1 %1200  ;;  %v1377_v2 = vpop.permute.xlu0 %1376 }
 0x1a3   : > { %4552 = vmatmul.mubr.msk.bf16.vlgmr.msra.gmra.mxu0 %vm481_vm3, %v1031_v54  ;;  %v5002_v54 = vld [vmem:[#allocation7 + $0x18] sm:$0xff]  }
 0x1a4   : > { %4562 = vmatpush3.bf16.msra.mxu0 %v4983_v53  ;;  %4563 = vmatprep.mubr.msk.bf16.mxu0 %vm5275_vm2, %v5274_v10 }
 0x1a5   : > { %4573 = vmatprep.subr.bf16.mxu0 %v5274_v10 }
 0x1a6   : > { %v1308_v0 = vpop.permute.xlu1 %1307  ;;  %v1481_v6 = vpop.permute.xlu0 %1480 }
 0x1a7   : > { %4558 = vmatmul.mubr.msk.bf16.vlgmr.msra.gmra.mxu1 %vm481_vm3, %v1085_v56  ;;  %v5003_v56 = vld [vmem:[#allocation7 + $0x8] sm:$0xff]  }
 0x1a8   : > { %4568 = vmatpush3.bf16.msra.mxu1 %v4984_v55  ;;  %4569 = vmatprep.mubr.msk.bf16.mxu1 %vm5275_vm2, %v5274_v10 }
 0x1a9   : > { %4579 = vmatprep.subr.bf16.mxu1 %v5274_v10 }
 0x1aa   : > { %v1428_v4 = vpop.permute.xlu1 %1427  ;;  %v1600_v11 = vpop.permute.xlu0 %1599 }
 0x1ab   : > { %4564 = vmatmul.mubr.msk.bf16.vlgmr.msra.gmra.mxu0 %vm481_vm3, %v1150_v58  ;;  %v5004_v58 = vld [vmem:[#allocation7] sm:$0xff]  }
 0x1ac   : > { %4574 = vmatpush3.bf16.msra.mxu0 %v4985_v57  ;;  %4575 = vmatprep.mubr.msk.bf16.mxu0 %vm5275_vm2, %v5274_v10 }
 0x1ad   : > { %4585 = vmatprep.subr.bf16.mxu0 %v5274_v10 }
 0x1ae   : > { %v1535_v8 = vpop.permute.xlu1 %1534  ;;  %v1704_v15 = vpop.permute.xlu0 %1703 }
 0x1af   : > { %4570 = vmatmul.mubr.msk.bf16.vlgmr.msra.gmra.mxu1 %vm481_vm3, %v1201_v60 }
 0x1b0   : > { %4580 = vmatpush3.bf16.msra.mxu1 %v4986_v59  ;;  %4581 = vmatprep.mubr.msk.bf16.mxu1 %vm5275_vm2, %v5274_v10 }
 0x1b1   : > { %4591 = vmatprep.subr.bf16.mxu1 %v5274_v10 }
 0x1b2   : > { %v1651_v13 = vpop.permute.xlu1 %1650  ;;  %v1827_v21 = vpop.permute.xlu0 %1826 }
 0x1b3   : > { %4576 = vmatmul.mubr.msk.bf16.vlgmr.msra.gmra.mxu0 %vm481_vm3, %v1254_v62  ;;  %v5005_v62 = vld [vmem:[#allocation7 + $0x10] sm:$0xff]  }
 0x1b4   : > { %4586 = vmatpush3.bf16.msra.mxu0 %v4987_v61  ;;  %4587 = vmatprep.mubr.msk.bf16.mxu0 %vm5275_vm2, %v5274_v10 }
 0x1b5   : > { %4597 = vmatprep.subr.bf16.mxu0 %v5274_v10 }
 0x1b6   : > { %v1758_v17 = vpop.permute.xlu1 %1757  ;;  %v1931_v34 = vpop.permute.xlu0 %1930 }
 0x1b7   : > { %4582 = vmatmul.mubr.msk.bf16.vlgmr.msra.gmra.mxu1 %vm481_vm3, %v1308_v0  ;;  %v5007_v0 = vld [vmem:[#allocation7 + $0x8] sm:$0xff]  }
 0x1b8   : > { %4592 = vmatpush3.bf16.msra.mxu1 %v4988_v63  ;;  %4593 = vmatprep.mubr.msk.bf16.mxu1 %vm5275_vm2, %v5274_v10  ;;  %v5006_v63 = vld [vmem:[#allocation7 + $0x18] sm:$0xff]  }
 0x1b9   : > { %4603 = vmatprep.subr.bf16.mxu1 %v5274_v10 }
 0x1ba   : > { %v1878_v27 = vpop.permute.xlu1 %1877  ;;  %v2050_v53 = vpop.permute.xlu0 %2049 }
 0x1bb   : > { %4588 = vmatmul.mubr.msk.bf16.vlgmr.msra.gmra.mxu0 %vm481_vm3, %v1377_v2  ;;  %v5009_v2 = vld [vmem:[#allocation7 + $0x10] sm:$0xff]  }
 0x1bc   : > { %4598 = vmatpush3.bf16.msra.mxu0 %v4989_v1  ;;  %4599 = vmatprep.mubr.msk.bf16.mxu0 %vm5275_vm2, %v5274_v10 }
 0x1bd   : > { %4609 = vmatprep.subr.bf16.mxu0 %v5274_v10 }
 0x1be   : > { %v1985_v47 = vpop.permute.xlu1 %1984  ;;  %v2154_v57 = vpop.permute.xlu0 %2153 }
 0x1bf   : > { %4594 = vmatmul.mubr.msk.bf16.vlgmr.msra.gmra.mxu1 %vm481_vm3, %v1428_v4  ;;  %v5011_v4 = vld [vmem:[#allocation7 + $0x8] sm:$0xff]  }
 0x1c0   : > { %4604 = vmatpush3.bf16.msra.mxu1 %v4990_v3  ;;  %4605 = vmatprep.mubr.msk.bf16.mxu1 %vm5275_vm2, %v5274_v10  ;;  %v5010_v3 = vld [vmem:[#allocation7 + $0x18] sm:$0xff]  }
 0x1c1   : > { %4615 = vmatprep.subr.bf16.mxu1 %v5274_v10 }
 0x1c2   : > { %v2101_v55 = vpop.permute.xlu1 %2100 }
 0x1c3   : > { %4600 = vmatmul.mubr.msk.bf16.vlgmr.msra.gmra.mxu0 %vm481_vm3, %v1481_v6  ;;  %v5012_v6 = vld [vmem:[#allocation7] sm:$0xff]  }
 0x1c4   : > { %4610 = vmatpush3.bf16.msra.mxu0 %v4991_v5  ;;  %4611 = vmatprep.mubr.msk.bf16.mxu0 %vm5275_vm2, %v5274_v10 }
 0x1c5   : > { %4621 = vmatprep.subr.bf16.mxu0 %v5274_v10 }
 0x1c6   : > { %v2208_v59 = vpop.permute.xlu1 %2207 }
 0x1c7   : > { %4606 = vmatmul.mubr.msk.bf16.vlgmr.msra.gmra.mxu1 %vm481_vm3, %v1535_v8  ;;  %v5013_v8 = vld [vmem:[#allocation7 + $0x10] sm:$0xff]  }
 0x1c8   : > { %4616 = vmatpush3.bf16.msra.mxu1 %v4992_v7  ;;  %4617 = vmatprep.mubr.msk.bf16.mxu1 %vm5275_vm2, %v5274_v10 }
 0x1c9   : > { %4627 = vmatprep.subr.bf16.mxu1 %v5274_v10 }
 0x1cb   : > { %4612 = vmatmul.mubr.msk.bf16.vlgmr.msra.gmra.mxu0 %vm481_vm3, %v1600_v11  ;;  %v5014_v11 = vld [vmem:[#allocation7 + $0x18] sm:$0xff]  }
 0x1cc   : > { %4622 = vmatpush3.bf16.msra.mxu0 %v4993_v9  ;;  %4623 = vmatprep.mubr.msk.bf16.mxu0 %vm5275_vm2, %v5274_v10 }
 0x1cd   : > { %4633 = vmatprep.subr.bf16.mxu0 %v5274_v10 }
 0x1cf   : > { %4618 = vmatmul.mubr.msk.bf16.vlgmr.msra.gmra.mxu1 %vm481_vm3, %v1651_v13  ;;  %v5015_v13 = vld [vmem:[#allocation7 + $0x8] sm:$0xff]  }
 0x1d0   : > { %4628 = vmatpush3.bf16.msra.mxu1 %v4994_v12  ;;  %4629 = vmatprep.mubr.msk.bf16.mxu1 %vm5275_vm2, %v5274_v10 }
 0x1d1   : > { %4639 = vmatprep.subr.bf16.mxu1 %v5274_v10 }
 0x1d3   : > { %4624 = vmatmul.mubr.msk.bf16.vlgmr.msra.gmra.mxu0 %vm481_vm3, %v1704_v15  ;;  %v5016_v15 = vld [vmem:[#allocation7] sm:$0xff]  }
 0x1d4   : > { %4634 = vmatpush3.bf16.msra.mxu0 %v4995_v14  ;;  %4635 = vmatprep.mubr.msk.bf16.mxu0 %vm5275_vm2, %v5274_v10 }
 0x1d5   : > { %4645 = vmatprep.subr.bf16.mxu0 %v5274_v10 }
 0x1d7   : > { %4630 = vmatmul.mubr.msk.bf16.vlgmr.msra.gmra.mxu1 %vm481_vm3, %v1758_v17  ;;  %v5017_v17 = vld [vmem:[#allocation7 + $0x10] sm:$0xff]  }
 0x1d8   : > { %v519_v18 = vpop.f32.mrf.mxu0  ;;  %4640 = vmatpush3.bf16.msra.mxu1 %v4996_v16  ;;  %4641 = vmatprep.mubr.msk.bf16.mxu1 %vm5275_vm2, %v5274_v10 }
 0x1d9   : > { %v568_v20 = vpop.f32.mrf.mxu1  ;;  %4651 = vmatprep.subr.bf16.mxu1 %v5274_v10 }
 0x1da   : > { %v4493_v23 = vpop.f32.mrf.mxu0  ;;  %v569_v30 = vadd.f32 %v568_v20, %v519_v18 }
 0x1db   : > { %v4499_v22 = vpop.f32.mrf.mxu1  ;;  %4636 = vmatmul.mubr.msk.bf16.vlgmr.msra.gmra.mxu0 %vm481_vm3, %v1827_v21  ;;  %v5019_v21 = vld [vmem:[#allocation7 + $0x8] sm:$0xff]   ;;  %v5020_v23 = vld [vmem:[#allocation7] sm:$0xff]  }
 0x1dc   : > { %4646 = vmatpush3.bf16.msra.mxu0 %v4997_v19  ;;  %4647 = vmatprep.mubr.msk.bf16.mxu0 %vm5275_vm2, %v5274_v10  ;;  %v522_v25 = vpop.f32.mrf.mxu0  ;;  %v5018_v19 = vld [vmem:[#allocation7 + $0x18] sm:$0xff]  }
 0x1dd   : > { %v571_v26 = vpop.f32.mrf.mxu1  ;;  %4657 = vmatprep.subr.bf16.mxu0 %v5274_v10  ;;  %v5021_v25 = vld [vmem:[#allocation7 + $0x10] sm:$0xff]  }
 0x1de   : > { %v4494_v29 = vpop.f32.mrf.mxu0 }
 0x1df   : > { %v4500_v28 = vpop.f32.mrf.mxu1  ;;  %4642 = vmatmul.mubr.msk.bf16.vlgmr.msra.gmra.mxu1 %vm481_vm3, %v1878_v27  ;;  %v5022_v27 = vld [vmem:[#allocation7 + $0x18] sm:$0xff]   ;;  %v5023_v29 = vld [vmem:[#allocation7 + $0x8] sm:$0xff]  }
 0x1e0   : > { %4652 = vmatpush3.bf16.msra.mxu1 %v4998_v24  ;;  %4653 = vmatprep.mubr.msk.bf16.mxu1 %vm5275_vm2, %v5274_v10 }
 0x1e1   : > { %v620_v32 = vpop.f32.mrf.mxu0  ;;  %v673_v33 = vpop.f32.mrf.mxu1  ;;  %4663 = vmatprep.subr.bf16.mxu1 %v5274_v10 }
 0x1e2   : > { %v626_v35 = vadd.f32 %v620_v32, %v569_v30 }
 0x1e3   : > { %v4511_v41 = vpop.f32.mrf.mxu1  ;;  %v4505_v42 = vpop.f32.mrf.mxu0  ;;  %4648 = vmatmul.mubr.msk.bf16.vlgmr.msra.gmra.mxu0 %vm481_vm3, %v1931_v34 }
 0x1e4   : > { %v679_v43 = vadd.f32 %v673_v33, %v626_v35  ;;  %4658 = vmatpush3.bf16.msra.mxu0 %v4999_v31  ;;  %4659 = vmatprep.mubr.msk.bf16.mxu0 %vm5275_vm2, %v5274_v10  ;;  %v5024_v31 = vld [vmem:[#allocation7] sm:$0xff]   ;;  %v5025_v33 = vld [vmem:[#allocation7 + $0x10] sm:$0xff]   ;;  %v5026_v41 = vld [vmem:[#allocation7 + $0x18] sm:$0xff]  }
 0x1e5   : > { %v623_v45 = vpop.f32.mrf.mxu0  ;;  %v676_v46 = vpop.f32.mrf.mxu1  ;;  %4669 = vmatprep.subr.bf16.mxu0 %v5274_v10 }
 0x1e6   : > { %v680_v48 = vadd.f32 %v679_v43, %v5682_v36  ;;  %v5027_v46 = vld [vmem:[#allocation7 + $0x8] sm:$0xff]  }
 0x1e7   : > { %v4512_v49 = vpop.f32.mrf.mxu1  ;;  %v4506_v50 = vpop.f32.mrf.mxu0  ;;  %4654 = vmatmul.mubr.msk.bf16.vlgmr.msra.gmra.mxu1 %vm481_vm3, %v1985_v47 }
 0x1e8   : > { %v4218_v51 = vmul.f32 -1.442695, %v680_v48  ;;  %4664 = vmatpush3.bf16.msra.mxu1 %v5000_v44  ;;  %4665 = vmatprep.mubr.msk.bf16.mxu1 %vm5275_vm2, %v5274_v10 }
 0x1e9   : > { %4675 = vmatprep.subr.bf16.mxu1 %v5274_v10 }
 0x1ea   : > { %5035 = vpow2.f32 %v4218_v51 }
 0x1eb   : > { %4660 = vmatmul.mubr.msk.bf16.vlgmr.msra.gmra.mxu0 %vm481_vm3, %v2050_v53  ;;  %v5028_v53 = vld [vmem:[#allocation7] sm:$0xff]  }
 0x1ec   : > { %4670 = vmatpush3.bf16.msra.mxu0 %v5001_v52  ;;  %4671 = vmatprep.mubr.msk.bf16.mxu0 %vm5275_vm2, %v5274_v10 }
 0x1ed   : > { %4681 = vmatprep.subr.bf16.mxu0 %v5274_v10 }
 0x1ef   : > { %4666 = vmatmul.mubr.msk.bf16.vlgmr.msra.gmra.mxu1 %vm481_vm3, %v2101_v55 }
 0x1f0   : > { %4676 = vmatpush3.bf16.msra.mxu1 %v5002_v54  ;;  %4677 = vmatprep.mubr.msk.bf16.mxu1 %vm5275_vm2, %v5274_v10 }
 0x1f1   : > { %4687 = vmatprep.subr.bf16.mxu1 %v5274_v10 }
 0x1f3   : > { %4672 = vmatmul.mubr.msk.bf16.vlgmr.msra.gmra.mxu0 %vm481_vm3, %v2154_v57 }
 0x1f4   : > { %4682 = vmatpush3.bf16.msra.mxu0 %v5003_v56  ;;  %4683 = vmatprep.mubr.msk.bf16.mxu0 %vm5275_vm2, %v5274_v10 }
 0x1f5   : > { %4693 = vmatprep.subr.bf16.mxu0 %v5274_v10 }
 0x1f7   : > { %v5036_v60 = vpop.eup %5035  ;;  %4678 = vmatmul.mubr.msk.bf16.vlgmr.msra.gmra.mxu1 %vm481_vm3, %v2208_v59 }
 0x1f8   : > { %v684_v61 = vadd.f32 1.0, %v5036_v60  ;;  %4688 = vmatpush3.bf16.msra.mxu1 %v5004_v58  ;;  %4689 = vmatprep.mubr.msk.bf16.mxu1 %vm5275_vm2, %v5274_v10 }
 0x1f9   : > { %4699 = vmatprep.subr.bf16.mxu1 %v5274_v10 }
 0x1fa   : > { %5037 = vrcp.f32 %v684_v61  ;;  %v5029_v61 = vld [vmem:[#allocation7 + $0x10] sm:$0xff]  }
 0x1fb   : > { %4684 = vmatmul.mubr.msk.bf16.vlgmr.msra.gmra.mxu0 %vm481_vm3, %v5522_v37  ;;  %v5008_v37 = vld [vmem:[#allocation7] sm:$0xff]  }
 0x1fc   : > { %4694 = vmatpush3.bf16.msra.mxu0 %v5005_v62  ;;  %4695 = vmatprep.mubr.msk.bf16.mxu0 %vm5275_vm2, %v5274_v10 }
 0x1fd   : > { %4705 = vmatprep.subr.bf16.mxu0 %v5274_v10 }
 0x1ff   : > { %4690 = vmatmul.mubr.msk.bf16.vlgmr.msra.gmra.mxu1 %vm481_vm3, %v5535_v39 }
 0x200   : > { %4700 = vmatpush3.bf16.msra.mxu1 %v5006_v63  ;;  %4701 = vmatprep.mubr.msk.bf16.mxu1 %vm5275_vm2, %v5274_v10 }
 0x201   : > { %4711 = vmatprep.subr.bf16.mxu1 %v5274_v10 }
 0x203   : > { %4696 = vmatmul.mubr.msk.bf16.vlgmr.msra.gmra.mxu0 %vm481_vm3, %v5528_v38  ;;  %v2493_v38 = vpop.permute.xlu0 %2492 }
 0x204   : > { %4706 = vmatpush3.bf16.msra.mxu0 %v5007_v0  ;;  %4707 = vmatprep.mubr.msk.bf16.mxu0 %vm5275_vm2, %v5274_v10 }
 0x205   : > { %4717 = vmatprep.subr.bf16.mxu0 %v5274_v10 }
 0x207   : > { %v5038_v1 = vpop.eup %5037  ;;  %4702 = vmatmul.mubr.msk.bf16.vlgmr.msra.gmra.mxu1 %vm481_vm3, %v5541_v40  ;;  %v2545_v40 = vpop.permute.xlu1 %2544 }
 0x208   : > { %v687_v39 = vmul.f32 %v5038_v1, %v680_v48  ;;  %4712 = vmatpush3.bf16.msra.mxu1 %v5008_v37  ;;  %4713 = vmatprep.mubr.msk.bf16.mxu1 %vm5275_vm2, %v5274_v10  ;;  %v2599_v5 = vpop.permute.xlu0 %2598 }
 0x209   : > { %4723 = vmatprep.subr.bf16.mxu1 %v5274_v10 }
 0x20a   : > { %689 = vst.msk [vmem:[%s5730_s30] sm:$0xf] %vm688_vm4, %v687_v39 }
 0x20b   : > { %4708 = vmatmul.mubr.msk.bf16.vlgmr.msra.gmra.mxu0 %vm481_vm3, %v2493_v38  ;;  %v2654_v7 = vpop.permute.xlu1 %2653  ;;  %v5030_v38 = vld [vmem:[#allocation7 + $0x18] sm:$0xff]  }
 0x20c   : > { %4718 = vmatpush3.bf16.msra.mxu0 %v5009_v2  ;;  %4719 = vmatprep.mubr.msk.bf16.mxu0 %vm5275_vm2, %v5274_v10  ;;  %v2723_v9 = vpop.permute.xlu0 %2722 }
 0x20d   : > { %4729 = vmatprep.subr.bf16.mxu0 %v5274_v10 }
 0x20f   : > { %4714 = vmatmul.mubr.msk.bf16.vlgmr.msra.gmra.mxu1 %vm481_vm3, %v2545_v40  ;;  %v2774_v12 = vpop.permute.xlu1 %2773 }
 0x210   : > { %4724 = vmatpush3.bf16.msra.mxu1 %v5010_v3  ;;  %4725 = vmatprep.mubr.msk.bf16.mxu1 %vm5275_vm2, %v5274_v10  ;;  %v2827_v14 = vpop.permute.xlu0 %2826 }
 0x211   : > { %4735 = vmatprep.subr.bf16.mxu1 %v5274_v10 }
 0x213   : > { %4720 = vmatmul.mubr.msk.bf16.vlgmr.msra.gmra.mxu0 %vm481_vm3, %v2599_v5  ;;  %v2881_v16 = vpop.permute.xlu1 %2880 }
 0x214   : > { %4730 = vmatpush3.bf16.msra.mxu0 %v5011_v4  ;;  %4731 = vmatprep.mubr.msk.bf16.mxu0 %vm5275_vm2, %v5274_v10  ;;  %v2946_v18 = vpop.permute.xlu0 %2945 }
 0x215   : > { %4741 = vmatprep.subr.bf16.mxu0 %v5274_v10 }
 0x217   : > { %4726 = vmatmul.mubr.msk.bf16.vlgmr.msra.gmra.mxu1 %vm481_vm3, %v2654_v7  ;;  %v2997_v20 = vpop.permute.xlu1 %2996  ;;  %v5031_v7 = vld [vmem:[#allocation7 + $0x8] sm:$0xff]  }
 0x218   : > { %4736 = vmatpush3.bf16.msra.mxu1 %v5012_v6  ;;  %4737 = vmatprep.mubr.msk.bf16.mxu1 %vm5275_vm2, %v5274_v10  ;;  %v3050_v22 = vpop.permute.xlu0 %3049 }
 0x219   : > { %4747 = vmatprep.subr.bf16.mxu1 %v5274_v10 }
 0x21b   : > { %4732 = vmatmul.mubr.msk.bf16.vlgmr.msra.gmra.mxu0 %vm481_vm3, %v2723_v9  ;;  %v3104_v24 = vpop.permute.xlu1 %3103 }
 0x21c   : > { %4742 = vmatpush3.bf16.msra.mxu0 %v5013_v8  ;;  %4743 = vmatprep.mubr.msk.bf16.mxu0 %vm5275_vm2, %v5274_v10  ;;  %v3173_v26 = vpop.permute.xlu0 %3172 }
 0x21d   : > { %4753 = vmatprep.subr.bf16.mxu0 %v5274_v10 }
 0x21f   : > { %4738 = vmatmul.mubr.msk.bf16.vlgmr.msra.gmra.mxu1 %vm481_vm3, %v2774_v12  ;;  %v3224_v28 = vpop.permute.xlu1 %3223 }
 0x220   : > { %4748 = vmatpush3.bf16.msra.mxu1 %v5014_v11  ;;  %4749 = vmatprep.mubr.msk.bf16.mxu1 %vm5275_vm2, %v5274_v10  ;;  %v3277_v30 = vpop.permute.xlu0 %3276 }
 0x221   : > { %4759 = vmatprep.subr.bf16.mxu1 %v5274_v10 }
 0x223   : > { %4744 = vmatmul.mubr.msk.bf16.vlgmr.msra.gmra.mxu0 %vm481_vm3, %v2827_v14  ;;  %v3331_v32 = vpop.permute.xlu1 %3330 }
 0x224   : > { %4754 = vmatpush3.bf16.msra.mxu0 %v5015_v13  ;;  %4755 = vmatprep.mubr.msk.bf16.mxu0 %vm5275_vm2, %v5274_v10  ;;  %v3396_v34 = vpop.permute.xlu0 %3395 }
 0x225   : > { %4765 = vmatprep.subr.bf16.mxu0 %v5274_v10 }
 0x227   : > { %4750 = vmatmul.mubr.msk.bf16.vlgmr.msra.gmra.mxu1 %vm481_vm3, %v2881_v16  ;;  %v3447_v43 = vpop.permute.xlu1 %3446 }
 0x228   : > { %4760 = vmatpush3.bf16.msra.mxu1 %v5016_v15  ;;  %4761 = vmatprep.mubr.msk.bf16.mxu1 %vm5275_vm2, %v5274_v10  ;;  %v3500_v49 = vpop.permute.xlu0 %3499  ;;  %v5032_v15 = vld [vmem:[#allocation7] sm:$0xff]  }
 0x229   : > { %4771 = vmatprep.subr.bf16.mxu1 %v5274_v10 }
 0x22b   : > { %4756 = vmatmul.mubr.msk.bf16.vlgmr.msra.gmra.mxu0 %vm481_vm3, %v2946_v18  ;;  %v3554_v56 = vpop.permute.xlu1 %3553 }
 0x22c   : > { %4766 = vmatpush3.bf16.msra.mxu0 %v5017_v17  ;;  %4767 = vmatprep.mubr.msk.bf16.mxu0 %vm5275_vm2, %v5274_v10  ;;  %v3623_v0 = vpop.permute.xlu0 %3622 }
 0x22d   : > { %4777 = vmatprep.subr.bf16.mxu0 %v5274_v10 }
 0x22f   : > { %4762 = vmatmul.mubr.msk.bf16.vlgmr.msra.gmra.mxu1 %vm481_vm3, %v2997_v20  ;;  %v3674_v4 = vpop.permute.xlu1 %3673 }
 0x230   : > { %4772 = vmatpush3.bf16.msra.mxu1 %v5018_v19  ;;  %4773 = vmatprep.mubr.msk.bf16.mxu1 %vm5275_vm2, %v5274_v10  ;;  %v3727_v11 = vpop.permute.xlu0 %3726 }
 0x231   : > { %4783 = vmatprep.subr.bf16.mxu1 %v5274_v10 }
 0x233   : > { %4768 = vmatmul.mubr.msk.bf16.vlgmr.msra.gmra.mxu0 %vm481_vm3, %v3050_v22  ;;  %v3781_v18 = vpop.permute.xlu1 %3780 }
 0x234   : > { %4778 = vmatpush3.bf16.msra.mxu0 %v5019_v21  ;;  %4779 = vmatprep.mubr.msk.bf16.mxu0 %vm5275_vm2, %v5274_v10 }
 0x235   : > { %4789 = vmatprep.subr.bf16.mxu0 %v5274_v10 }
 0x237   : > { %4774 = vmatmul.mubr.msk.bf16.vlgmr.msra.gmra.mxu1 %vm481_vm3, %v3104_v24 }
 0x238   : > { %4784 = vmatpush3.bf16.msra.mxu1 %v5020_v23  ;;  %4785 = vmatprep.mubr.msk.bf16.mxu1 %vm5275_vm2, %v5274_v10  ;;  %v5033_v23 = vld [vmem:[#allocation7 + $0x10] sm:$0xff]  }
 0x239   : > { %4795 = vmatprep.subr.bf16.mxu1 %v5274_v10 }
 0x23b   : > { %4780 = vmatmul.mubr.msk.bf16.vlgmr.msra.gmra.mxu0 %vm481_vm3, %v3173_v26  ;;  %v3846_v26 = vpop.permute.xlu0 %3845 }
 0x23c   : > { %4790 = vmatpush3.bf16.msra.mxu0 %v5021_v25  ;;  %4791 = vmatprep.mubr.msk.bf16.mxu0 %vm5275_vm2, %v5274_v10 }
 0x23d   : > { %4801 = vmatprep.subr.bf16.mxu0 %v5274_v10 }
 0x23f   : > { %4786 = vmatmul.mubr.msk.bf16.vlgmr.msra.gmra.mxu1 %vm481_vm3, %v3224_v28 }
 0x240   : > { %4796 = vmatpush3.bf16.msra.mxu1 %v5022_v27  ;;  %4797 = vmatprep.mubr.msk.bf16.mxu1 %vm5275_vm2, %v5274_v10 }
 0x241   : > { %4807 = vmatprep.subr.bf16.mxu1 %v5274_v10 }
 0x243   : > { %4792 = vmatmul.mubr.msk.bf16.vlgmr.msra.gmra.mxu0 %vm481_vm3, %v3277_v30 }
 0x244   : > { %4802 = vmatpush3.bf16.msra.mxu0 %v5023_v29  ;;  %4803 = vmatprep.mubr.msk.bf16.mxu0 %vm5275_vm2, %v5274_v10 }
 0x245   : > { %4813 = vmatprep.subr.bf16.mxu0 %v5274_v10 }
 0x247   : > { %4798 = vmatmul.mubr.msk.bf16.vlgmr.msra.gmra.mxu1 %vm481_vm3, %v3331_v32 }
 0x248   : > { %4808 = vmatpush3.bf16.msra.mxu1 %v5024_v31  ;;  %4809 = vmatprep.mubr.msk.bf16.mxu1 %vm5275_vm2, %v5274_v10 }
 0x249   : > { %4819 = vmatprep.subr.bf16.mxu1 %v5274_v10 }
 0x24b   : > { %v740_v35 = vpop.f32.mrf.mxu0  ;;  %4804 = vmatmul.mubr.msk.bf16.vlgmr.msra.gmra.mxu0 %vm481_vm3, %v3396_v34 }
 0x24c   : > { %4814 = vmatpush3.bf16.msra.mxu0 %v5025_v33  ;;  %4815 = vmatprep.mubr.msk.bf16.mxu0 %vm5275_vm2, %v5274_v10  ;;  %v5034_v33 = vld [vmem:[#allocation7 + $0x18] sm:$0xff]  }
 0x24d   : > { %v4517_v42 = vpop.f32.mrf.mxu0  ;;  %4825 = vmatprep.subr.bf16.mxu0 %v5274_v10 }
 0x24f   : > { %v743_v44 = vpop.f32.mrf.mxu0  ;;  %v792_v45 = vpop.f32.mrf.mxu1  ;;  %4810 = vmatmul.mubr.msk.bf16.vlgmr.msra.gmra.mxu1 %vm481_vm3, %v3447_v43 }
 0x250   : > { %4820 = vmatpush3.bf16.msra.mxu1 %v5026_v41  ;;  %4821 = vmatprep.mubr.msk.bf16.mxu1 %vm5275_vm2, %v5274_v10  ;;  %v793_v52 = vadd.f32 %v792_v45, %v740_v35  ;;  %v3897_v41 = vpop.permute.xlu1 %3896 }
 0x251   : > { %v4518_v47 = vpop.f32.mrf.mxu0  ;;  %v4523_v48 = vpop.f32.mrf.mxu1  ;;  %4831 = vmatprep.subr.bf16.mxu1 %v5274_v10 }
 0x253   : > { %v795_v50 = vpop.f32.mrf.mxu1  ;;  %v846_v51 = vpop.f32.mrf.mxu0  ;;  %4816 = vmatmul.mubr.msk.bf16.vlgmr.msra.gmra.mxu0 %vm481_vm3, %v3500_v49 }
 0x254   : > { %4826 = vmatpush3.bf16.msra.mxu0 %v5027_v46  ;;  %4827 = vmatprep.mubr.msk.bf16.mxu0 %vm5275_vm2, %v5274_v10  ;;  %v852_v57 = vadd.f32 %v846_v51, %v793_v52  ;;  %v3950_v46 = vpop.permute.xlu0 %3949  ;;  %v4004_v52 = vpop.permute.xlu1 %4003 }
 0x255   : > { %v4524_v54 = vpop.f32.mrf.mxu1  ;;  %v4529_v55 = vpop.f32.mrf.mxu0  ;;  %4837 = vmatprep.subr.bf16.mxu0 %v5274_v10 }
 0x257   : > { %v849_v58 = vpop.f32.mrf.mxu0  ;;  %v901_v59 = vpop.f32.mrf.mxu1  ;;  %4822 = vmatmul.mubr.msk.bf16.vlgmr.msra.gmra.mxu1 %vm481_vm3, %v3554_v56 }
 0x258   : > { %v907_v60 = vadd.f32 %v901_v59, %v852_v57  ;;  %4832 = vmatpush3.bf16.msra.mxu1 %v5028_v53  ;;  %4833 = vmatprep.mubr.msk.bf16.mxu1 %vm5275_vm2, %v5274_v10 }
 0x259   : > { %v4530_v62 = vpop.f32.mrf.mxu0  ;;  %v4535_v63 = vpop.f32.mrf.mxu1  ;;  %4843 = vmatprep.subr.bf16.mxu1 %v5274_v10 }
 0x25a   : > { %v5815_v37 = vadd.f32 %v907_v60, %v5682_v36 }
 0x25b   : > { %v904_v1 = vpop.f32.mrf.mxu1  ;;  %v971_v39 = vpop.f32.mrf.mxu0  ;;  %4828 = vmatmul.mubr.msk.bf16.vlgmr.msra.gmra.mxu0 %vm481_vm3, %v3623_v0 }
 0x25c   : > { %v4227_v2 = vmul.f32 -1.442695, %v5815_v37  ;;  %4838 = vmatpush3.bf16.msra.mxu0 %v5029_v61  ;;  %4839 = vmatprep.mubr.msk.bf16.mxu0 %vm5275_vm2, %v5274_v10 }
 0x25d   : > { %v4536_v3 = vpop.f32.mrf.mxu1  ;;  %v4541_v40 = vpop.f32.mrf.mxu0  ;;  %4849 = vmatprep.subr.bf16.mxu0 %v5274_v10 }
 0x25e   : > { %5039 = vpow2.f32 %v4227_v2 }
 0x25f   : > { %v974_v5 = vpop.f32.mrf.mxu0  ;;  %v1022_v6 = vpop.f32.mrf.mxu1  ;;  %4834 = vmatmul.mubr.msk.bf16.vlgmr.msra.gmra.mxu1 %vm481_vm3, %v3674_v4 }
 0x260   : > { %4844 = vmatpush3.bf16.msra.mxu1 %v5030_v38  ;;  %4845 = vmatprep.mubr.msk.bf16.mxu1 %vm5275_vm2, %v5274_v10  ;;  %v1023_v14 = vadd.f32 %v1022_v6, %v971_v39 }
 0x261   : > { %v4542_v8 = vpop.f32.mrf.mxu0  ;;  %v4547_v9 = vpop.f32.mrf.mxu1  ;;  %4855 = vmatprep.subr.bf16.mxu1 %v5274_v10 }
 0x263   : > { %v1025_v12 = vpop.f32.mrf.mxu1  ;;  %v1075_v13 = vpop.f32.mrf.mxu0  ;;  %4840 = vmatmul.mubr.msk.bf16.vlgmr.msra.gmra.mxu0 %vm481_vm3, %v3727_v11 }
 0x264   : > { %4850 = vmatpush3.bf16.msra.mxu0 %v5031_v7  ;;  %4851 = vmatprep.mubr.msk.bf16.mxu0 %vm5275_vm2, %v5274_v10  ;;  %v1081_v19 = vadd.f32 %v1075_v13, %v1023_v14 }
 0x265   : > { %v4548_v16 = vpop.f32.mrf.mxu1  ;;  %v4553_v17 = vpop.f32.mrf.mxu0  ;;  %4861 = vmatprep.subr.bf16.mxu0 %v5274_v10 }
 0x267   : > { %v1078_v20 = vpop.f32.mrf.mxu0  ;;  %v1129_v21 = vpop.f32.mrf.mxu1  ;;  %4846 = vmatmul.mubr.msk.bf16.vlgmr.msra.gmra.mxu1 %vm481_vm3, %v3781_v18 }
 0x268   : > { %v1135_v22 = vadd.f32 %v1129_v21, %v1081_v19  ;;  %4856 = vmatpush3.bf16.msra.mxu1 %v5032_v15  ;;  %4857 = vmatprep.mubr.msk.bf16.mxu1 %vm5275_vm2, %v5274_v10 }
 0x269   : > { %v4554_v24 = vpop.f32.mrf.mxu0  ;;  %v4559_v25 = vpop.f32.mrf.mxu1  ;;  %4867 = vmatprep.subr.bf16.mxu1 %v5274_v10 }
 0x26a   : > { %v5835_v27 = vadd.f32 %v1135_v22, %v5682_v36 }
 0x26b   : > { %v5040_v28 = vpop.eup %5039  ;;  %v1132_v29 = vpop.f32.mrf.mxu1  ;;  %4852 = vmatmul.mubr.msk.bf16.vlgmr.msra.gmra.mxu0 %vm481_vm3, %v3846_v26 }
 0x26c   : > { %v1194_v30 = vpop.f32.mrf.mxu0  ;;  %v912_v31 = vadd.f32 1.0, %v5040_v28  ;;  %v4236_v32 = vmul.f32 -1.442695, %v5835_v27  ;;  %4862 = vmatpush3.bf16.msra.mxu0 %v5033_v23  ;;  %4863 = vmatprep.mubr.msk.bf16.mxu0 %vm5275_vm2, %v5274_v10 }
 0x26d   : > { %v4560_v34 = vpop.f32.mrf.mxu1 }
 0x26e   : > { %v4565_v35 = vpop.f32.mrf.mxu0  ;;  %5041 = vrcp.f32 %v912_v31 }
 0x26f   : > { %5043 = vpow2.f32 %v4236_v32  ;;  %v1245_v43 = vpop.f32.mrf.mxu1  ;;  %4858 = vmatmul.mubr.msk.bf16.vlgmr.msra.gmra.mxu1 %vm481_vm3, %v3897_v41 }
 0x270   : > { %v1197_v42 = vpop.f32.mrf.mxu0  ;;  %4868 = vmatpush3.bf16.msra.mxu1 %v5034_v33  ;;  %4869 = vmatprep.mubr.msk.bf16.mxu1 %vm5275_vm2, %v5274_v10  ;;  %v1246_v49 = vadd.f32 %v1245_v43, %v1194_v30 }
 0x271   : > { %v4571_v45 = vpop.f32.mrf.mxu1 }
 0x272   : > { %v4566_v44 = vpop.f32.mrf.mxu0 }
 0x273   : > { %v1248_v47 = vpop.f32.mrf.mxu1  ;;  %4864 = vmatmul.mubr.msk.bf16.vlgmr.msra.gmra.mxu0 %vm481_vm3, %v3950_v46 }
 0x274   : > { %v1298_v48 = vpop.f32.mrf.mxu0 }
 0x275   : > { %v4572_v50 = vpop.f32.mrf.mxu1  ;;  %v1304_v53 = vadd.f32 %v1298_v48, %v1246_v49 }
 0x276   : > { %v4577_v51 = vpop.f32.mrf.mxu0 }
 0x277   : > { %v1352_v55 = vpop.f32.mrf.mxu1  ;;  %4870 = vmatmul.mubr.msk.bf16.vlgmr.msra.gmra.mxu1 %vm481_vm3, %v4004_v52 }
 0x278   : > { %v1301_v54 = vpop.f32.mrf.mxu0  ;;  %v1358_v56 = vadd.f32 %v1352_v55, %v1304_v53 }
 0x279   : > { %v4583_v58 = vpop.f32.mrf.mxu1 }
 0x27a   : > { %v4578_v57 = vpop.f32.mrf.mxu0  ;;  %v1359_v10 = vadd.f32 %v1358_v56, %v5682_v36 }
 0x27b   : > { %v5042_v59 = vpop.eup %5041  ;;  %v1355_v60 = vpop.f32.mrf.mxu1 }
 0x27c   : > { %v1421_v61 = vpop.f32.mrf.mxu0  ;;  %v5044_v62 = vpop.eup %5043  ;;  %v4245_v63 = vmul.f32 -1.442695, %v1359_v10  ;;  %v915_v0 = vmul.f32 %v5042_v59, %v5815_v37 }
 0x27d   : > { %v1140_v1 = vadd.f32 1.0, %v5044_v62  ;;  %v4584_v39 = vpop.f32.mrf.mxu1 }
 0x27e   : > { %v4589_v2 = vpop.f32.mrf.mxu0  ;;  %5045 = vpow2.f32 %v4245_v63  ;;  %917 = vrot.lane.b32.xlu0 %v915_v0, %s5279_s12 }
 0x27f   : > { %5047 = vrcp.f32 %v1140_v1  ;;  %v1472_v3 = vpop.f32.mrf.mxu1 }
 0x280   : > { %v1424_v38 = vpop.f32.mrf.mxu0  ;;  %v1473_v7 = vadd.f32 %v1472_v3, %v1421_v61 }
 0x281   : > { %v4595_v4 = vpop.f32.mrf.mxu1 }
 0x282   : > { %v4590_v40 = vpop.f32.mrf.mxu0 }
 0x283   : > { %v1475_v5 = vpop.f32.mrf.mxu1 }
 0x284   : > { %v1525_v6 = vpop.f32.mrf.mxu0 }
 0x285   : > { %v4596_v8 = vpop.f32.mrf.mxu1  ;;  %v1531_v11 = vadd.f32 %v1525_v6, %v1473_v7 }
 0x286   : > { %v4601_v9 = vpop.f32.mrf.mxu0 }
 0x287   : > { %v1579_v13 = vpop.f32.mrf.mxu1 }
 0x288   : > { %v1528_v12 = vpop.f32.mrf.mxu0  ;;  %v1585_v37 = vadd.f32 %v1579_v13, %v1531_v11 }
 0x289   : > { %v4607_v15 = vpop.f32.mrf.mxu1 }
 0x28a   : > { %v4602_v14 = vpop.f32.mrf.mxu0  ;;  %v5850_v16 = vadd.f32 %v1585_v37, %v5682_v36 }
 0x28b   : > { %v5046_v17 = vpop.eup %5045  ;;  %v1582_v18 = vpop.f32.mrf.mxu1 }
 0x28c   : > { %v1644_v19 = vpop.f32.mrf.mxu0  ;;  %v5048_v20 = vpop.eup %5047  ;;  %v1363_v21 = vadd.f32 1.0, %v5046_v17  ;;  %v4254_v22 = vmul.f32 -1.442695, %v5850_v16 }
 0x28d   : > { %v1143_v23 = vmul.f32 %v5048_v20, %v5835_v27  ;;  %v4608_v24 = vpop.f32.mrf.mxu1 }
 0x28e   : > { %v4613_v25 = vpop.f32.mrf.mxu0  ;;  %5049 = vrcp.f32 %v1363_v21 }
 0x28f   : > { %5051 = vpow2.f32 %v4254_v22  ;;  %v1695_v28 = vpop.f32.mrf.mxu1  ;;  %1144 = vst.msk [vmem:[%s5730_s30 + $0x4] sm:$0xf] %vm688_vm4, %v1143_v23 }
 0x290   : > { %v1647_v26 = vpop.f32.mrf.mxu0  ;;  %v1696_v33 = vadd.f32 %v1695_v28, %v1644_v19 }
 0x291   : > { %v4619_v30 = vpop.f32.mrf.mxu1 }
 0x292   : > { %v4614_v29 = vpop.f32.mrf.mxu0 }
 0x293   : > { %v1698_v31 = vpop.f32.mrf.mxu1 }
 0x294   : > { %v1748_v32 = vpop.f32.mrf.mxu0 }
 0x295   : > { %v4620_v34 = vpop.f32.mrf.mxu1  ;;  %v1754_v41 = vadd.f32 %v1748_v32, %v1696_v33 }
 0x296   : > { %v4625_v35 = vpop.f32.mrf.mxu0 }
 0x297   : > { %v1802_v43 = vpop.f32.mrf.mxu1 }
 0x298   : > { %v1751_v42 = vpop.f32.mrf.mxu0  ;;  %v1808_v44 = vadd.f32 %v1802_v43, %v1754_v41 }
 0x299   : > { %v4631_v45 = vpop.f32.mrf.mxu1 }
 0x29a   : > { %v4626_v27 = vpop.f32.mrf.mxu0  ;;  %v1809_v46 = vadd.f32 %v1808_v44, %v5682_v36 }
 0x29b   : > { %v5050_v47 = vpop.eup %5049  ;;  %v1805_v48 = vpop.f32.mrf.mxu1 }
 0x29c   : > { %v1871_v49 = vpop.f32.mrf.mxu0  ;;  %v5052_v50 = vpop.eup %5051  ;;  %v4263_v51 = vmul.f32 -1.442695, %v1809_v46  ;;  %v1366_v52 = vmul.f32 %v5050_v47, %v1359_v10 }
 0x29d   : > { %v1590_v53 = vadd.f32 1.0, %v5052_v50  ;;  %v4632_v54 = vpop.f32.mrf.mxu1 }
 0x29e   : > { %v4637_v55 = vpop.f32.mrf.mxu0  ;;  %5053 = vpow2.f32 %v4263_v51  ;;  %1368 = vrot.lane.b32.xlu1 %v1366_v52, %s5279_s12 }
 0x29f   : > { %5055 = vrcp.f32 %v1590_v53  ;;  %v1922_v57 = vpop.f32.mrf.mxu1 }
 0x2a0   : > { %v1874_v56 = vpop.f32.mrf.mxu0  ;;  %v1923_v62 = vadd.f32 %v1922_v57, %v1871_v49 }
 0x2a1   : > { %v4643_v59 = vpop.f32.mrf.mxu1 }
 0x2a2   : > { %v4638_v58 = vpop.f32.mrf.mxu0 }
 0x2a3   : > { %v1925_v60 = vpop.f32.mrf.mxu1 }
 0x2a4   : > { %v1975_v61 = vpop.f32.mrf.mxu0 }
 0x2a5   : > { %v4644_v63 = vpop.f32.mrf.mxu1  ;;  %v1981_v1 = vadd.f32 %v1975_v61, %v1923_v62 }
 0x2a6   : > { %v4649_v0 = vpop.f32.mrf.mxu0 }
 0x2a7   : > { %v2029_v2 = vpop.f32.mrf.mxu1 }
 0x2a8   : > { %v1978_v39 = vpop.f32.mrf.mxu0  ;;  %v2035_v10 = vadd.f32 %v2029_v2, %v1981_v1 }
 0x2a9   : > { %v4655_v3 = vpop.f32.mrf.mxu1 }
 0x2aa   : > { %v4650_v38 = vpop.f32.mrf.mxu0  ;;  %v5859_v40 = vadd.f32 %v2035_v10, %v5682_v36 }
 0x2ab   : > { %v5054_v4 = vpop.eup %5053  ;;  %v2032_v5 = vpop.f32.mrf.mxu1 }
 0x2ac   : > { %v2094_v6 = vpop.f32.mrf.mxu0  ;;  %v5056_v7 = vpop.eup %5055  ;;  %v1813_v8 = vadd.f32 1.0, %v5054_v4  ;;  %v4272_v9 = vmul.f32 -1.442695, %v5859_v40 }
 0x2ad   : > { %v1593_v11 = vmul.f32 %v5056_v7, %v5850_v16  ;;  %v4656_v12 = vpop.f32.mrf.mxu1 }
 0x2ae   : > { %v4661_v13 = vpop.f32.mrf.mxu0  ;;  %5057 = vrcp.f32 %v1813_v8 }
 0x2af   : > { %5059 = vpow2.f32 %v4272_v9  ;;  %v2145_v14 = vpop.f32.mrf.mxu1  ;;  %1594 = vst.msk [vmem:[%s5730_s30 + $0x8] sm:$0xf] %vm688_vm4, %v1593_v11 }
 0x2b0   : > { %v2097_v37 = vpop.f32.mrf.mxu0  ;;  %v2146_v20 = vadd.f32 %v2145_v14, %v2094_v6 }
 0x2b1   : > { %v4667_v17 = vpop.f32.mrf.mxu1 }
 0x2b2   : > { %v4662_v15 = vpop.f32.mrf.mxu0 }
 0x2b3   : > { %v2148_v18 = vpop.f32.mrf.mxu1 }
 0x2b4   : > { %v2198_v19 = vpop.f32.mrf.mxu0 }
 0x2b5   : > { %v4668_v21 = vpop.f32.mrf.mxu1  ;;  %v2204_v23 = vadd.f32 %v2198_v19, %v2146_v20 }
 0x2b6   : > { %v4673_v22 = vpop.f32.mrf.mxu0 }
 0x2b7   : > { %v2252_v25 = vpop.f32.mrf.mxu1 }
 0x2b8   : > { %v2201_v24 = vpop.f32.mrf.mxu0  ;;  %v2258_v26 = vadd.f32 %v2252_v25, %v2204_v23 }
 0x2b9   : > { %v4679_v28 = vpop.f32.mrf.mxu1 }
 0x2ba   : > { %v4674_v16 = vpop.f32.mrf.mxu0  ;;  %v2259_v29 = vadd.f32 %v2258_v26, %v5682_v36 }
 0x2bb   : > { %v5058_v30 = vpop.eup %5057  ;;  %v2255_v31 = vpop.f32.mrf.mxu1 }
 0x2bc   : > { %v2319_v32 = vpop.f32.mrf.mxu0  ;;  %v5060_v33 = vpop.eup %5059  ;;  %v4281_v34 = vmul.f32 -1.442695, %v2259_v29  ;;  %v1816_v35 = vmul.f32 %v5058_v30, %v1809_v46 }
 0x2bd   : > { %v2040_v41 = vadd.f32 1.0, %v5060_v33  ;;  %v4680_v42 = vpop.f32.mrf.mxu1 }
 0x2be   : > { %v4685_v43 = vpop.f32.mrf.mxu0  ;;  %5061 = vpow2.f32 %v4281_v34  ;;  %1818 = vrot.lane.b32.xlu0 %v1816_v35, %s5279_s12 }
 0x2bf   : > { %5063 = vrcp.f32 %v2040_v41  ;;  %v2368_v27 = vpop.f32.mrf.mxu1 }
 0x2c0   : > { %v2322_v44 = vpop.f32.mrf.mxu0  ;;  %v2369_v50 = vadd.f32 %v2368_v27, %v2319_v32 }
 0x2c1   : > { %v4691_v47 = vpop.f32.mrf.mxu1 }
 0x2c2   : > { %v4686_v45 = vpop.f32.mrf.mxu0 }
 0x2c3   : > { %v2371_v48 = vpop.f32.mrf.mxu1 }
 0x2c4   : > { %v2419_v49 = vpop.f32.mrf.mxu0 }
 0x2c5   : > { %v4692_v51 = vpop.f32.mrf.mxu1  ;;  %v2425_v53 = vadd.f32 %v2419_v49, %v2369_v50 }
 0x2c6   : > { %v4697_v52 = vpop.f32.mrf.mxu0 }
 0x2c7   : > { %v2471_v55 = vpop.f32.mrf.mxu1 }
 0x2c8   : > { %v2422_v54 = vpop.f32.mrf.mxu0  ;;  %v2477_v46 = vadd.f32 %v2471_v55, %v2425_v53 }
 0x2c9   : > { %v4703_v57 = vpop.f32.mrf.mxu1 }
 0x2ca   : > { %v4698_v56 = vpop.f32.mrf.mxu0  ;;  %v5868_v58 = vadd.f32 %v2477_v46, %v5682_v36 }
 0x2cb   : > { %v5062_v59 = vpop.eup %5061  ;;  %v2474_v60 = vpop.f32.mrf.mxu1 }
 0x2cc   : > { %v2537_v61 = vpop.f32.mrf.mxu0  ;;  %v5064_v62 = vpop.eup %5063  ;;  %v2263_v63 = vadd.f32 1.0, %v5062_v59  ;;  %v4290_v0 = vmul.f32 -1.442695, %v5868_v58 }
 0x2cd   : > { %v2043_v1 = vmul.f32 %v5064_v62, %v5859_v40  ;;  %v4704_v39 = vpop.f32.mrf.mxu1 }
 0x2ce   : > { %v4709_v2 = vpop.f32.mrf.mxu0  ;;  %5065 = vrcp.f32 %v2263_v63 }
 0x2cf   : > { %5067 = vpow2.f32 %v4290_v0  ;;  %v2589_v38 = vpop.f32.mrf.mxu1  ;;  %2044 = vst.msk [vmem:[%s5730_s30 + $0xc] sm:$0xf] %vm688_vm4, %v2043_v1 }
 0x2d0   : > { %v2540_v10 = vpop.f32.mrf.mxu0  ;;  %v2590_v7 = vadd.f32 %v2589_v38, %v2537_v61 }
 0x2d1   : > { %v4715_v4 = vpop.f32.mrf.mxu1 }
 0x2d2   : > { %v4710_v3 = vpop.f32.mrf.mxu0 }
 0x2d3   : > { %v2592_v5 = vpop.f32.mrf.mxu1  ;;  %v5891_v3 = vld [vmem:[%s5986_s3] sm:$0xf] }
 0x2d4   : > { %v2643_v6 = vpop.f32.mrf.mxu0 }
 0x2d5   : > { %v4716_v8 = vpop.f32.mrf.mxu1  ;;  %v2649_v11 = vadd.f32 %v2643_v6, %v2590_v7 }
 0x2d6   : > { %v4721_v9 = vpop.f32.mrf.mxu0 }
 0x2d7   : > { %v2698_v13 = vpop.f32.mrf.mxu1 }
 0x2d8   : > { %v2646_v12 = vpop.f32.mrf.mxu0  ;;  %v2704_v37 = vadd.f32 %v2698_v13, %v2649_v11 }
 0x2d9   : > { %v4727_v14 = vpop.f32.mrf.mxu1 }
 0x2da   : > { %v4722_v40 = vpop.f32.mrf.mxu0  ;;  %v5875_v15 = vadd.f32 %v2704_v37, %v5682_v36 }
 0x2db   : > { %v5066_v17 = vpop.eup %5065  ;;  %v2701_v18 = vpop.f32.mrf.mxu1 }
 0x2dc   : > { %v2767_v19 = vpop.f32.mrf.mxu0  ;;  %v5068_v20 = vpop.eup %5067  ;;  %v4299_v21 = vmul.f32 -1.442695, %v5875_v15  ;;  %v2266_v22 = vmul.f32 %v5066_v17, %v2259_v29 }
 0x2dd   : > { %v2482_v23 = vadd.f32 1.0, %v5068_v20  ;;  %v4728_v24 = vpop.f32.mrf.mxu1 }
 0x2de   : > { %v4733_v25 = vpop.f32.mrf.mxu0  ;;  %5069 = vpow2.f32 %v4299_v21  ;;  %2268 = vrot.lane.b32.xlu1 %v2266_v22, %s5279_s12 }
 0x2df   : > { %5071 = vrcp.f32 %v2482_v23  ;;  %v2818_v16 = vpop.f32.mrf.mxu1 }
 0x2e0   : > { %v2770_v26 = vpop.f32.mrf.mxu0  ;;  %v2819_v33 = vadd.f32 %v2818_v16, %v2767_v19 }
 0x2e1   : > { %v4739_v30 = vpop.f32.mrf.mxu1 }
 0x2e2   : > { %v4734_v28 = vpop.f32.mrf.mxu0 }
 0x2e3   : > { %v2821_v31 = vpop.f32.mrf.mxu1 }
 0x2e4   : > { %v2871_v32 = vpop.f32.mrf.mxu0 }
 0x2e5   : > { %v4740_v34 = vpop.f32.mrf.mxu1  ;;  %v2877_v41 = vadd.f32 %v2871_v32, %v2819_v33 }
 0x2e6   : > { %v4745_v35 = vpop.f32.mrf.mxu0 }
 0x2e7   : > { %v2925_v43 = vpop.f32.mrf.mxu1 }
 0x2e8   : > { %v2874_v42 = vpop.f32.mrf.mxu0  ;;  %v2931_v29 = vadd.f32 %v2925_v43, %v2877_v41 }
 0x2e9   : > { %v4751_v27 = vpop.f32.mrf.mxu1 }
 0x2ea   : > { %v4746_v44 = vpop.f32.mrf.mxu0  ;;  %v5880_v45 = vadd.f32 %v2931_v29, %v5682_v36 }
 0x2eb   : > { %v5070_v47 = vpop.eup %5069  ;;  %v2928_v48 = vpop.f32.mrf.mxu1 }
 0x2ec   : > { %v2990_v49 = vpop.f32.mrf.mxu0  ;;  %v5072_v50 = vpop.eup %5071  ;;  %v2709_v51 = vadd.f32 1.0, %v5070_v47  ;;  %v4308_v52 = vmul.f32 -1.442695, %v5880_v45 }
 0x2ed   : > { %v2485_v53 = vmul.f32 %v5072_v50, %v5868_v58  ;;  %v4752_v54 = vpop.f32.mrf.mxu1 }
 0x2ee   : > { %v4757_v55 = vpop.f32.mrf.mxu0  ;;  %5073 = vrcp.f32 %v2709_v51 }
 0x2ef   : > { %5075 = vpow2.f32 %v4308_v52  ;;  %v3041_v56 = vpop.f32.mrf.mxu1  ;;  %2486 = vst.msk [vmem:[%s5730_s30 + $0x10] sm:$0xf] %vm688_vm4, %v2485_v53 }
 0x2f0   : > { %v2993_v46 = vpop.f32.mrf.mxu0  ;;  %v918_v36 = vpop.permute.xlu0 %917  ;;  %v3042_v62 = vadd.f32 %v3041_v56, %v2990_v49 }
 0x2f1   : > { %921 = vst.msk [vmem:[%s5730_s30] sm:$0xf] %vm920_vm5, %v918_v36  ;;  %v4763_v59 = vpop.f32.mrf.mxu1 }
 0x2f2   : > { %v4758_v57 = vpop.f32.mrf.mxu0 }
 0x2f3   : > { %v3044_v60 = vpop.f32.mrf.mxu1 }
 0x2f4   : > { %v3094_v61 = vpop.f32.mrf.mxu0 }
 0x2f5   : > { %v4764_v63 = vpop.f32.mrf.mxu1  ;;  %v3100_v58 = vadd.f32 %v3094_v61, %v3042_v62 }
 0x2f6   : > { %v4769_v0 = vpop.f32.mrf.mxu0 }
 0x2f7   : > { %v3148_v39 = vpop.f32.mrf.mxu1 }
 0x2f8   : > { %v3097_v1 = vpop.f32.mrf.mxu0  ;;  %v3154_v2 = vadd.f32 %v3148_v39, %v3100_v58 }
 0x2f9   : > { %v4775_v38 = vpop.f32.mrf.mxu1 }
 0x2fa   : > { %v4770_v10 = vpop.f32.mrf.mxu0  ;;  %v5894_v4 = vadd.f32 %v5891_v3, %v3154_v2 }
 0x2fb   : > { %v5074_v5 = vpop.eup %5073  ;;  %v3151_v6 = vpop.f32.mrf.mxu1 }
 0x2fc   : > { %v3217_v7 = vpop.f32.mrf.mxu0  ;;  %v5076_v8 = vpop.eup %5075  ;;  %v4317_v9 = vmul.f32 -1.442695, %v5894_v4  ;;  %v2712_v11 = vmul.f32 %v5074_v5, %v5875_v15 }
 0x2fd   : > { %v2936_v12 = vadd.f32 1.0, %v5076_v8  ;;  %v4776_v13 = vpop.f32.mrf.mxu1 }
 0x2fe   : > { %v4781_v37 = vpop.f32.mrf.mxu0  ;;  %5077 = vpow2.f32 %v4317_v9  ;;  %2714 = vrot.lane.b32.xlu0 %v2712_v11, %s5279_s12 }
 0x2ff   : > { %5079 = vrcp.f32 %v2936_v12  ;;  %v3268_v14 = vpop.f32.mrf.mxu1 }
 0x300   : > { %v3220_v40 = vpop.f32.mrf.mxu0  ;;  %v3269_v21 = vadd.f32 %v3268_v14, %v3217_v7 }
 0x301   : > { %v4787_v18 = vpop.f32.mrf.mxu1 }
 0x302   : > { %v4782_v17 = vpop.f32.mrf.mxu0 }
 0x303   : > { %v3271_v19 = vpop.f32.mrf.mxu1 }
 0x304   : > { %v3321_v20 = vpop.f32.mrf.mxu0 }
 0x305   : > { %v4788_v22 = vpop.f32.mrf.mxu1  ;;  %v3327_v24 = vadd.f32 %v3321_v20, %v3269_v21 }
 0x306   : > { %v4793_v23 = vpop.f32.mrf.mxu0 }
 0x307   : > { %v3375_v15 = vpop.f32.mrf.mxu1 }
 0x308   : > { %v3324_v25 = vpop.f32.mrf.mxu0  ;;  %v3381_v26 = vadd.f32 %v3375_v15, %v3327_v24 }
 0x309   : > { %v4799_v28 = vpop.f32.mrf.mxu1 }
 0x30a   : > { %v4794_v16 = vpop.f32.mrf.mxu0  ;;  %v5900_v30 = vadd.f32 %v5891_v3, %v3381_v26 }
 0x30b   : > { %v5078_v31 = vpop.eup %5077  ;;  %v3378_v32 = vpop.f32.mrf.mxu1 }
 0x30c   : > { %v3440_v33 = vpop.f32.mrf.mxu0  ;;  %v5080_v34 = vpop.eup %5079  ;;  %v3159_v35 = vadd.f32 1.0, %v5078_v31  ;;  %v4326_v41 = vmul.f32 -1.442695, %v5900_v30 }
 0x30d   : > { %v2939_v42 = vmul.f32 %v5080_v34, %v5880_v45  ;;  %v4800_v43 = vpop.f32.mrf.mxu1 }
 0x30e   : > { %v4805_v29 = vpop.f32.mrf.mxu0  ;;  %5081 = vrcp.f32 %v3159_v35 }
 0x30f   : > { %2940 = vst.msk [vmem:[%s5730_s30 + $0x14] sm:$0xf] %vm688_vm4, %v2939_v42  ;;  %5083 = vpow2.f32 %v4326_v41  ;;  %v3491_v27 = vpop.f32.mrf.mxu1 }
 0x310   : > { %v3443_v44 = vpop.f32.mrf.mxu0  ;;  %v1369_v47 = vpop.permute.xlu1 %1368  ;;  %v3492_v52 = vadd.f32 %v3491_v27, %v3440_v33 }
 0x311   : > { %1371 = vst.msk [vmem:[%s5730_s30 + $0x4] sm:$0xf] %vm920_vm5, %v1369_v47  ;;  %v4811_v49 = vpop.f32.mrf.mxu1 }
 0x312   : > { %v4806_v48 = vpop.f32.mrf.mxu0 }
 0x313   : > { %v3494_v50 = vpop.f32.mrf.mxu1 }
 0x314   : > { %v3544_v51 = vpop.f32.mrf.mxu0 }
 0x315   : > { %v4812_v53 = vpop.f32.mrf.mxu1  ;;  %v3550_v55 = vadd.f32 %v3544_v51, %v3492_v52 }
 0x316   : > { %v4817_v54 = vpop.f32.mrf.mxu0 }
 0x317   : > { %v3598_v46 = vpop.f32.mrf.mxu1 }
 0x318   : > { %v3547_v45 = vpop.f32.mrf.mxu0  ;;  %v3604_v56 = vadd.f32 %v3598_v46, %v3550_v55 }
 0x319   : > { %v4823_v57 = vpop.f32.mrf.mxu1 }
 0x31a   : > { %v4818_v36 = vpop.f32.mrf.mxu0  ;;  %v5909_v59 = vadd.f32 %v5891_v3, %v3604_v56 }
 0x31b   : > { %v5082_v60 = vpop.eup %5081  ;;  %v3601_v61 = vpop.f32.mrf.mxu1 }
 0x31c   : > { %v3667_v62 = vpop.f32.mrf.mxu0  ;;  %v5084_v63 = vpop.eup %5083  ;;  %v4335_v0 = vmul.f32 -1.442695, %v5909_v59  ;;  %v3162_v58 = vmul.f32 %v5082_v60, %v5894_v4 }
 0x31d   : > { %v3386_v1 = vadd.f32 1.0, %v5084_v63  ;;  %v4824_v39 = vpop.f32.mrf.mxu1 }
 0x31e   : > { %v4829_v2 = vpop.f32.mrf.mxu0  ;;  %5085 = vpow2.f32 %v4335_v0  ;;  %3164 = vrot.lane.b32.xlu1 %v3162_v58, %s5279_s12 }
 0x31f   : > { %5087 = vrcp.f32 %v3386_v1  ;;  %v3718_v38 = vpop.f32.mrf.mxu1 }
 0x320   : > { %v3670_v10 = vpop.f32.mrf.mxu0  ;;  %v3719_v9 = vadd.f32 %v3718_v38, %v3667_v62 }
 0x321   : > { %v4835_v6 = vpop.f32.mrf.mxu1 }
 0x322   : > { %v4830_v5 = vpop.f32.mrf.mxu0 }
 0x323   : > { %v3721_v7 = vpop.f32.mrf.mxu1 }
 0x324   : > { %v3771_v8 = vpop.f32.mrf.mxu0 }
 0x325   : > { %v4836_v11 = vpop.f32.mrf.mxu1  ;;  %v3777_v13 = vadd.f32 %v3771_v8, %v3719_v9 }
 0x326   : > { %v4841_v12 = vpop.f32.mrf.mxu0 }
 0x327   : > { %v3825_v4 = vpop.f32.mrf.mxu1 }
 0x328   : > { %v3774_v37 = vpop.f32.mrf.mxu0  ;;  %v3831_v40 = vadd.f32 %v3825_v4, %v3777_v13 }
 0x329   : > { %v4847_v17 = vpop.f32.mrf.mxu1 }
 0x32a   : > { %v4842_v14 = vpop.f32.mrf.mxu0  ;;  %v3832_v18 = vadd.f32 %v5891_v3, %v3831_v40 }
 0x32b   : > { %v5086_v19 = vpop.eup %5085  ;;  %v3828_v20 = vpop.f32.mrf.mxu1 }
 0x32c   : > { %v3890_v21 = vpop.f32.mrf.mxu0  ;;  %v5088_v22 = vpop.eup %5087  ;;  %v3609_v23 = vadd.f32 1.0, %v5086_v19  ;;  %v4344_v24 = vmul.f32 -1.442695, %v3832_v18 }
 0x32d   : > { %v3389_v25 = vmul.f32 %v5088_v22, %v5900_v30  ;;  %v4848_v15 = vpop.f32.mrf.mxu1 }
 0x32e   : > { %v4853_v26 = vpop.f32.mrf.mxu0  ;;  %5089 = vrcp.f32 %v3609_v23 }
 0x32f   : > { %3390 = vst.msk [vmem:[%s5730_s30 + $0x18] sm:$0xf] %vm688_vm4, %v3389_v25  ;;  %5091 = vpow2.f32 %v4344_v24  ;;  %v3941_v28 = vpop.f32.mrf.mxu1 }
 0x330   : > { %v3893_v16 = vpop.f32.mrf.mxu0  ;;  %v1819_v31 = vpop.permute.xlu0 %1818  ;;  %v3942_v41 = vadd.f32 %v3941_v28, %v3890_v21 }
 0x331   : > { %1821 = vst.msk [vmem:[%s5730_s30 + $0x8] sm:$0xf] %vm920_vm5, %v1819_v31  ;;  %v4859_v33 = vpop.f32.mrf.mxu1 }
 0x332   : > { %v4854_v32 = vpop.f32.mrf.mxu0 }
 0x333   : > { %v3944_v34 = vpop.f32.mrf.mxu1 }
 0x334   : > { %v3994_v35 = vpop.f32.mrf.mxu0 }
 0x335   : > { %v4860_v42 = vpop.f32.mrf.mxu1  ;;  %v4000_v29 = vadd.f32 %v3994_v35, %v3942_v41 }
 0x336   : > { %v4865_v43 = vpop.f32.mrf.mxu0 }
 0x337   : > { %v4048_v44 = vpop.f32.mrf.mxu1 }
 0x338   : > { %v3997_v30 = vpop.f32.mrf.mxu0  ;;  %v4054_v27 = vadd.f32 %v4048_v44, %v4000_v29 }
 0x339   : > { %v4871_v48 = vpop.f32.mrf.mxu1 }
 0x33a   : > { %v4866_v47 = vpop.f32.mrf.mxu0  ;;  %v4055_v49 = vadd.f32 %v5891_v3, %v4054_v27 }
 0x33b   : > { %v5090_v50 = vpop.eup %5089  ;;  %v4051_v51 = vpop.f32.mrf.mxu1 }
 0x33c   : > { %v5092_v52 = vpop.eup %5091  ;;  %v4353_v53 = vmul.f32 -1.442695, %v4055_v49  ;;  %v3612_v54 = vmul.f32 %v5090_v50, %v5909_v59 }
 0x33d   : > { %v3836_v55 = vadd.f32 1.0, %v5092_v52  ;;  %v4872_v45 = vpop.f32.mrf.mxu1 }
 0x33e   : > { %5093 = vpow2.f32 %v4353_v53  ;;  %3614 = vrot.lane.b32.xlu0 %v3612_v54, %s5279_s12 }
 0x33f   : > { %5095 = vrcp.f32 %v3836_v55 }
 0x34b   : > { %v5094_v46 = vpop.eup %5093 }
 0x34c   : > { %v5096_v56 = vpop.eup %5095  ;;  %v4059_v3 = vadd.f32 1.0, %v5094_v46 }
 0x34d   : > { %v3839_v36 = vmul.f32 %v5096_v56, %v3832_v18 }
 0x34e   : > { %5097 = vrcp.f32 %v4059_v3 }
 0x34f   : > { %3840 = vst.msk [vmem:[%s5730_s30 + $0x1c] sm:$0xf] %vm688_vm4, %v3839_v36 }
 0x350   : > { %v2269_v57 = vpop.permute.xlu1 %2268 }
 0x351   : > { %2271 = vst.msk [vmem:[%s5730_s30 + $0xc] sm:$0xf] %vm920_vm5, %v2269_v57 }
 0x35b   : > { %v5098_v59 = vpop.eup %5097 }
 0x35c   : > { %v4062_v60 = vmul.f32 %v5098_v59, %v4055_v49 }
 0x35e   : > { %4064 = vrot.lane.b32.xlu1 %v4062_v60, %s5279_s12  ;;  %s4069_s12 = scalar_lea.sflag [#allocation4], %s5431_s7 }
 0x370   : > { %v2715_v61 = vpop.permute.xlu0 %2714 }
 0x371   : > { %2717 = vst.msk [vmem:[%s5730_s30 + $0x10] sm:$0xf] %vm920_vm5, %v2715_v61 }
 0x390   : > { %v3165_v62 = vpop.permute.xlu1 %3164 }
 0x391   : > { %3167 = vst.msk [vmem:[%s5730_s30 + $0x14] sm:$0xf] %vm920_vm5, %v3165_v62 }
 0x3b0   : > { %v3615_v63 = vpop.permute.xlu0 %3614 }
 0x3b1   : > { %3617 = vst.msk [vmem:[%s5730_s30 + $0x18] sm:$0xf] %vm920_vm5, %v3615_v63 }
 0x3d0   : > { %v4065_v0 = vpop.permute.xlu1 %4064 }
 0x3d1   : > { %4067 = vst.msk [vmem:[%s5730_s30 + $0x1c] sm:$0xf] %vm920_vm5, %v4065_v0 }
 0x3d2   : > { %5193 = shalt.err (!%p5190_p5)
}
 0x3d3   : > { %s5194_s21 = scalar_lea.hbm %s5939_s27, 512  ;;  %s5198_s29 = scalar_lea.hbm %s5987_s4, 1024 }
 0x3d4   : > { %p5195_p10 = scmp.ne.s32.totalorder %s5939_s27, %s5194_s21  ;;  %p5199_p6 = scmp.lt.s32.totalorder %s5939_s27, %s5987_s4 }
 0x3d5   : > { %p5200_p12 = scmp.lt.s32.totalorder %s5198_s29, %s5194_s21 }
 0x3d6   : > { %p5196_p1 = pnand %p5195_p10, %p5404_p7 }
 0x3d7   : > { %p5201_p3 = por %p5200_p12, %p5199_p6 }
 0x3d8   : > { %p5197_p4 = pneg %p5196_p1 }
 0x3da   : > { %p5202_p8 = pnand %p5201_p3, %p5197_p4 }
 0x3dc   : > { %5205 = shalt.err (!%p5202_p8)
}
 0x3dd   : > { %4883 = dma.vmem_to_hbm [thread:$0]  (%p5404_p7), %s4086_s11, 512, %s5939_s27, %s4069_s12  }
 0x3de PF: > { %s4097_s6 = sand.u32 1, %s5244_s15   ;;  %p6001_p9 = scmp.ne.s32.totalorder %s5994_s26, 0 }
 0x3df   : > { %p6002_p11 = scmp.ge.s32.totalorder %s5264_s20, 2  ;;  %s4098_s10 = scalar_lea.sflag [#allocation4], %s4097_s6 }
 0x3e1   : > { %p4897_p2 = pnand %p6002_p11, %p6001_p9 }
 0x3e3   : > { %p4898_p13 = pneg %p4897_p2 }
 0x3e5   : > { %5239 = dma.done.wait (%p4898_p13), %s4098_s10, 512  }
 0x3e6   : > { %5241 = vsyncadd (%p4898_p13), %s4098_s10, 4294966784  ;;  %s21_s20 = sadd.s32 1, %s5264_s20   ;;  %s6003_s15 = smov %s5248_s16 }
 0x3e7   : > { %p18_p0 = scmp.ge.s32.totalorder %s21_s20, 4   ;;  %s6004_s16 = smov %s5252_s17 }
 0x3e8   : > { %s6005_s17 = smov %s5413_s9  ;;  %s6006_s18 = smov %s5260_s19 }
 0x3e9   : > { %s6007_s19 = smov %s6009_s28  ;;  %20 = sbr.rel (!%p18_p0) target bundleno = 7 (0x7), region = 95 }
 0x3ee   :  { %4103 = vsyncpa [#allocation3], 1 }
 0x3ef   :  { %4105 = vsyncpa [#allocation3 + $0x1], 1 }
 0x3f0   :  { %4106 = vsyncpa [#allocation6], 1 }
 0x3f1   :  { %4107 = vsyncpa [#allocation4], 1 }
 0x3f2   :  { %4109 = vsyncpa [#allocation4 + $0x1], 1 }

</bundles_post_ra>
